<compile_context>
chip_gen: v5e
topology: v5e:2x2
jax: 0.10.0
libtpu: 0.0.40
codegen_flags: <defaults>
</compile_context>

<pallas_src>
import jax
import jax.numpy as jnp
from jax import lax
from jax.experimental import pallas as pl
from jax.experimental.pallas import tpu as pltpu

LANE = 128


def _round_up(x, m):
    return ((x + m - 1) // m) * m


def _pick_block_rows(h_out, target):
    """Largest divisor of h_out that is <= target, so every row-block is full-sized."""
    best = 1
    for d in range(1, min(target, h_out) + 1):
        if h_out % d == 0:
            best = d
    return best


def _vmem_capacity_bytes():
    """Physical VMEM per TensorCore (generation aware), with a conservative fallback."""
    try:
        cap = getattr(pltpu.get_tpu_info(), "vmem_capacity_bytes", None)
        if cap:
            return int(cap)
    except Exception:
        pass
    return 64 * 1024 * 1024          # v7x per-core VMEM (smallest of the three generations)


# ----------------------------- Pallas kernel ---------------------------------

def make_basic_block_kernel(stride, br, n_rb, w_out, n_in_rows, cin_p, cout_p,
                            has_conv_shortcut, fuse_k1, fuse_k2):
    """Fused BasicBlock kernel for one (image, row-block) per grid step (static shapes)."""
    s = stride
    rows1 = (br + 2) * w_out          # conv1 rows per block (block rows + conv2 halo rows)
    rows2 = br * w_out                # final output rows per block

    def compute(xs_ref,   # (1, s*s*n_in_rows, wq, Cin_p) bf16 haloed, phase-decomposed slab
                w1_ref,   # (9*Cin_p, Cout_p)  bf16 conv1 weights, tap-major
                w2_ref,   # (9*Cout_p, Cout_p) bf16 conv2 weights, tap-major
                bn_ref,   # (4 or 6, Cout_p) f32  rows: s1,b1,s2,b2[,ss,bs]
                ws_ref,   # (Cin_p, Cout_p) bf16  1x1 shortcut weights (or None)
                out_ref,  # (1, br, w_out, Cout_p)
                o1s_ref): # (br+2, w_out+2, Cout_p) bf16 VMEM halo scratch
        rb = pl.program_id(1)

        def bnvec(k):
            return bn_ref[pl.ds(k, 1), :]                       # (1, Cout_p) f32

        # ---- conv1 over br+2 output rows (block rows + conv2 top/bottom halo rows) ----
        def conv1_tap(dy, dx):
            ph = (dy % s) * s + (dx % s)                        # stride-phase index
            r0 = ph * n_in_rows + dy // s                       # static in-slab offsets
            c0 = dx // s
            t = xs_ref[0, pl.ds(r0, br + 2), pl.ds(c0, w_out), :]
            return t.reshape(rows1, cin_p)

        if fuse_k1:
            x1 = jnp.concatenate([conv1_tap(dy, dx)
                                  for dy in range(3) for dx in range(3)], axis=-1)
            acc1 = jnp.dot(x1, w1_ref[...], preferred_element_type=jnp.float32)
        else:                                                   # per-tap K=C_p accumulation
            acc1 = jnp.zeros((rows1, cout_p), jnp.float32)
            for t in range(9):
                dy, dx = divmod(t, 3)
                acc1 = acc1 + jnp.dot(conv1_tap(dy, dx),
                                      w1_ref[pl.ds(t * cin_p, cin_p), :],
                                      preferred_element_type=jnp.float32)
        out1 = jnp.maximum(acc1 * bnvec(0) + bnvec(1), 0.0)     # BN1 + ReLU (f32)

        # ---- conv2 via haloed VMEM scratch; border-only zeroing every iteration -------
        o1s_ref[:, pl.ds(1, w_out), :] = (
            out1.astype(o1s_ref.dtype).reshape(br + 2, w_out, cout_p))
        zero_col = jnp.zeros((br + 2, 1, cout_p), o1s_ref.dtype)
        o1s_ref[:, pl.ds(0, 1), :] = zero_col                   # left padding column
        o1s_ref[:, pl.ds(w_out + 1, 1), :] = zero_col           # right padding column
        zero_row = jnp.zeros((1, w_out + 2, cout_p), o1s_ref.dtype)

        @pl.when(rb == 0)                                       # block touches image top
        def _():
            o1s_ref[pl.ds(0, 1), :, :] = zero_row

        @pl.when(rb == n_rb - 1)                                # block touches image bottom
        def _():
            o1s_ref[pl.ds(br + 1, 1), :, :] = zero_row

        def conv2_tap(dy, dx):
            t = o1s_ref[pl.ds(dy, br), pl.ds(dx, w_out), :]
            return t.reshape(rows2, cout_p)

        if fuse_k2:
            x2 = jnp.concatenate([conv2_tap(dy, dx)
                                  for dy in range(3) for dx in range(3)], axis=-1)
            acc2 = jnp.dot(x2, w2_ref[...], preferred_element_type=jnp.float32)
        else:
            acc2 = jnp.zeros((rows2, cout_p), jnp.float32)
            for t in range(9):
                dy, dx = divmod(t, 3)
                acc2 = acc2 + jnp.dot(conv2_tap(dy, dx),
                                      w2_ref[pl.ds(t * cout_p, cout_p), :],
                                      preferred_element_type=jnp.float32)
        out2 = acc2 * bnvec(2) + bnvec(3)                       # BN2 (f32)

        # ---- shortcut: x at the stride-s centers of this block's output rows ----------
        ph_c = (1 % s) * s + (1 % s)
        xc = xs_ref[0, pl.ds(ph_c * n_in_rows + 1 // s + 1, br), pl.ds(1 // s, w_out), :]
        xc = xc.reshape(rows2, cin_p)
        if has_conv_shortcut:
            sc = jnp.dot(xc, ws_ref[...], preferred_element_type=jnp.float32)
            sc = sc * bnvec(4) + bnvec(5)
        else:
            # TODO(synk): identity skip reuses the bf16 MXU activation (tiny systematic
            # rounding vs. an exact f32 skip); an extra f32 input stream would remove it.
            sc = xc.astype(jnp.float32)

        # ---- residual add + final ReLU (lane-dense store) -----------------------------
        out_ref[0] = (jnp.maximum(out2 + sc, 0.0)
                      .reshape(br, w_out, cout_p).astype(out_ref.dtype))

    if has_conv_shortcut:
        def kernel(xs_ref, w1_ref, w2_ref, bn_ref, ws_ref, out_ref, o1s_ref):
            compute(xs_ref, w1_ref, w2_ref, bn_ref, ws_ref, out_ref, o1s_ref)
    else:
        def kernel(xs_ref, w1_ref, w2_ref, bn_ref, out_ref, o1s_ref):
            compute(xs_ref, w1_ref, w2_ref, bn_ref, None, out_ref, o1s_ref)
    return kernel


# ----------------------------- wrapper (glue) ---------------------------------

def basic_block_pallas(x_nchw, p, stride, *, block_rows=8, out_dtype=jnp.float32):
    """BasicBlock.forward on an NCHW float32 input via the fused Pallas kernel."""
    cdt = jnp.bfloat16                                     # MXU feed dtype (f32 accumulation)
    n, cin, h, w = x_nchw.shape
    cout = p['w1'].shape[0]
    s = int(stride)
    h_out = (h + 2 - 3) // s + 1
    w_out = (w + 2 - 3) // s + 1
    has_conv_shortcut = (s != 1) or (cin != cout)

    cin_p = _round_up(cin, LANE)                           # lane-dense channel padding
    cout_p = _round_up(cout, LANE)

    br = _pick_block_rows(h_out, block_rows)               # output rows per grid step
    n_rb = h_out // br
    n_in_rows = br + 2 + 2 // s                            # slab rows per stride phase

    # Activations: NCHW -> NHWC, 1px spatial zero pad, channel pad, stride-phase
    # (space-to-depth) decomposition, then per-row-block haloed slabs so every conv1 tap
    # is a contiguous in-kernel window read and every block is self-contained.
    x = jnp.transpose(x_nchw, (0, 2, 3, 1)).astype(cdt)
    xp = jnp.pad(x, ((0, 0), (1, 1), (1, 1), (0, cin_p - cin)))
    hp, wp = h + 2, w + 2
    hq, wq = -(-hp // s), -(-wp // s)
    phases = []
    for py in range(s):
        for px in range(s):
            phx = xp[:, py::s, px::s, :]
            phx = jnp.pad(phx, ((0, 0), (0, hq - phx.shape[1]),
                                (0, wq - phx.shape[2]), (0, 0)))
            phases.append(phx)
    xq = jnp.stack(phases, axis=1)                         # (n, s*s, hq, wq, Cin_p)
    pad_b = max(0, h_out + 2 // s + 1 - hq)
    xq = jnp.pad(xq, ((0, 0), (0, 0), (1, pad_b), (0, 0), (0, 0)))
    xslab = jnp.stack([xq[:, :, rb * br: rb * br + n_in_rows] for rb in range(n_rb)],
                      axis=1)                              # (n, n_rb, s*s, n_in_rows, wq, Cin_p)
    xslab = xslab.reshape(n * n_rb, s * s * n_in_rows, wq, cin_p)

    # Weights: PyTorch OIHW -> tap-major (9*Cin_p, Cout_p), zero-padded, bf16.
    def conv3x3_weights(wt, ci, co, cip, cop):
        wt = jnp.transpose(wt, (2, 3, 1, 0)).astype(cdt)   # (3,3,ci,co)
        full = jnp.zeros((3, 3, cip, cop), cdt).at[:, :, :ci, :co].set(wt)
        return full.reshape(9 * cip, cop)

    w1f = conv3x3_weights(p['w1'], cin, cout, cin_p, cout_p)
    w2f = conv3x3_weights(p['w2'], cout, cout, cout_p, cout_p)

    def bn_row(v):
        return jnp.pad(v.astype(jnp.float32), (0, cout_p - cout)).reshape(1, cout_p)

    bn_rows = [bn_row(p['s1']), bn_row(p['b1']), bn_row(p['s2']), bn_row(p['b2'])]

    inputs = [xslab, w1f, w2f]
    in_specs = [
        pl.BlockSpec((1, s * s * n_in_rows, wq, cin_p),
                     lambda i, rb: (i * n_rb + rb, 0, 0, 0)),
        pl.BlockSpec((9 * cin_p, cout_p), lambda i, rb: (0, 0)),   # weights stay VMEM-resident
        pl.BlockSpec((9 * cout_p, cout_p), lambda i, rb: (0, 0)),
    ]
    if has_conv_shortcut:
        bn_rows += [bn_row(p['ss']), bn_row(p['bs'])]
        bn = jnp.concatenate(bn_rows, axis=0)                      # (6, Cout_p)
        wsf = (jnp.zeros((cin_p, cout_p), cdt)
               .at[:cin, :cout].set(jnp.transpose(p['ws'][:, :, 0, 0], (1, 0)).astype(cdt)))
        inputs += [bn, wsf]
        in_specs += [pl.BlockSpec((6, cout_p), lambda i, rb: (0, 0)),
                     pl.BlockSpec((cin_p, cout_p), lambda i, rb: (0, 0))]
    else:
        bn = jnp.concatenate(bn_rows, axis=0)                      # (4, Cout_p)
        inputs += [bn]
        in_specs += [pl.BlockSpec((4, cout_p), lambda i, rb: (0, 0))]

    # Fused K=9*C matmul only while a single tap underfills the MXU depth; per-tap otherwise.
    fuse_k1 = cin_p <= 128
    fuse_k2 = cout_p <= 128

    kernel = make_basic_block_kernel(s, br, n_rb, w_out, n_in_rows, cin_p, cout_p,
                                     has_conv_shortcut, fuse_k1, fuse_k2)

    # ---- generation-aware VMEM budget --------------------------------------------------
    out_isz = jnp.dtype(out_dtype).itemsize
    rows1, rows2 = (br + 2) * w_out, br * w_out
    blk_bytes = (s * s * n_in_rows * wq * cin_p * 2
                 + (9 * cin_p + 9 * cout_p) * cout_p * 2
                 + bn.shape[0] * cout_p * 4
                 + (cin_p * cout_p * 2 if has_conv_shortcut else 0)
                 + rows2 * cout_p * out_isz)
    interm = ((rows1 * 9 * cin_p * 2 if fuse_k1 else 0)
              + (rows2 * 9 * cout_p * 2 if fuse_k2 else 0)
              + rows1 * cout_p * 4 * 2 + rows2 * cout_p * 4 * 3)
    scratch_bytes = (br + 2) * (w_out + 2) * cout_p * 2
    need = 2 * blk_bytes + scratch_bytes + interm            # 2x: double-buffered pipeline
    cap = _vmem_capacity_bytes() * 3 // 4
    vmem_limit = min(cap, max(32 * 1024 * 1024, int(need * 1.5) + (4 << 20)))

    flops = n * h_out * w_out * (18 * cin_p * cout_p + 18 * cout_p * cout_p
                                 + (2 * cin_p * cout_p if has_conv_shortcut else 0))
    bytes_accessed = int(sum(int(a.size) * a.dtype.itemsize for a in inputs)
                         + n * h_out * w_out * cout_p * out_isz)

    out = pl.pallas_call(
        kernel,
        out_shape=jax.ShapeDtypeStruct((n, h_out, w_out, cout_p), out_dtype),
        grid=(n, n_rb),                                      # (image, spatial row-block)
        in_specs=in_specs,
        out_specs=pl.BlockSpec((1, br, w_out, cout_p), lambda i, rb: (i, rb, 0, 0)),
        scratch_shapes=[pltpu.VMEM((br + 2, w_out + 2, cout_p), cdt)],
        compiler_params=pltpu.CompilerParams(
            dimension_semantics=("parallel", "parallel"),    # megacore on both axes (v7x)
            vmem_limit_bytes=vmem_limit),
        cost_estimate=pl.CostEstimate(flops=flops, transcendentals=0,
                                      bytes_accessed=bytes_accessed),
    )(*inputs)

    out = out[:, :, :, :cout]                                # drop channel padding
    return jnp.transpose(out, (0, 3, 1, 2))                  # NHWC -> NCHW


# ----------------------------- pure-JAX reference ------------------------------

def basic_block_ref(x_nchw, p, stride):
    dn = ('NCHW', 'OIHW', 'NCHW')

    def bn(y, scale, bias):
        return y * scale[None, :, None, None] + bias[None, :, None, None]

    cin = x_nchw.shape[1]
    cout = p['w1'].shape[0]
    has_conv_shortcut = (stride != 1) or (cin != cout)

    y = lax.conv_general_dilated(x_nchw, p['w1'], (stride, stride), ((1, 1), (1, 1)),
                                 dimension_numbers=dn, precision=lax.Precision.HIGHEST)
    y = jax.nn.relu(bn(y, p['s1'], p['b1']))
    y = lax.conv_general_dilated(y, p['w2'], (1, 1), ((1, 1), (1, 1)),
                                 dimension_numbers=dn, precision=lax.Precision.HIGHEST)
    y = bn(y, p['s2'], p['b2'])
    if has_conv_shortcut:
        sc = lax.conv_general_dilated(x_nchw, p['ws'], (stride, stride), ((0, 0), (0, 0)),
                                      dimension_numbers=dn, precision=lax.Precision.HIGHEST)
        sc = bn(sc, p['ss'], p['bs'])
    else:
        sc = x_nchw
    return jax.nn.relu(y + sc)


# ----------------------------- parameter init ----------------------------------

def init_params(key, in_planes, planes):
    ks = jax.random.split(key, 16)
    eps = 1e-5

    def fold_bn(kg, kb, km, kv, c):
        gamma = 1.0 + 0.1 * jax.random.normal(kg, (c,), jnp.float32)
        beta = 0.1 * jax.random.normal(kb, (c,), jnp.float32)
        mean = 0.1 * jax.random.normal(km, (c,), jnp.float32)
        var = jax.random.uniform(kv, (c,), jnp.float32, 0.5, 1.5)
        scale = gamma / jnp.sqrt(var + eps)
        bias = beta - mean * scale
        return scale, bias

    p = {}
    p['w1'] = 0.2 * jax.random.normal(ks[0], (planes, in_planes, 3, 3), jnp.float32)
    p['s1'], p['b1'] = fold_bn(ks[1], ks[2], ks[3], ks[4], planes)
    p['w2'] = 0.2 * jax.random.normal(ks[5], (planes, planes, 3, 3), jnp.float32)
    p['s2'], p['b2'] = fold_bn(ks[6], ks[7], ks[8], ks[9], planes)
    p['ws'] = 0.2 * jax.random.normal(ks[10], (planes, in_planes, 1, 1), jnp.float32)
    p['ss'], p['bs'] = fold_bn(ks[11], ks[12], ks[13], ks[14], planes)
    return p


# ----------------------------- demo --------------------------------------------

if __name__ == "__main__":
    key = jax.random.PRNGKey(0)
    k1, k2, k3, k4, k5, k6 = jax.random.split(key, 6)

    # bf16 MXU inputs vs f32-HIGHEST reference -> widened tolerance (a real indexing
    # bug would produce O(1) errors, far above this threshold).
    TOL = 1e-1

    # Case 1: conv+BN shortcut branch (stride=2, in_planes != planes); single row-block.
    x_a = jax.random.normal(k1, (2, 4, 16, 16), jnp.float32)
    p_a = init_params(k2, 4, 8)
    out_a = jax.block_until_ready(basic_block_pallas(x_a, p_a, 2, block_rows=8))
    ref_a = jax.block_until_ready(basic_block_ref(x_a, p_a, 2))
    assert out_a.shape == ref_a.shape == (2, 8, 8, 8)
    err_a = float(jnp.max(jnp.abs(out_a - ref_a)))
    assert err_a < TOL, f"conv-shortcut max abs err = {err_a}"

    # Case 2: identity shortcut (stride=1); two row-blocks -> exercises the conv2 halo
    # hand-off across spatial blocks (top/bottom zero rows + recomputed neighbor rows).
    x_b = jax.random.normal(k3, (2, 8, 16, 16), jnp.float32)
    p_b = init_params(k4, 8, 8)
    out_b = jax.block_until_ready(basic_block_pallas(x_b, p_b, 1, block_rows=8))
    ref_b = jax.block_until_ready(basic_block_ref(x_b, p_b, 1))
    assert out_b.shape == ref_b.shape == (2, 8, 16, 16)
    err_b = float(jnp.max(jnp.abs(out_b - ref_b)))
    assert err_b < TOL, f"identity max abs err = {err_b}"

    # Case 3: stride=2 with two row-blocks -> exercises the stride-phase slabs + halo
    # logic together on the strided path.
    x_c = jax.random.normal(k5, (1, 4, 32, 32), jnp.float32)
    p_c = init_params(k6, 4, 8)
    out_c = jax.block_until_ready(basic_block_pallas(x_c, p_c, 2, block_rows=8))
    ref_c = jax.block_until_ready(basic_block_ref(x_c, p_c, 2))
    assert out_c.shape == ref_c.shape == (1, 8, 16, 16)
    err_c = float(jnp.max(jnp.abs(out_c - ref_c)))
    assert err_c < TOL, f"strided multi-block max abs err = {err_c}"

    print("KERNEL_OK")
</pallas_src>

<mosaic_0001>
module attributes {stable_mosaic.version = 11 : i64} {
  func.func @kernel(%arg0: i32, %arg1: i32, %arg2: memref<1x44x9x128xbf16, #tpu.memory_space<vmem>>, %arg3: memref<1152x128xbf16, #tpu.memory_space<vmem>>, %arg4: memref<1152x128xbf16, #tpu.memory_space<vmem>>, %arg5: memref<6x128xf32, #tpu.memory_space<vmem>>, %arg6: memref<128x128xbf16, #tpu.memory_space<vmem>>, %arg7: memref<1x8x8x128xf32, #tpu.memory_space<vmem>>, %arg8: memref<10x10x128xbf16, #tpu.memory_space<vmem>>) attributes {dimension_semantics = [#tpu.dimension_semantics<parallel>, #tpu.dimension_semantics<parallel>], iteration_bounds = array<i64: 2, 1>, scalar_prefetch = 0 : i64, scratch_operands = 1 : i64, tpu.core_type = #tpu.core_type<tc>, window_params = [{transform_indices = @transform_0, window_bounds = array<i64: 1, 44, 9, 128>}, {pipeline_mode = #tpu.pipeline_mode<synchronous>, transform_indices = @transform_1, window_bounds = array<i64: 1152, 128>}, {pipeline_mode = #tpu.pipeline_mode<synchronous>, transform_indices = @transform_2, window_bounds = array<i64: 1152, 128>}, {pipeline_mode = #tpu.pipeline_mode<synchronous>, transform_indices = @transform_3, window_bounds = array<i64: 6, 128>}, {pipeline_mode = #tpu.pipeline_mode<synchronous>, transform_indices = @transform_4, window_bounds = array<i64: 128, 128>}, {transform_indices = @transform_5, window_bounds = array<i64: 1, 8, 8, 128>}]} {
    %c0 = arith.constant 0 : index
    %c0_0 = arith.constant 0 : index
    %c0_1 = arith.constant 0 : index
    %c0_2 = arith.constant 0 : index
    %0 = vector.load %arg2[%c0, %c0_0, %c0_1, %c0_2] : memref<1x44x9x128xbf16, #tpu.memory_space<vmem>>, vector<1x10x8x128xbf16>
    %1 = vector.shape_cast %0 : vector<1x10x8x128xbf16> to vector<10x8x128xbf16>
    %2 = vector.shape_cast %1 : vector<10x8x128xbf16> to vector<80x128xbf16>
    %c0_3 = arith.constant 0 : index
    %c11 = arith.constant 11 : index
    %c0_4 = arith.constant 0 : index
    %c0_5 = arith.constant 0 : index
    %3 = vector.load %arg2[%c0_3, %c11, %c0_4, %c0_5] : memref<1x44x9x128xbf16, #tpu.memory_space<vmem>>, vector<1x10x8x128xbf16>
    %4 = vector.shape_cast %3 : vector<1x10x8x128xbf16> to vector<10x8x128xbf16>
    %5 = vector.shape_cast %4 : vector<10x8x128xbf16> to vector<80x128xbf16>
    %c0_6 = arith.constant 0 : index
    %c0_7 = arith.constant 0 : index
    %c1 = arith.constant 1 : index
    %c0_8 = arith.constant 0 : index
    %6 = vector.load %arg2[%c0_6, %c0_7, %c1, %c0_8] : memref<1x44x9x128xbf16, #tpu.memory_space<vmem>>, vector<1x10x8x128xbf16>
    %7 = vector.shape_cast %6 : vector<1x10x8x128xbf16> to vector<10x8x128xbf16>
    %8 = vector.shape_cast %7 : vector<10x8x128xbf16> to vector<80x128xbf16>
    %c0_9 = arith.constant 0 : index
    %c22 = arith.constant 22 : index
    %c0_10 = arith.constant 0 : index
    %c0_11 = arith.constant 0 : index
    %9 = vector.load %arg2[%c0_9, %c22, %c0_10, %c0_11] : memref<1x44x9x128xbf16, #tpu.memory_space<vmem>>, vector<1x10x8x128xbf16>
    %10 = vector.shape_cast %9 : vector<1x10x8x128xbf16> to vector<10x8x128xbf16>
    %11 = vector.shape_cast %10 : vector<10x8x128xbf16> to vector<80x128xbf16>
    %c0_12 = arith.constant 0 : index
    %c33 = arith.constant 33 : index
    %c0_13 = arith.constant 0 : index
    %c0_14 = arith.constant 0 : index
    %12 = vector.load %arg2[%c0_12, %c33, %c0_13, %c0_14] : memref<1x44x9x128xbf16, #tpu.memory_space<vmem>>, vector<1x10x8x128xbf16>
    %13 = vector.shape_cast %12 : vector<1x10x8x128xbf16> to vector<10x8x128xbf16>
    %14 = vector.shape_cast %13 : vector<10x8x128xbf16> to vector<80x128xbf16>
    %c0_15 = arith.constant 0 : index
    %c22_16 = arith.constant 22 : index
    %c1_17 = arith.constant 1 : index
    %c0_18 = arith.constant 0 : index
    %15 = vector.load %arg2[%c0_15, %c22_16, %c1_17, %c0_18] : memref<1x44x9x128xbf16, #tpu.memory_space<vmem>>, vector<1x10x8x128xbf16>
    %16 = vector.shape_cast %15 : vector<1x10x8x128xbf16> to vector<10x8x128xbf16>
    %17 = vector.shape_cast %16 : vector<10x8x128xbf16> to vector<80x128xbf16>
    %c0_19 = arith.constant 0 : index
    %c1_20 = arith.constant 1 : index
    %c0_21 = arith.constant 0 : index
    %c0_22 = arith.constant 0 : index
    %18 = vector.load %arg2[%c0_19, %c1_20, %c0_21, %c0_22] : memref<1x44x9x128xbf16, #tpu.memory_space<vmem>>, vector<1x10x8x128xbf16>
    %19 = vector.shape_cast %18 : vector<1x10x8x128xbf16> to vector<10x8x128xbf16>
    %20 = vector.shape_cast %19 : vector<10x8x128xbf16> to vector<80x128xbf16>
    %c0_23 = arith.constant 0 : index
    %c12 = arith.constant 12 : index
    %c0_24 = arith.constant 0 : index
    %c0_25 = arith.constant 0 : index
    %21 = vector.load %arg2[%c0_23, %c12, %c0_24, %c0_25] : memref<1x44x9x128xbf16, #tpu.memory_space<vmem>>, vector<1x10x8x128xbf16>
    %22 = vector.shape_cast %21 : vector<1x10x8x128xbf16> to vector<10x8x128xbf16>
    %23 = vector.shape_cast %22 : vector<10x8x128xbf16> to vector<80x128xbf16>
    %c0_26 = arith.constant 0 : index
    %c1_27 = arith.constant 1 : index
    %c1_28 = arith.constant 1 : index
    %c0_29 = arith.constant 0 : index
    %24 = vector.load %arg2[%c0_26, %c1_27, %c1_28, %c0_29] : memref<1x44x9x128xbf16, #tpu.memory_space<vmem>>, vector<1x10x8x128xbf16>
    %25 = vector.shape_cast %24 : vector<1x10x8x128xbf16> to vector<10x8x128xbf16>
    %26 = vector.shape_cast %25 : vector<10x8x128xbf16> to vector<80x128xbf16>
    %27 = tpu.concatenate %2, %5, %8, %11, %14, %17, %20, %23, %26 in 1 : vector<80x128xbf16>, vector<80x128xbf16>, vector<80x128xbf16>, vector<80x128xbf16>, vector<80x128xbf16>, vector<80x128xbf16>, vector<80x128xbf16>, vector<80x128xbf16>, vector<80x128xbf16> -> vector<80x1152xbf16>
    %c0_30 = arith.constant 0 : index
    %c0_31 = arith.constant 0 : index
    %28 = vector.load %arg3[%c0_30, %c0_31] : memref<1152x128xbf16, #tpu.memory_space<vmem>>, vector<1152x128xbf16>
    %cst = arith.constant dense<0.000000e+00> : vector<80x128xf32>
    %29 = tpu.matmul %27, %28, %cst {dimension_numbers = #tpu.dot_dimension_numbers<[1], [0], [0], [1], [0, 0, 1, 1], [], []>} : vector<80x1152xbf16>, vector<1152x128xbf16>, vector<80x128xf32> -> vector<80x128xf32>
    %c0_32 = arith.constant 0 : index
    %c0_33 = arith.constant 0 : index
    %30 = vector.load %arg5[%c0_32, %c0_33] : memref<6x128xf32, #tpu.memory_space<vmem>>, vector<1x128xf32>
    %31 = vector.broadcast %30 : vector<1x128xf32> to vector<80x128xf32>
    %32 = arith.mulf %29, %31 : vector<80x128xf32>
    %c1_34 = arith.constant 1 : index
    %c0_35 = arith.constant 0 : index
    %33 = vector.load %arg5[%c1_34, %c0_35] : memref<6x128xf32, #tpu.memory_space<vmem>>, vector<1x128xf32>
    %34 = vector.broadcast %33 : vector<1x128xf32> to vector<80x128xf32>
    %35 = arith.addf %32, %34 : vector<80x128xf32>
    %cst_36 = arith.constant 0.000000e+00 : f32
    %36 = vector.broadcast %cst_36 : f32 to vector<80x128xf32>
    %37 = arith.maximumf %35, %36 : vector<80x128xf32>
    %38 = arith.truncf %37 : vector<80x128xf32> to vector<80x128xbf16>
    %39 = vector.shape_cast %38 : vector<80x128xbf16> to vector<10x8x128xbf16>
    %c0_37 = arith.constant 0 : index
    %c1_38 = arith.constant 1 : index
    %c0_39 = arith.constant 0 : index
    %40 = vector.load %arg8[%c0_37, %c1_38, %c0_39] : memref<10x10x128xbf16, #tpu.memory_space<vmem>>, vector<10x8x128xbf16>
    tpu.vector_store %arg8[%c0_37, %c1_38, %c0_39], %39 {strides = array<i32>} : memref<10x10x128xbf16, #tpu.memory_space<vmem>>, vector<10x8x128xbf16>,
    %cst_40 = arith.constant 0.000000e+00 : bf16
    %41 = vector.broadcast %cst_40 : bf16 to vector<10x1x128xbf16>
    %c0_41 = arith.constant 0 : index
    %c0_42 = arith.constant 0 : index
    %c0_43 = arith.constant 0 : index
    %42 = vector.load %arg8[%c0_41, %c0_42, %c0_43] : memref<10x10x128xbf16, #tpu.memory_space<vmem>>, vector<10x1x128xbf16>
    tpu.vector_store %arg8[%c0_41, %c0_42, %c0_43], %41 {strides = array<i32>} : memref<10x10x128xbf16, #tpu.memory_space<vmem>>, vector<10x1x128xbf16>,
    %c0_44 = arith.constant 0 : index
    %c9 = arith.constant 9 : index
    %c0_45 = arith.constant 0 : index
    %43 = vector.load %arg8[%c0_44, %c9, %c0_45] : memref<10x10x128xbf16, #tpu.memory_space<vmem>>, vector<10x1x128xbf16>
    tpu.vector_store %arg8[%c0_44, %c9, %c0_45], %41 {strides = array<i32>} : memref<10x10x128xbf16, #tpu.memory_space<vmem>>, vector<10x1x128xbf16>,
    %cst_46 = arith.constant 0.000000e+00 : bf16
    %44 = vector.broadcast %cst_46 : bf16 to vector<1x10x128xbf16>
    %c0_i32 = arith.constant 0 : i32
    %45 = arith.cmpi eq, %arg1, %c0_i32 : i32
    %46 = arith.extui %45 : i1 to i32
    %c0_i32_47 = arith.constant 0 : i32
    %47 = arith.cmpi ne, %46, %c0_i32_47 : i32
    scf.if %47 {
      %c0_95 = arith.constant 0 : index
      %c0_96 = arith.constant 0 : index
      %c0_97 = arith.constant 0 : index
      %96 = vector.load %arg8[%c0_95, %c0_96, %c0_97] : memref<10x10x128xbf16, #tpu.memory_space<vmem>>, vector<1x10x128xbf16>
      tpu.vector_store %arg8[%c0_95, %c0_96, %c0_97], %44 {strides = array<i32>} : memref<10x10x128xbf16, #tpu.memory_space<vmem>>, vector<1x10x128xbf16>,
    } else {
    }
    %c0_i32_48 = arith.constant 0 : i32
    %48 = arith.cmpi eq, %arg1, %c0_i32_48 : i32
    %49 = arith.extui %48 : i1 to i32
    %c0_i32_49 = arith.constant 0 : i32
    %50 = arith.cmpi ne, %49, %c0_i32_49 : i32
    scf.if %50 {
      %c9_95 = arith.constant 9 : index
      %c0_96 = arith.constant 0 : index
      %c0_97 = arith.constant 0 : index
      %96 = vector.load %arg8[%c9_95, %c0_96, %c0_97] : memref<10x10x128xbf16, #tpu.memory_space<vmem>>, vector<1x10x128xbf16>
      tpu.vector_store %arg8[%c9_95, %c0_96, %c0_97], %44 {strides = array<i32>} : memref<10x10x128xbf16, #tpu.memory_space<vmem>>, vector<1x10x128xbf16>,
    } else {
    }
    %c0_50 = arith.constant 0 : index
    %c0_51 = arith.constant 0 : index
    %c0_52 = arith.constant 0 : index
    %51 = vector.load %arg8[%c0_50, %c0_51, %c0_52] : memref<10x10x128xbf16, #tpu.memory_space<vmem>>, vector<8x8x128xbf16>
    %52 = vector.shape_cast %51 : vector<8x8x128xbf16> to vector<64x128xbf16>
    %c0_53 = arith.constant 0 : index
    %c1_54 = arith.constant 1 : index
    %c0_55 = arith.constant 0 : index
    %53 = vector.load %arg8[%c0_53, %c1_54, %c0_55] : memref<10x10x128xbf16, #tpu.memory_space<vmem>>, vector<8x8x128xbf16>
    %54 = vector.shape_cast %53 : vector<8x8x128xbf16> to vector<64x128xbf16>
    %c0_56 = arith.constant 0 : index
    %c2 = arith.constant 2 : index
    %c0_57 = arith.constant 0 : index
    %55 = vector.load %arg8[%c0_56, %c2, %c0_57] : memref<10x10x128xbf16, #tpu.memory_space<vmem>>, vector<8x8x128xbf16>
    %56 = vector.shape_cast %55 : vector<8x8x128xbf16> to vector<64x128xbf16>
    %c1_58 = arith.constant 1 : index
    %c0_59 = arith.constant 0 : index
    %c0_60 = arith.constant 0 : index
    %57 = vector.load %arg8[%c1_58, %c0_59, %c0_60] : memref<10x10x128xbf16, #tpu.memory_space<vmem>>, vector<8x8x128xbf16>
    %58 = vector.shape_cast %57 : vector<8x8x128xbf16> to vector<64x128xbf16>
    %c1_61 = arith.constant 1 : index
    %c1_62 = arith.constant 1 : index
    %c0_63 = arith.constant 0 : index
    %59 = vector.load %arg8[%c1_61, %c1_62, %c0_63] : memref<10x10x128xbf16, #tpu.memory_space<vmem>>, vector<8x8x128xbf16>
    %60 = vector.shape_cast %59 : vector<8x8x128xbf16> to vector<64x128xbf16>
    %c1_64 = arith.constant 1 : index
    %c2_65 = arith.constant 2 : index
    %c0_66 = arith.constant 0 : index
    %61 = vector.load %arg8[%c1_64, %c2_65, %c0_66] : memref<10x10x128xbf16, #tpu.memory_space<vmem>>, vector<8x8x128xbf16>
    %62 = vector.shape_cast %61 : vector<8x8x128xbf16> to vector<64x128xbf16>
    %c2_67 = arith.constant 2 : index
    %c0_68 = arith.constant 0 : index
    %c0_69 = arith.constant 0 : index
    %63 = vector.load %arg8[%c2_67, %c0_68, %c0_69] : memref<10x10x128xbf16, #tpu.memory_space<vmem>>, vector<8x8x128xbf16>
    %64 = vector.shape_cast %63 : vector<8x8x128xbf16> to vector<64x128xbf16>
    %c2_70 = arith.constant 2 : index
    %c1_71 = arith.constant 1 : index
    %c0_72 = arith.constant 0 : index
    %65 = vector.load %arg8[%c2_70, %c1_71, %c0_72] : memref<10x10x128xbf16, #tpu.memory_space<vmem>>, vector<8x8x128xbf16>
    %66 = vector.shape_cast %65 : vector<8x8x128xbf16> to vector<64x128xbf16>
    %c2_73 = arith.constant 2 : index
    %c2_74 = arith.constant 2 : index
    %c0_75 = arith.constant 0 : index
    %67 = vector.load %arg8[%c2_73, %c2_74, %c0_75] : memref<10x10x128xbf16, #tpu.memory_space<vmem>>, vector<8x8x128xbf16>
    %68 = vector.shape_cast %67 : vector<8x8x128xbf16> to vector<64x128xbf16>
    %69 = tpu.concatenate %52, %54, %56, %58, %60, %62, %64, %66, %68 in 1 : vector<64x128xbf16>, vector<64x128xbf16>, vector<64x128xbf16>, vector<64x128xbf16>, vector<64x128xbf16>, vector<64x128xbf16>, vector<64x128xbf16>, vector<64x128xbf16>, vector<64x128xbf16> -> vector<64x1152xbf16>
    %c0_76 = arith.constant 0 : index
    %c0_77 = arith.constant 0 : index
    %70 = vector.load %arg4[%c0_76, %c0_77] : memref<1152x128xbf16, #tpu.memory_space<vmem>>, vector<1152x128xbf16>
    %cst_78 = arith.constant dense<0.000000e+00> : vector<64x128xf32>
    %71 = tpu.matmul %69, %70, %cst_78 {dimension_numbers = #tpu.dot_dimension_numbers<[1], [0], [0], [1], [0, 0, 1, 1], [], []>} : vector<64x1152xbf16>, vector<1152x128xbf16>, vector<64x128xf32> -> vector<64x128xf32>
    %c2_79 = arith.constant 2 : index
    %c0_80 = arith.constant 0 : index
    %72 = vector.load %arg5[%c2_79, %c0_80] : memref<6x128xf32, #tpu.memory_space<vmem>>, vector<1x128xf32>
    %73 = vector.broadcast %72 : vector<1x128xf32> to vector<64x128xf32>
    %74 = arith.mulf %71, %73 : vector<64x128xf32>
    %c3 = arith.constant 3 : index
    %c0_81 = arith.constant 0 : index
    %75 = vector.load %arg5[%c3, %c0_81] : memref<6x128xf32, #tpu.memory_space<vmem>>, vector<1x128xf32>
    %76 = vector.broadcast %75 : vector<1x128xf32> to vector<64x128xf32>
    %77 = arith.addf %74, %76 : vector<64x128xf32>
    %c0_82 = arith.constant 0 : index
    %c34 = arith.constant 34 : index
    %c0_83 = arith.constant 0 : index
    %c0_84 = arith.constant 0 : index
    %78 = vector.load %arg2[%c0_82, %c34, %c0_83, %c0_84] : memref<1x44x9x128xbf16, #tpu.memory_space<vmem>>, vector<1x8x8x128xbf16>
    %79 = vector.shape_cast %78 : vector<1x8x8x128xbf16> to vector<8x8x128xbf16>
    %80 = vector.shape_cast %79 : vector<8x8x128xbf16> to vector<64x128xbf16>
    %c0_85 = arith.constant 0 : index
    %c0_86 = arith.constant 0 : index
    %81 = vector.load %arg6[%c0_85, %c0_86] : memref<128x128xbf16, #tpu.memory_space<vmem>>, vector<128x128xbf16>
    %cst_87 = arith.constant dense<0.000000e+00> : vector<64x128xf32>
    %82 = tpu.matmul %80, %81, %cst_87 {dimension_numbers = #tpu.dot_dimension_numbers<[1], [0], [0], [1], [0, 0, 1, 1], [], []>} : vector<64x128xbf16>, vector<128x128xbf16>, vector<64x128xf32> -> vector<64x128xf32>
    %c4 = arith.constant 4 : index
    %c0_88 = arith.constant 0 : index
    %83 = vector.load %arg5[%c4, %c0_88] : memref<6x128xf32, #tpu.memory_space<vmem>>, vector<1x128xf32>
    %84 = vector.broadcast %83 : vector<1x128xf32> to vector<64x128xf32>
    %85 = arith.mulf %82, %84 : vector<64x128xf32>
    %c5 = arith.constant 5 : index
    %c0_89 = arith.constant 0 : index
    %86 = vector.load %arg5[%c5, %c0_89] : memref<6x128xf32, #tpu.memory_space<vmem>>, vector<1x128xf32>
    %87 = vector.broadcast %86 : vector<1x128xf32> to vector<64x128xf32>
    %88 = arith.addf %85, %87 : vector<64x128xf32>
    %89 = arith.addf %77, %88 : vector<64x128xf32>
    %cst_90 = arith.constant 0.000000e+00 : f32
    %90 = vector.broadcast %cst_90 : f32 to vector<64x128xf32>
    %91 = arith.maximumf %89, %90 : vector<64x128xf32>
    %92 = vector.shape_cast %91 : vector<64x128xf32> to vector<8x8x128xf32>
    %c0_91 = arith.constant 0 : index
    %c0_92 = arith.constant 0 : index
    %c0_93 = arith.constant 0 : index
    %c0_94 = arith.constant 0 : index
    %93 = vector.load %arg7[%c0_91, %c0_92, %c0_93, %c0_94] : memref<1x8x8x128xf32, #tpu.memory_space<vmem>>, vector<1x8x8x128xf32>
    %94 = vector.shape_cast %93 : vector<1x8x8x128xf32> to vector<8x8x128xf32>
    %95 = vector.shape_cast %92 : vector<8x8x128xf32> to vector<1x8x8x128xf32>
    tpu.vector_store %arg7[%c0_91, %c0_92, %c0_93, %c0_94], %95 {strides = array<i32>} : memref<1x8x8x128xf32, #tpu.memory_space<vmem>>, vector<1x8x8x128xf32>,
    return
  }
  func.func @transform_0(%arg0: i32, %arg1: i32) -> (i32, i32, i32, i32) {
    %c1_i32 = arith.constant 1 : i32
    %0 = arith.muli %arg0, %c1_i32 : i32
    %1 = arith.addi %0, %arg1 : i32
    %c0_i32 = arith.constant 0 : i32
    %c0_i32_0 = arith.constant 0 : i32
    %c0_i32_1 = arith.constant 0 : i32
    %c0_i32_2 = arith.constant 0 : i32
    return %1, %c0_i32, %c0_i32_0, %c0_i32_1 : i32, i32, i32, i32
  }
  func.func @transform_1(%arg0: i32, %arg1: i32) -> (i32, i32) {
    %c0_i32 = arith.constant 0 : i32
    %c0_i32_0 = arith.constant 0 : i32
    %c0_i32_1 = arith.constant 0 : i32
    return %c0_i32, %c0_i32_0 : i32, i32
  }
  func.func @transform_2(%arg0: i32, %arg1: i32) -> (i32, i32) {
    %c0_i32 = arith.constant 0 : i32
    %c0_i32_0 = arith.constant 0 : i32
    %c0_i32_1 = arith.constant 0 : i32
    return %c0_i32, %c0_i32_0 : i32, i32
  }
  func.func @transform_3(%arg0: i32, %arg1: i32) -> (i32, i32) {
    %c0_i32 = arith.constant 0 : i32
    %c0_i32_0 = arith.constant 0 : i32
    %c0_i32_1 = arith.constant 0 : i32
    return %c0_i32, %c0_i32_0 : i32, i32
  }
  func.func @transform_4(%arg0: i32, %arg1: i32) -> (i32, i32) {
    %c0_i32 = arith.constant 0 : i32
    %c0_i32_0 = arith.constant 0 : i32
    %c0_i32_1 = arith.constant 0 : i32
    return %c0_i32, %c0_i32_0 : i32, i32
  }
  func.func @transform_5(%arg0: i32, %arg1: i32) -> (i32, i32, i32, i32) {
    %c0_i32 = arith.constant 0 : i32
    %c0_i32_0 = arith.constant 0 : i32
    %c0_i32_1 = arith.constant 0 : i32
    return %arg0, %arg1, %c0_i32, %c0_i32_0 : i32, i32, i32, i32
  }
}

</mosaic_0001>

<bundles_post_ra>
// kernel: tpu_custom_call.1
= control target key start
LH: loop header
LB: loop body
LE: loop exit
PB: predicated region body
PF: predicated region fallthrough
CT: control target
= control target key end

     0   :  { %10 = vsyncpa [#allocation4], 0  ;;  %s6499_s0 = inlined_call_operand.vmem [shape: bf16[2,44,9,128], index: 0, kind: input, shape index: {}]   ;;  %s6500_s1 = inlined_call_operand.vmem [shape: bf16[1152,128], index: 1, kind: input, shape index: {}]   ;;  %s6501_s2 = inlined_call_operand.hbm [shape: bf16[1152,128], index: 2, kind: input, shape index: {}]   ;;  %s6502_s3 = inlined_call_operand.vmem [shape: f32[6,128], index: 3, kind: input, shape index: {}]   ;;  %s6503_s4 = inlined_call_operand.vmem [shape: bf16[128,128], index: 4, kind: input, shape index: {}]   ;;  %s6504_s5 = inlined_call_operand.hbm [shape: f32[2,8,8,128], index: 5, kind: output, shape index: {}]  }
   0x1   :  { %11 = vsyncpa [#allocation5], 0 }
   0x2   :  { %13 = vsyncpa [#allocation5 + $0x1], 0  ;;  %s5381_s18 = smov 0   ;;  %s5383_s19 = smov 0  }
   0x3   :  { %s5385_s20 = smov 0   ;;  %s5387_s21 = smov 0  }
   0x4   :  { %s5389_s22 = smov 0   ;;  %s5391_s23 = smov 0  }
   0x5 LB: > { %s4038_s24 = sadd.s32 4294967295, %s5343_s23   ;;  %s4039_s25 = sadd.s32 4294967294, %s5343_s23   ;;  %s5343_s23 = sphi %s5391_s23, %s19_s23   ;;  %s5339_s22 = sphi %s5389_s22, %s6521_s22   ;;  %s5335_s21 = sphi %s5387_s21, %s6520_s21   ;;  %s5331_s20 = sphi %s5385_s20, %s6519_s20   ;;  %s5327_s19 = sphi %s5383_s19, %s6518_s19   ;;  %s5323_s18 = sphi %s5381_s18, %s6517_s18  }
   0x6   : > { %s31_s26 = sadd.s32 1, %s5339_s22  ;;  %s152_s27 = sadd.s32 1, %s5331_s20 }
   0x7   : > { %p33_p0 = scmp.ge.s32.totalorder %s31_s26, 2  ;;  %p162_p1 = scmp.ne.s32.totalorder %s5331_s20, %s5327_s19 }
   0x8   : > { %p163_p2 = scmp.eq.s32.totalorder %s4038_s24, 1  ;;  %p168_p3 = scmp.ne.s32.totalorder %s5327_s19, %s5323_s18 }
   0x9   : > { %s6523_s26 = smov (%p33_p0, %s31_s26), 0  ;;  %p169_p5 = scmp.eq.s32.totalorder %s4039_s25, 1 }
   0xa   : > { %p5421_p4 = por %p163_p2, %p162_p1  ;;  %s147_s29 = ssub.s32 %s5339_s22, %s6523_s26 }
   0xb   : > { %p4040_p6 = scmp.ge.s32.totalorder %s5343_s23, 1  ;;  %p150_p7 = scmp.eq.s32.totalorder %s147_s29, 0 }
   0xc   : > { %p5428_p8 = por %p169_p5, %p168_p3  ;;  %p176_p9 = scmp.lt.s32.totalorder %s5343_s23, 3 }
   0xd   : > { %s5434_s6 = scalar_select %p150_p7, %s5331_s20, %s152_s27  }
   0xe   : > { %p177_p10 = pnand %p4040_p6, %p176_p9  ;;  %p5168_p11 = scmp.eq.s32.totalorder %s4038_s24, 0 }
   0xf   : > { %s190_s9 = sshll.u32 %s6501_s2, 4  ;;  %s5345_s10 = smov [#allocation3]   ;;  %s191_s9 = int_to_ptr.hbm [resolvable:$true] %s190_s9 }
  0x10   : > { %p5160_p12 = pneg %p177_p10  ;;  %s192_s11 = sshll.u32 %s5345_s10, 4  ;;  %s193_s11 = int_to_ptr.vmem [resolvable:$true] %s192_s11 }
  0x11   : > { %s5346_s12 = smov 64   ;;  %s5347_s13 = smov 4  }
  0x12   : > { %p5161_p13 = pnand %p5168_p11, %p5160_p12  ;;  %224 = sbr.rel (%p177_p10) target bundleno = 736 (0x2e0), region = 40 }
  0x14   : > { %5163 = dma.hbm_to_vmem [thread:$0]  (!%p5161_p13), %s191_s9, 9216, %s193_s11, [#allocation4], %s5346_s12, %s5346_s12, %s5347_s13  }
  0x17   : > { %5314 = dma.done.wait (%p5168_p11), [#allocation4], 9216  }
  0x18   : > { %5316 = vsyncadd (%p5168_p11), [#allocation4], 4294958080  ;;  %p255_p0 = scmp.lt.s32.totalorder %s5335_s21, 1  ;;  %v4983_v0 = vld [vmem:[%s6500_s1 + $0x38] sm:$0xff]  ;;  %v4982_v4 = vld [vmem:[%s6500_s1 + $0x30] sm:$0xff]  ;;  %vm2047_vm3 = vcmask 1043456  }
  0x19   : > { %v4991_v1 = vld [vmem:[%s6500_s1 + $0x78] sm:$0xff]  ;;  %1597 = vmatpush.bf16.msra.mxu0 %v4983_v0  ;;  %v4990_v5 = vld [vmem:[%s6500_s1 + $0x70] sm:$0xff]  ;;  %v4981_v8 = vld [vmem:[%s6500_s1 + $0x28] sm:$0xff]  ;;  %vm294_vm0 = vsmask.f32 3328  ;;  %vm2053_vm5 = vcmask 1040384  }
  0x1a   : > { %v4999_v2 = vld [vmem:[%s6500_s1 + $0xb8] sm:$0xff]  ;;  %s256_s7 = scalar_select %p255_p0, %s5335_s21, 1  ;;  %1631 = vmatpush.bf16.msra.mxu1 %v4991_v1  ;;  %v4998_v6 = vld [vmem:[%s6500_s1 + $0xb0] sm:$0xff]  ;;  %v4989_v9 = vld [vmem:[%s6500_s1 + $0x68] sm:$0xff]  ;;  %vm295_vm1 = vsmask.f32 7440 }
  0x1b   : > { %v5007_v3 = vld [vmem:[%s6500_s1 + $0xf8] sm:$0xff]  ;;  %1665 = vmatpush.bf16.msra.mxu2 %v4999_v2  ;;  %v5006_v7 = vld [vmem:[%s6500_s1 + $0xf0] sm:$0xff]  ;;  %v4997_v10 = vld [vmem:[%s6500_s1 + $0xa8] sm:$0xff]  ;;  %vm2048_vm4 = vsmask.f32 7938  ;;  %vm2335_vm10 = vcmask 1042432  }
  0x1c   : > { %1699 = vmatpush.bf16.msra.mxu3 %v5007_v3  ;;  %s5153_s16 = smul.u32 352, %s256_s7  ;;  %v5005_v11 = vld [vmem:[%s6500_s1 + $0xe8] sm:$0xff]  ;;  %v4980_v12 = vld [vmem:[%s6500_s1 + $0x20] sm:$0xff]  ;;  %v4979_v23 = vld [vmem:[%s6500_s1 + $0x18] sm:$0xff]  ;;  %vm2054_vm6 = vsmask.f32 256 }
  0x1d   : > { %1598 = vmatpush.bf16.msra.mxu0 %v4982_v4  ;;  %v4988_v13 = vld [vmem:[%s6500_s1 + $0x60] sm:$0xff]  ;;  %v4987_v24 = vld [vmem:[%s6500_s1 + $0x58] sm:$0xff]  ;;  %v4978_v35 = vld [vmem:[%s6500_s1 + $0x10] sm:$0xff]  ;;  %vm2336_vm11 = vcmask 1046532   ;;  %s251_s27 = sand.u32 1, %s5327_s19   ;;  %s5144_s9 = sshll.u32 %s5335_s21, 6 }
  0x1e   : > { %1632 = vmatpush.bf16.msra.mxu1 %v4990_v5  ;;  %s5480_s12 = scalar_lea.vmem %s6499_s0, %s5153_s16  ;;  %v4996_v14 = vld [vmem:[%s6500_s1 + $0xa0] sm:$0xff]  ;;  %v4995_v27 = vld [vmem:[%s6500_s1 + $0x98] sm:$0xff]  ;;  %v4986_v36 = vld [vmem:[%s6500_s1 + $0x50] sm:$0xff]  ;;  %s4045_s29 = sshll.u32 %s251_s27, 6 }
  0x1f   : > { %1666 = vmatpush.bf16.msra.mxu2 %v4998_v6  ;;  %v5004_v15 = vld [vmem:[%s6500_s1 + $0xe0] sm:$0xff]  ;;  %v264_v17 = vld [vmem:[%s5480_s12 + $0x8] sm:$0xf]  ;;  %v285_v19 = vld [vmem:[%s5480_s12 + $0xc] sm:$0x1]  ;;  %s6406_s8 = scalar_lea.vmem [#allocation6], %s4045_s29  ;;  %s3949_s11 = scalar_lea.hbm %s6504_s5, %s5144_s9 }
  0x20   : > { %1700 = vmatpush.bf16.msra.mxu3 %v5006_v7  ;;  %v263_v16 = vld [vmem:[%s5480_s12] sm:$0xf]  ;;  %v284_v18 = vld [vmem:[%s5480_s12 + $0x4] sm:$0x1]  ;;  %v312_v22 = vshrl.u32 %v264_v17, 16  ;;  %v315_v26 = vshll.u32 %v264_v17, 16  ;;  %vm5525_vm2 = vmor %vm294_vm0, %vm295_vm1 }
  0x21   : > { %1599 = vmatpush.bf16.msra.mxu0 %v4981_v8  ;;  %v298_v20 = vshrl.u32 %v263_v16, 16  ;;  %v301_v21 = vshll.u32 %v263_v16, 16  ;;  %v307_v25 = vshll.u32 %v284_v18, 16  ;;  %v5003_v28 = vld [vmem:[%s6500_s1 + $0xd8] sm:$0xff]  ;;  %v321_v32 = vshll.u32 %v285_v19, 16  ;;  %v4994_v37 = vld [vmem:[%s6500_s1 + $0x90] sm:$0xff]  ;;  %vm5953_vm7 = vmand %vm2047_vm3, %vm2048_vm4 }
  0x22   : > { %1633 = vmatpush.bf16.msra.mxu1 %v4989_v9  ;;  %v314_v31 = vrot.slane %v312_v22, 4  ;;  %v317_v33 = vrot.slane %v315_v26, 5  ;;  %v5002_v39 = vld [vmem:[%s6500_s1 + $0xd0] sm:$0xff]  ;;  %v266_v46 = vld [vmem:[%s5480_s12 + $0x18] sm:$0xf]  ;;  %v4977_v47 = vld [vmem:[%s6500_s1 + $0x8] sm:$0xff] }
  0x23   : > { %1667 = vmatpush.bf16.msra.mxu2 %v4997_v10  ;;  %v300_v29 = vrot.slane %v298_v20, 4  ;;  %v303_v30 = vrot.slane %v301_v21, 5  ;;  %v309_v41 = vrot.slane %v307_v25, 5  ;;  %v323_v42 = vrot.slane %v321_v32, 5  ;;  %v265_v43 = vld [vmem:[%s5480_s12 + $0x10] sm:$0xf]  ;;  %vm5959_vm8 = vmand %vm2053_vm5, %vm2054_vm6 }
  0x24   : > { %1701 = vmatpush.bf16.msra.mxu3 %v5005_v11  ;;  %v318_v38 = vor.u32 %v317_v33, %v314_v31  ;;  %v4985_v48 = vld [vmem:[%s6500_s1 + $0x48] sm:$0xff]  ;;  %v326_v49 = vshrl.u32 %v265_v43, 16  ;;  %v329_v50 = vshll.u32 %v265_v43, 16  ;;  %v340_v55 = vshrl.u32 %v266_v46, 16  ;;  %v4976_v57 = vld [vmem:[%s6500_s1] sm:$0xff]  ;;  %v5015_v4 = vld [vmem:[%s6500_s1 + $0x138] sm:$0xff] }
  0x25   : > { %1600 = vmatpush.bf16.msra.mxu0 %v4980_v12  ;;  %v304_v34 = vor.u32 %v303_v30, %v300_v29  ;;  %v4993_v51 = vld [vmem:[%s6500_s1 + $0x88] sm:$0xff]  ;;  %v343_v56 = vshll.u32 %v266_v46, 16  ;;  %v4984_v58 = vld [vmem:[%s6500_s1 + $0x40] sm:$0xff]  ;;  %v4139_v61 = vld [vmem:[%s5480_s12 + $0x58] sm:$0xf]  ;;  %s3952_s13 = sshll.u32 %s3949_s11, 4  ;;  %s3953_s13 = int_to_ptr.hbm [resolvable:$true] %s3952_s13 }
  0x26   : > { %1634 = vmatpush.bf16.msra.mxu1 %v4988_v13  ;;  %v319_v45 = vrot.slane %v318_v38, 4  ;;  %v5001_v52 = vld [vmem:[%s6500_s1 + $0xc8] sm:$0xff]  ;;  %v4119_v59 = vld [vmem:[%s5480_s12] sm:$0xf]  ;;  %v4159_v1 = vld [vmem:[%s5480_s12 + $0xb0] sm:$0xf] }
  0x27   : > { %1668 = vmatpush.bf16.msra.mxu2 %v4996_v14  ;;  %v305_v40 = vrot.slane %v304_v34, 4  ;;  %v4946_v60 = vld [vmem:[%s5480_s12 + $0x4] sm:$0xf0]  ;;  %v4992_v62 = vld [vmem:[%s6500_s1 + $0x80] sm:$0xff]  ;;  %v4956_v5 = vld [vmem:[%s5480_s12 + $0xb4] sm:$0xf0] }
  0x28   : > { %1702 = vmatpush.bf16.msra.mxu3 %v5004_v15  ;;  %v324_v54 = vsel %vm5525_vm2, %v319_v45, %v323_v42  ;;  %v5000_v63 = vld [vmem:[%s6500_s1 + $0xc0] sm:$0xff]  ;;  %v286_v6 = vld [vmem:[%s5480_s12 + $0x14] sm:$0x1]  ;;  %v328_v7 = vrot.slane %v326_v49, 4  ;;  %v331_v8 = vrot.slane %v329_v50, 5  ;;  %v342_v9 = vrot.slane %v340_v55, 4  ;;  %vm5984_vm9 = vmand %vm2053_vm5, %vm2048_vm4 }
  0x29   : > { %1601 = vmatpush.bf16.msra.mxu0 %v4979_v23  ;;  %v310_v53 = vsel %vm5525_vm2, %v305_v40, %v309_v41  ;;  %v4951_v0 = vld [vmem:[%s5480_s12 + $0x5c] sm:$0xf0]  ;;  %v842_v3 = vunpack.c.l.b16 %v324_v54  ;;  %v345_v10 = vrot.slane %v343_v56, 5  ;;  %v287_v11 = vld [vmem:[%s5480_s12 + $0x1c] sm:$0x1]  ;;  %v4120_v12 = vor.u32 %v4946_v60, %v4119_v59  ;;  %v5014_v20 = vld [vmem:[%s6500_s1 + $0x130] sm:$0xff] }
  0x2a   : > { %1635 = vmatpush.bf16.msra.mxu1 %v4987_v24  ;;  %v841_v2 = vunpack.c.l.b16 %v310_v53  ;;  %v4140_v13 = vor.u32 %v4951_v0, %v4139_v61  ;;  %v4160_v15 = vor.u32 %v4956_v5, %v4159_v1  ;;  %v332_v16 = vor.u32 %v331_v8, %v328_v7  ;;  %v267_v25 = vld [vmem:[%s5480_s12 + $0x20] sm:$0xf]  ;;  %v5013_v26 = vld [vmem:[%s6500_s1 + $0x128] sm:$0xff]  ;;  %v4952_v38 = vld [vmem:[%s5480_s12 + $0x6c] sm:$0xf0]  ;;  %s3936_s21 = scalar_lea.sflag [#allocation5], %s251_s27 }
  0x2b   : > { %1669 = vmatpush.bf16.msra.mxu2 %v4995_v27  ;;  %v335_v17 = vshll.u32 %v286_v6, 16  ;;  %v346_v18 = vor.u32 %v345_v10, %v342_v9  ;;  %v349_v19 = vshll.u32 %v287_v11, 16  ;;  %v268_v27 = vld [vmem:[%s5480_s12 + $0x28] sm:$0xf]  ;;  %v357_v29 = vshll.u32 %v267_v25, 16  ;;  %v5012_v34 = vld [vmem:[%s6500_s1 + $0x120] sm:$0xff]  ;;  %vm6029_vm12 = vmor %vm2335_vm10, %vm2336_vm11 }
  0x2c   : > { %1703 = vmatpush.bf16.msra.mxu3 %v5003_v28  ;;  %v851_v14 = vpack.c.b16 %v842_v3, %v841_v2  ;;  %v333_v21 = vrot.slane %v332_v16, 4  ;;  %v354_v28 = vshrl.u32 %v267_v25, 16  ;;  %v368_v32 = vshrl.u32 %v268_v27, 16  ;;  %v4163_v41 = vld [vmem:[%s5480_s12 + $0xc0] sm:$0xf]  ;;  %v5011_v50 = vld [vmem:[%s6500_s1 + $0x118] sm:$0xff] }
  0x2d   : > { %1602 = vmatpush.bf16.msra.mxu0 %v4978_v35  ;;  %v337_v22 = vrot.slane %v335_v17, 5  ;;  %v347_v23 = vrot.slane %v346_v18, 4  ;;  %v351_v24 = vrot.slane %v349_v19, 5  ;;  %v371_v33 = vshll.u32 %v268_v27, 16  ;;  %v4123_v35 = vld [vmem:[%s5480_s12 + $0x10] sm:$0xf] }
  0x2e   : > { %1636 = vmatpush.bf16.msra.mxu1 %v4986_v36  ;;  %v4947_v36 = vld [vmem:[%s5480_s12 + $0x14] sm:$0xf0]  ;;  %v4957_v42 = vld [vmem:[%s5480_s12 + $0xc4] sm:$0xf0]  ;;  %v288_v43 = vld [vmem:[%s5480_s12 + $0x24] sm:$0x1] }
  0x2f   : > { %1670 = vmatpush.bf16.msra.mxu2 %v4994_v37  ;;  %v338_v30 = vsel %vm5525_vm2, %v333_v21, %v337_v22  ;;  %v352_v31 = vsel %vm5525_vm2, %v347_v23, %v351_v24  ;;  %v4143_v37 = vld [vmem:[%s5480_s12 + $0x68] sm:$0xf]  ;;  %v356_v45 = vrot.slane %v354_v28, 4  ;;  %v359_v46 = vrot.slane %v357_v29, 5  ;;  %v289_v49 = vld [vmem:[%s5480_s12 + $0x2c] sm:$0x1] }
  0x30   : > { %1704 = vmatpush.bf16.msra.mxu3 %v5002_v39  ;;  %v843_v39 = vunpack.c.l.b16 %v338_v30  ;;  %v844_v40 = vunpack.c.l.b16 %v352_v31  ;;  %v4164_v54 = vor.u32 %v4957_v42, %v4163_v41  ;;  %v363_v55 = vshll.u32 %v288_v43, 16  ;;  %v5031_v59 = vld [vmem:[%s6500_s1 + $0x1b8] sm:$0xff]  ;;  %v5010_v61 = vld [vmem:[%s6500_s1 + $0x110] sm:$0xff]  ;;  %v5009_v8 = vld [vmem:[%s6500_s1 + $0x108] sm:$0xff]  ;;  %s5275_s14 = sshra.s32 %s3953_s13, 4  ;;  %s5281_s25 = scalar_lea.hbm %s6504_s5, 128  ;;  %s5276_s14 = int_to_ptr.hbm [resolvable:$true] %s5275_s14 }
  0x31   : > { %1603 = vmatpush.bf16.msra.mxu0 %v4977_v47  ;;  %v370_v47 = vrot.slane %v368_v32, 4  ;;  %v360_v56 = vor.u32 %v359_v46, %v356_v45  ;;  %v269_v3 = vld [vmem:[%s5480_s12 + $0x30] sm:$0xf]  ;;  %v270_v5 = vld [vmem:[%s5480_s12 + $0x38] sm:$0xf]  ;;  %v5021_v17 = vld [vmem:[%s6500_s1 + $0x168] sm:$0xff]  ;;  %p5282_p5 = scmp.lt.s32.totalorder %s5276_s14, %s6504_s5 }
  0x32   : > { %1637 = vmatpush.bf16.msra.mxu1 %v4985_v48  ;;  %v373_v48 = vrot.slane %v371_v33, 5  ;;  %v852_v53 = vpack.c.b16 %v844_v40, %v843_v39  ;;  %v365_v60 = vrot.slane %v363_v55, 5  ;;  %v5022_v6 = vld [vmem:[%s6500_s1 + $0x170] sm:$0xff]  ;;  %v382_v9 = vshrl.u32 %v269_v3, 16  ;;  %v4127_v16 = vld [vmem:[%s5480_s12 + $0x20] sm:$0xf] }
  0x33   : > { %1671 = vmatpush.bf16.msra.mxu2 %v4993_v51  ;;  %v4124_v51 = vor.u32 %v4947_v36, %v4123_v35  ;;  %v361_v0 = vrot.slane %v360_v56, 4  ;;  %v5038_v7 = vld [vmem:[%s6500_s1 + $0x1f0] sm:$0xff]  ;;  %v385_v10 = vshll.u32 %v269_v3, 16  ;;  %v4948_v18 = vld [vmem:[%s5480_s12 + $0x24] sm:$0xf0]  ;;  %v5028_v30 = vld [vmem:[%s6500_s1 + $0x1a0] sm:$0xff] }
  0x34   : > { %1705 = vmatpush.bf16.msra.mxu3 %v5001_v52  ;;  %v4144_v52 = vor.u32 %v4952_v38, %v4143_v37  ;;  %v4147_v19 = vld [vmem:[%s5480_s12 + $0x78] sm:$0xf]  ;;  %v4953_v21 = vld [vmem:[%s5480_s12 + $0x7c] sm:$0xf0]  ;;  %v4167_v24 = vld [vmem:[%s5480_s12 + $0xd0] sm:$0xf] }
  0x35   : > { %1604 = vmatpush.bf16.msra.mxu0 %v4976_v57  ;;  %v374_v57 = vor.u32 %v373_v48, %v370_v47  ;;  %v366_v11 = vsel %vm5525_vm2, %v361_v0, %v365_v60  ;;  %v384_v25 = vrot.slane %v382_v9, 4  ;;  %v4958_v27 = vld [vmem:[%s5480_s12 + $0xd4] sm:$0xf0]  ;;  %v290_v31 = vld [vmem:[%s5480_s12 + $0x34] sm:$0x1]  ;;  %v5020_v33 = vld [vmem:[%s6500_s1 + $0x160] sm:$0xff]  ;;  %v4148_v35 = vor.u32 %v4953_v21, %v4147_v19 }
  0x36   : > { %1638 = vmatpush.bf16.msra.mxu1 %v4984_v58  ;;  %v377_v58 = vshll.u32 %v289_v49, 16  ;;  %v845_v22 = vunpack.c.l.b16 %v366_v11  ;;  %v291_v32 = vld [vmem:[%s5480_s12 + $0x3c] sm:$0x1]  ;;  %v4168_v37 = vor.u32 %v4958_v27, %v4167_v24  ;;  %v391_v39 = vshll.u32 %v290_v31, 16  ;;  %v5036_v42 = vld [vmem:[%s6500_s1 + $0x1e0] sm:$0xff]  ;;  %v5018_v55 = vld [vmem:[%s6500_s1 + $0x150] sm:$0xff] }
  0x37   : > { %1672 = vmatpush.bf16.msra.mxu2 %v4992_v62  ;;  %v5023_v62 = vld [vmem:[%s6500_s1 + $0x178] sm:$0xff]  ;;  %v375_v1 = vrot.slane %v374_v57, 4  ;;  %v405_v41 = vshll.u32 %v291_v32, 16  ;;  %v271_v46 = vld [vmem:[%s5480_s12 + $0x40] sm:$0xf]  ;;  %v5025_v0 = vld [vmem:[%s6500_s1 + $0x188] sm:$0xff] }
  0x38   : > { %1706 = vmatpush.bf16.msra.mxu3 %v5000_v63  ;;  %1605 = vmatmul.bf16.vlgmr.msra.gmra.mxu0 %v4120_v12  ;;  %v5039_v63 = vld [vmem:[%s6500_s1 + $0x1f8] sm:$0xff]  ;;  %v379_v2 = vrot.slane %v377_v58, 5  ;;  %v272_v47 = vld [vmem:[%s5480_s12 + $0x48] sm:$0xf]  ;;  %v393_v49 = vrot.slane %v391_v39, 5  ;;  %v410_v56 = vshrl.u32 %v271_v46, 16 }
  0x39   : > { %1733 = vmatpush.bf16.msrb.mxu0 %v5015_v4  ;;  %1639 = vmatmul.bf16.vlgmr.msra.gmra.mxu1 %v4140_v13  ;;  %v5030_v4 = vld [vmem:[%s6500_s1 + $0x1b0] sm:$0xff]  ;;  %v396_v13 = vshrl.u32 %v270_v5, 16  ;;  %v5027_v43 = vld [vmem:[%s6500_s1 + $0x198] sm:$0xff]  ;;  %v413_v57 = vshll.u32 %v271_v46, 16  ;;  %v424_v58 = vshrl.u32 %v272_v47, 16  ;;  %v5017_v3 = vld [vmem:[%s6500_s1 + $0x148] sm:$0xff] }
  0x3a   : > { %1673 = vmatmul.bf16.vlgmr.msra.gmra.mxu2 %v851_v14  ;;  %1767 = vmatpush.bf16.msrb.mxu1 %v5023_v62  ;;  %v380_v12 = vsel %vm5525_vm2, %v375_v1, %v379_v2  ;;  %v399_v14 = vshll.u32 %v270_v5, 16  ;;  %v5019_v48 = vld [vmem:[%s6500_s1 + $0x158] sm:$0xff]  ;;  %v4131_v60 = vld [vmem:[%s5480_s12 + $0x30] sm:$0xf]  ;;  %v4151_v2 = vld [vmem:[%s5480_s12 + $0x88] sm:$0xf] }
  0x3b   : > { %1707 = vmatmul.bf16.vlgmr.msra.gmra.mxu3 %v4160_v15  ;;  %1801 = vmatpush.bf16.msrb.mxu2 %v5031_v59  ;;  %v5029_v15 = vld [vmem:[%s6500_s1 + $0x1a8] sm:$0xff]  ;;  %v846_v23 = vunpack.c.l.b16 %v380_v12  ;;  %v398_v28 = vrot.slane %v396_v13, 4  ;;  %v427_v59 = vshll.u32 %v272_v47, 16  ;;  %v4949_v1 = vld [vmem:[%s5480_s12 + $0x34] sm:$0xf0]  ;;  %v412_v5 = vrot.slane %v410_v56, 4 }
  0x3c   : > { %1835 = vmatpush.bf16.msrb.mxu3 %v5039_v63  ;;  %v401_v29 = vrot.slane %v399_v14, 5  ;;  %v5034_v63 = vld [vmem:[%s6500_s1 + $0x1d0] sm:$0xff]  ;;  %v4171_v11 = vld [vmem:[%s5480_s12 + $0xe0] sm:$0xf]  ;;  %v292_v12 = vld [vmem:[%s5480_s12 + $0x44] sm:$0x1] }
  0x3d   : > { %1734 = vmatpush.bf16.msrb.mxu0 %v5014_v20  ;;  %v5037_v20 = vld [vmem:[%s6500_s1 + $0x1e8] sm:$0xff]  ;;  %v853_v36 = vpack.c.b16 %v846_v23, %v845_v22  ;;  %v5016_v19 = vld [vmem:[%s6500_s1 + $0x140] sm:$0xff]  ;;  %v419_v21 = vshll.u32 %v292_v12, 16  ;;  %v5047_v31 = vld [vmem:[%s6500_s1 + $0x238] sm:$0xff]  ;;  %s5277_s15 = scalar_lea.hbm %s5276_s14, 64 }
  0x3e   : > { %1768 = vmatpush.bf16.msrb.mxu1 %v5022_v6  ;;  %v402_v40 = vor.u32 %v401_v29, %v398_v28  ;;  %v415_v6 = vrot.slane %v413_v57, 5  ;;  %v293_v13 = vld [vmem:[%s5480_s12 + $0x4c] sm:$0x1]  ;;  %v4959_v14 = vld [vmem:[%s5480_s12 + $0xe4] sm:$0xf0]  ;;  %p5278_p1 = scmp.ne.s32.totalorder %s5276_s14, %s5277_s15  ;;  %p5283_p6 = scmp.lt.s32.totalorder %s5281_s25, %s5277_s15 }
  0x3f   : > { %1802 = vmatpush.bf16.msrb.mxu2 %v5030_v4  ;;  %v4954_v4 = vld [vmem:[%s5480_s12 + $0x8c] sm:$0xf0]  ;;  %v433_v23 = vshll.u32 %v293_v13, 16  ;;  %v421_v28 = vrot.slane %v419_v21, 5  ;;  %v4080_v21 = vld [vmem:[%s5480_s12 + $0xcc] sm:$0x1] }
  0x40   : > { %1836 = vmatpush.bf16.msrb.mxu3 %v5038_v7  ;;  %v426_v7 = vrot.slane %v424_v58, 4  ;;  %v4057_v32 = vld [vmem:[%s5480_s12 + $0xb0] sm:$0xf]  ;;  %p5279_p2 = pnand %p5278_p1, %p5421_p4  ;;  %p5284_p7 = por %p5283_p6, %p5282_p5 }
  0x41   : > { %1735 = vmatpush.bf16.msrb.mxu0 %v5013_v26  ;;  %v387_v26 = vrot.slane %v385_v10, 5 }
  0x42   : > { %1769 = vmatpush.bf16.msrb.mxu1 %v5021_v17  ;;  %v4132_v17 = vor.u32 %v4949_v1, %v4131_v60  ;;  %v4060_v1 = vld [vmem:[%s5480_s12 + $0xc8] sm:$0xf]  ;;  %p5280_p3 = pneg %p5279_p2 }
  0x43   : > { %1803 = vmatpush.bf16.msrb.mxu2 %v5029_v15  ;;  %v388_v38 = vor.u32 %v387_v26, %v384_v25  ;;  %v5033_v15 = vld [vmem:[%s6500_s1 + $0x1c8] sm:$0xff]  ;;  %v4172_v25 = vor.u32 %v4959_v14, %v4171_v11  ;;  %v5032_v26 = vld [vmem:[%s6500_s1 + $0x1c0] sm:$0xff] }
  0x44   : > { %1837 = vmatpush.bf16.msrb.mxu3 %v5037_v20  ;;  %v416_v20 = vor.u32 %v415_v6, %v412_v5  ;;  %v5045_v6 = vld [vmem:[%s6500_s1 + $0x228] sm:$0xff]  ;;  %v5044_v11 = vld [vmem:[%s6500_s1 + $0x220] sm:$0xff]  ;;  %p5285_p9 = pnand %p5284_p7, %p5280_p3 }
  0x45   : > { %1736 = vmatpush.bf16.msrb.mxu0 %v5012_v34  ;;  %v4128_v34 = vor.u32 %v4948_v18, %v4127_v16  ;;  %v389_v45 = vrot.slane %v388_v38, 4  ;;  %v5024_v16 = vld [vmem:[%s6500_s1 + $0x180] sm:$0xff]  ;;  %v4152_v18 = vor.u32 %v4954_v4, %v4151_v2  ;;  %v473_v38 = vshll.u32 %v4057_v32, 16 }
  0x46   : > { %1770 = vmatpush.bf16.msrb.mxu1 %v5020_v33  ;;  %v417_v27 = vrot.slane %v416_v20, 4  ;;  %v4058_v33 = vld [vmem:[%s5480_s12 + $0xb8] sm:$0xf]  ;;  %v4079_v20 = vld [vmem:[%s5480_s12 + $0xc4] sm:$0x1] }
  0x47   : > { %1804 = vmatpush.bf16.msrb.mxu2 %v5028_v30  ;;  %v435_v30 = vrot.slane %v433_v23, 5  ;;  %v484_v39 = vshrl.u32 %v4058_v33, 16  ;;  %v4961_v23 = vld [vmem:[%s5480_s12 + $0x10c] sm:$0xf0] }
  0x48   : > { %1610 = vmatmul.bf16.gmra.mxu0 %v4124_v51  ;;  %v407_v51 = vrot.slane %v405_v41, 5  ;;  %1838 = vmatpush.bf16.msrb.mxu3 %v5036_v42  ;;  %v4135_v41 = vld [vmem:[%s5480_s12 + $0x40] sm:$0xf]  ;;  %v4950_v42 = vld [vmem:[%s5480_s12 + $0x44] sm:$0xf0] }
  0x49   : > { %1737 = vmatpush.bf16.msrb.mxu0 %v5011_v50  ;;  %1644 = vmatmul.bf16.gmra.mxu1 %v4144_v52  ;;  %v403_v50 = vrot.slane %v402_v40, 4  ;;  %v5035_v52 = vld [vmem:[%s6500_s1 + $0x1d8] sm:$0xff]  ;;  %v487_v40 = vshll.u32 %v4058_v33, 16  ;;  %v4136_v56 = vor.u32 %v4950_v42, %v4135_v41 }
  0x4a   : > { %1678 = vmatmul.bf16.gmra.mxu2 %v852_v53  ;;  %v5026_v53 = vld [vmem:[%s6500_s1 + $0x190] sm:$0xff]  ;;  %1771 = vmatpush.bf16.msrb.mxu1 %v5019_v48  ;;  %v4062_v41 = vld [vmem:[%s5480_s12 + $0xd8] sm:$0xf] }
  0x4b   : > { %1712 = vmatmul.bf16.gmra.mxu3 %v4164_v54  ;;  %1805 = vmatpush.bf16.msrb.mxu2 %v5027_v43  ;;  %v5008_v54 = vld [vmem:[%s6500_s1 + $0x100] sm:$0xff]  ;;  %v408_v62 = vsel %vm5525_vm2, %v403_v50, %v407_v51  ;;  %v4155_v43 = vld [vmem:[%s5480_s12 + $0x98] sm:$0xf]  ;;  %v4175_v48 = vld [vmem:[%s5480_s12 + $0xf0] sm:$0xf]  ;;  %v475_v51 = vrot.slane %v473_v38, 5 }
  0x4c   : > { %1839 = vmatpush.bf16.msrb.mxu3 %v5035_v52  ;;  %v848_v10 = vunpack.c.l.b16 %v408_v62  ;;  %v486_v52 = vrot.slane %v484_v39, 4  ;;  %v5043_v42 = vld [vmem:[%s6500_s1 + $0x218] sm:$0xff] }
  0x4d   : > { %1738 = vmatpush.bf16.msrb.mxu0 %v5010_v61  ;;  %v394_v61 = vsel %vm5525_vm2, %v389_v45, %v393_v49  ;;  %v4955_v45 = vld [vmem:[%s5480_s12 + $0x9c] sm:$0xf0]  ;;  %v4960_v49 = vld [vmem:[%s5480_s12 + $0xf4] sm:$0xf0] }
  0x4e   : > { %1772 = vmatpush.bf16.msrb.mxu1 %v5018_v55  ;;  %v847_v9 = vunpack.c.l.b16 %v394_v61  ;;  %v4078_v55 = vld [vmem:[%s5480_s12 + $0xbc] sm:$0x1]  ;;  %v4156_v57 = vor.u32 %v4955_v45, %v4155_v43 }
  0x4f   : > { %1806 = vmatpush.bf16.msrb.mxu2 %v5026_v53  ;;  %v489_v53 = vrot.slane %v487_v40, 5  ;;  %v4061_v40 = vld [vmem:[%s5480_s12 + $0xd0] sm:$0xf] }
  0x50   : > { %1840 = vmatpush.bf16.msrb.mxu3 %v5034_v63  ;;  %v854_v24 = vpack.c.b16 %v848_v10, %v847_v9  ;;  %v493_v63 = vshll.u32 %v4078_v55, 16  ;;  %v512_v9 = vshrl.u32 %v4060_v1, 16  ;;  %v515_v10 = vshll.u32 %v4060_v1, 16 }
  0x51   : > { %1739 = vmatpush.bf16.msrb.mxu0 %v5009_v8  ;;  %v429_v8 = vrot.slane %v427_v59, 5  ;;  %v4176_v59 = vor.u32 %v4960_v49, %v4175_v48  ;;  %v490_v62 = vor.u32 %v489_v53, %v486_v52  ;;  %v540_v48 = vshrl.u32 %v4062_v41, 16  ;;  %v4962_v53 = vld [vmem:[%s5480_s12 + $0x11c] sm:$0xf0] }
  0x52   : > { %1773 = vmatpush.bf16.msrb.mxu1 %v5017_v3  ;;  %v495_v5 = vrot.slane %v493_v63, 5  ;;  %v543_v49 = vshll.u32 %v4062_v41, 16  ;;  %v4972_v63 = vld [vmem:[%s5480_s12 + $0x74] sm:$0xf0] }
  0x53   : > { %1807 = vmatpush.bf16.msrb.mxu2 %v5025_v0  ;;  %v430_v22 = vor.u32 %v429_v8, %v426_v7  ;;  %v4059_v0 = vld [vmem:[%s5480_s12 + $0xc0] sm:$0xf]  ;;  %v491_v4 = vrot.slane %v490_v62, 4  ;;  %v4223_v62 = vld [vmem:[%s5480_s12 + $0x70] sm:$0xf] }
  0x54   : > { %1841 = vmatpush.bf16.msrb.mxu3 %v5033_v15  ;;  %v498_v7 = vshrl.u32 %v4059_v0, 16  ;;  %v501_v8 = vshll.u32 %v4059_v0, 16 }
  0x55   : > { %1740 = vmatpush.bf16.msrb.mxu0 %v5008_v54  ;;  %v431_v29 = vrot.slane %v430_v22, 4  ;;  %v4077_v54 = vld [vmem:[%s5480_s12 + $0xb4] sm:$0x1]  ;;  %v496_v13 = vsel %vm5525_vm2, %v491_v4, %v495_v5  ;;  %v4179_v22 = vld [vmem:[%s5480_s12 + $0x108] sm:$0xf] }
  0x56   : > { %1774 = vmatpush.bf16.msrb.mxu1 %v5016_v19  ;;  %v479_v61 = vshll.u32 %v4077_v54, 16  ;;  %v500_v14 = vrot.slane %v498_v7, 4  ;;  %v503_v15 = vrot.slane %v501_v8, 5  ;;  %v922_v19 = vunpack.c.l.b16 %v496_v13  ;;  %v4063_v13 = vld [vmem:[%s5480_s12 + $0xe0] sm:$0xf] }
  0x57   : > { %1808 = vmatpush.bf16.msrb.mxu2 %v5024_v16  ;;  %v514_v16 = vrot.slane %v512_v9, 4  ;;  %v4224_v7 = vor.u32 %v4972_v63, %v4223_v62 }
  0x58   : > { %1615 = vmatmul.bf16.gmra.mxu0 %v4128_v34  ;;  %1842 = vmatpush.bf16.msrb.mxu3 %v5032_v26  ;;  %v5046_v34 = vld [vmem:[%s6500_s1 + $0x230] sm:$0xff]  ;;  %v481_v3 = vrot.slane %v479_v61, 5  ;;  %v4219_v26 = vld [vmem:[%s5480_s12 + $0x60] sm:$0xf] }
  0x59   : > { %1649 = vmatmul.bf16.gmra.mxu1 %v4148_v35  ;;  %1869 = vmatpush.bf16.msra.mxu0 %v5047_v31  ;;  %v422_v35 = vsel %vm5525_vm2, %v417_v27, %v421_v28  ;;  %v4971_v27 = vld [vmem:[%s5480_s12 + $0x64] sm:$0xf0]  ;;  %v504_v28 = vor.u32 %v503_v15, %v500_v14  ;;  %v521_v31 = vshll.u32 %v4080_v21, 16  ;;  %v4967_v61 = vld [vmem:[%s5480_s12 + $0x1c] sm:$0xf0] }
  0x5a   : > { %1683 = vmatmul.bf16.gmra.mxu2 %v853_v36  ;;  %v436_v36 = vsel %vm5525_vm2, %v431_v29, %v435_v30  ;;  %v849_v46 = vunpack.c.l.b16 %v422_v35  ;;  %v507_v29 = vshll.u32 %v4079_v20, 16  ;;  %v4220_v35 = vor.u32 %v4971_v27, %v4219_v26  ;;  %v4064_v14 = vld [vmem:[%s5480_s12 + $0xe8] sm:$0xf]  ;;  %v4227_v27 = vld [vmem:[%s5480_s12 + $0x80] sm:$0xf] }
  0x5b   : > { %1717 = vmatmul.bf16.gmra.mxu3 %v4168_v37  ;;  %v470_v37 = vshrl.u32 %v4057_v32, 16  ;;  %v850_v47 = vunpack.c.l.b16 %v436_v36  ;;  %v4180_v32 = vor.u32 %v4961_v23, %v4179_v22  ;;  %v505_v36 = vrot.slane %v504_v28, 4  ;;  %v4187_v21 = vld [vmem:[%s5480_s12 + $0x128] sm:$0xf]  ;;  %v4963_v22 = vld [vmem:[%s5480_s12 + $0x12c] sm:$0xf0] }
  0x5c   : > { %v523_v39 = vrot.slane %v521_v31, 5  ;;  %v571_v20 = vshll.u32 %v4064_v14, 16  ;;  %v4207_v23 = vld [vmem:[%s5480_s12 + $0x28] sm:$0xf] }
  0x5d   : > { %1870 = vmatpush.bf16.msra.mxu0 %v5046_v34  ;;  %v472_v50 = vrot.slane %v470_v37, 4  ;;  %v855_v58 = vpack.c.b16 %v850_v47, %v849_v46  ;;  %v509_v37 = vrot.slane %v507_v29, 5  ;;  %v526_v46 = vshrl.u32 %v4061_v40, 16  ;;  %v4973_v28 = vld [vmem:[%s5480_s12 + $0x84] sm:$0xf0] }
  0x5e   : > { %v529_v47 = vshll.u32 %v4061_v40, 16 }
  0x5f   : > { %v476_v60 = vor.u32 %v475_v51, %v472_v50  ;;  %v510_v43 = vsel %vm5525_vm2, %v505_v36, %v509_v37  ;;  %v4183_v50 = vld [vmem:[%s5480_s12 + $0x118] sm:$0xf]  ;;  %v528_v54 = vrot.slane %v526_v46, 4 }
  0x60   : > { %v923_v51 = vunpack.c.l.b16 %v510_v43  ;;  %v531_v55 = vrot.slane %v529_v47, 5  ;;  %v4184_v0 = vor.u32 %v4962_v53, %v4183_v50  ;;  %v5041_v43 = vld [vmem:[%s6500_s1 + $0x208] sm:$0xff]  ;;  %v4066_v46 = vld [vmem:[%s5480_s12 + $0xf8] sm:$0xf] }
  0x61   : > { %v477_v2 = vrot.slane %v476_v60, 4  ;;  %1871 = vmatpush.bf16.msra.mxu0 %v5045_v6  ;;  %v4082_v60 = vld [vmem:[%s5480_s12 + $0xdc] sm:$0x1]  ;;  %v596_v53 = vshrl.u32 %v4066_v46, 16 }
  0x62   : > { %v549_v5 = vshll.u32 %v4082_v60, 16 }
  0x63   : > { %v482_v12 = vsel %vm5525_vm2, %v477_v2, %v481_v3  ;;  %v532_v2 = vor.u32 %v531_v55, %v528_v54  ;;  %v599_v54 = vshll.u32 %v4066_v46, 16  ;;  %v4215_v46 = vld [vmem:[%s5480_s12 + $0x48] sm:$0xf] }
  0x65   : > { %1872 = vmatpush.bf16.msra.mxu0 %v5044_v11  ;;  %v533_v8 = vrot.slane %v532_v2, 4  ;;  %v551_v11 = vrot.slane %v549_v5, 5  ;;  %v601_v60 = vrot.slane %v599_v54, 5  ;;  %v4191_v2 = vld [vmem:[%s5480_s12 + $0x138] sm:$0xf] }
  0x66   : > { %v4969_v5 = vld [vmem:[%s5480_s12 + $0x3c] sm:$0xf0] }
  0x68   : > { %1620 = vmatmul.bf16.gmra.mxu0 %v4132_v17  ;;  %v517_v17 = vrot.slane %v515_v10, 5 }
  0x69   : > { %1654 = vmatmul.bf16.gmra.mxu1 %v4152_v18  ;;  %v921_v18 = vunpack.c.l.b16 %v482_v12  ;;  %1873 = vmatpush.bf16.msra.mxu0 %v5043_v42  ;;  %v5042_v12 = vld [vmem:[%s6500_s1 + $0x210] sm:$0xff] }
  0x6a   : > { %1688 = vmatmul.bf16.gmra.mxu2 %v854_v24  ;;  %v4199_v24 = vld [vmem:[%s5480_s12 + $0x8] sm:$0xf]  ;;  %v518_v30 = vor.u32 %v517_v17, %v514_v16  ;;  %v554_v17 = vshrl.u32 %v4063_v13, 16 }
  0x6b   : > { %1722 = vmatmul.bf16.gmra.mxu3 %v4172_v25  ;;  %v4966_v25 = vld [vmem:[%s5480_s12 + $0xc] sm:$0xf0]  ;;  %v931_v33 = vpack.c.b16 %v922_v19, %v921_v18  ;;  %v557_v18 = vshll.u32 %v4063_v13, 16  ;;  %v568_v19 = vshrl.u32 %v4064_v14, 16 }
  0x6c   : > { %v4200_v34 = vor.u32 %v4966_v25, %v4199_v24  ;;  %v519_v38 = vrot.slane %v518_v30, 4  ;;  %v4968_v24 = vld [vmem:[%s5480_s12 + $0x2c] sm:$0xf0]  ;;  %v556_v29 = vrot.slane %v554_v17, 4 }
  0x6d   : > { %1874 = vmatpush.bf16.msra.mxu0 %v5042_v12  ;;  %v559_v30 = vrot.slane %v557_v18, 5  ;;  %v570_v31 = vrot.slane %v568_v19, 4  ;;  %v4208_v36 = vor.u32 %v4968_v24, %v4207_v23  ;;  %v4087_v23 = vld [vmem:[%s5480_s12 + $0x8] sm:$0xf]  ;;  %v4088_v24 = vld [vmem:[%s5480_s12 + $0x10] sm:$0xf] }
  0x6e   : > { %v524_v45 = vsel %vm5525_vm2, %v519_v38, %v523_v39  ;;  %v4228_v38 = vor.u32 %v4973_v28, %v4227_v27 }
  0x6f   : > { %v924_v52 = vunpack.c.l.b16 %v524_v45  ;;  %v560_v39 = vor.u32 %v559_v30, %v556_v29  ;;  %v4065_v45 = vld [vmem:[%s5480_s12 + $0xf0] sm:$0xf]  ;;  %v642_v29 = vshrl.u32 %v4087_v23, 16  ;;  %v645_v30 = vshll.u32 %v4087_v23, 16 }
  0x71   : > { %v932_v1 = vpack.c.b16 %v924_v52, %v923_v51  ;;  %1875 = vmatpush.bf16.msra.mxu0 %v5041_v43  ;;  %v561_v47 = vrot.slane %v560_v39, 4  ;;  %v582_v51 = vshrl.u32 %v4065_v45, 16  ;;  %v585_v52 = vshll.u32 %v4065_v45, 16 }
  0x78   : > { %1625 = vmatmul.bf16.gmra.mxu0 %v4136_v56  ;;  %v542_v56 = vrot.slane %v540_v48, 4 }
  0x79   : > { %1659 = vmatmul.bf16.gmra.mxu1 %v4156_v57  ;;  %v545_v57 = vrot.slane %v543_v49, 5 }
  0x7a   : > { %1693 = vmatmul.bf16.gmra.mxu2 %v855_v58  ;;  %v4203_v58 = vld [vmem:[%s5480_s12 + $0x18] sm:$0xf] }
  0x7b   : > { %1727 = vmatmul.bf16.gmra.mxu3 %v4176_v59  ;;  %v4081_v59 = vld [vmem:[%s5480_s12 + $0xd4] sm:$0x1]  ;;  %v546_v4 = vor.u32 %v545_v57, %v542_v56  ;;  %v4204_v6 = vor.u32 %v4967_v61, %v4203_v58  ;;  %v584_v57 = vrot.slane %v582_v51, 4  ;;  %v587_v58 = vrot.slane %v585_v52, 5  ;;  %v5040_v61 = vld [vmem:[%s6500_s1 + $0x200] sm:$0xff] }
  0x7c   : > { %v535_v3 = vshll.u32 %v4081_v59, 16  ;;  %v598_v59 = vrot.slane %v596_v53, 4  ;;  %1876 = vmatpush.bf16.msra.mxu0 %v5040_v61  ;;  %v4975_v51 = vld [vmem:[%s5480_s12 + $0xa4] sm:$0xf0] }
  0x7d   : > { %v547_v10 = vrot.slane %v546_v4, 4  ;;  %v4211_v4 = vld [vmem:[%s5480_s12 + $0x38] sm:$0xf] }
  0x7e   : > { %v537_v9 = vrot.slane %v535_v3, 5  ;;  %v4964_v3 = vld [vmem:[%s5480_s12 + $0x13c] sm:$0xf0] }
  0x7f   : > { %v552_v16 = vsel %vm5525_vm2, %v547_v10, %v551_v11  ;;  %v602_v10 = vor.u32 %v601_v60, %v598_v59  ;;  %v4192_v12 = vor.u32 %v4964_v3, %v4191_v2 }
  0x80   : > { %v538_v15 = vsel %vm5525_vm2, %v533_v8, %v537_v9  ;;  %v926_v26 = vunpack.c.l.b16 %v552_v16  ;;  %v588_v8 = vor.u32 %v587_v58, %v584_v57  ;;  %v4212_v16 = vor.u32 %v4969_v5, %v4211_v4  ;;  %v4089_v5 = vld [vmem:[%s5480_s12 + $0x18] sm:$0xf] }
  0x81   : > { %v925_v25 = vunpack.c.l.b16 %v538_v15 }
  0x82   : > { %v589_v19 = vrot.slane %v588_v8, 4 }
  0x83   : > { %v933_v37 = vpack.c.b16 %v926_v26, %v925_v25 }
  0x88   : > { %1741 = vmatmul.bf16.vlgmr.msrb.gmra.mxu0 %v4180_v32  ;;  %v573_v32 = vrot.slane %v571_v20, 5 }
  0x89   : > { %1775 = vmatmul.bf16.vlgmr.msrb.gmra.mxu1 %v931_v33  ;;  %v4083_v33 = vld [vmem:[%s5480_s12 + $0xe4] sm:$0x1] }
  0x8a   : > { %1809 = vmatmul.bf16.vlgmr.msrb.gmra.mxu2 %v4200_v34  ;;  %v4084_v34 = vld [vmem:[%s5480_s12 + $0xec] sm:$0x1]  ;;  %v563_v40 = vshll.u32 %v4083_v33, 16  ;;  %v574_v41 = vor.u32 %v573_v32, %v570_v31  ;;  %v656_v31 = vshrl.u32 %v4088_v24, 16  ;;  %v659_v32 = vshll.u32 %v4088_v24, 16 }
  0x8b   : > { %1843 = vmatmul.bf16.vlgmr.msrb.gmra.mxu3 %v4220_v35  ;;  %v4188_v35 = vor.u32 %v4963_v22, %v4187_v21  ;;  %v577_v42 = vshll.u32 %v4084_v34, 16  ;;  %v603_v21 = vrot.slane %v602_v10, 4 }
  0x8c   : > { %v565_v48 = vrot.slane %v563_v40, 5  ;;  %v575_v49 = vrot.slane %v574_v41, 4  ;;  %v4965_v40 = vld [vmem:[%s5480_s12 + $0x14c] sm:$0xf0]  ;;  %v644_v41 = vrot.slane %v642_v29, 4  ;;  %v658_v43 = vrot.slane %v656_v31, 4 }
  0x8d   : > { %v579_v50 = vrot.slane %v577_v42, 5  ;;  %v647_v42 = vrot.slane %v645_v30, 5  ;;  %v661_v45 = vrot.slane %v659_v32, 5 }
  0x8e   : > { %v566_v55 = vsel %vm5525_vm2, %v561_v47, %v565_v48  ;;  %v4107_v47 = vld [vmem:[%s5480_s12 + $0xc] sm:$0x1]  ;;  %v4108_v48 = vld [vmem:[%s5480_s12 + $0x14] sm:$0x1] }
  0x8f   : > { %v580_v56 = vsel %vm5525_vm2, %v575_v49, %v579_v50  ;;  %v927_v62 = vunpack.c.l.b16 %v566_v55  ;;  %v4970_v49 = vld [vmem:[%s5480_s12 + $0x4c] sm:$0xf0]  ;;  %v4235_v50 = vld [vmem:[%s5480_s12 + $0xa0] sm:$0xf]  ;;  %v651_v57 = vshll.u32 %v4107_v47, 16  ;;  %v662_v58 = vor.u32 %v661_v45, %v658_v43 }
  0x90   : > { %v928_v63 = vunpack.c.l.b16 %v580_v56  ;;  %v648_v56 = vor.u32 %v647_v42, %v644_v41  ;;  %v665_v59 = vshll.u32 %v4108_v48, 16  ;;  %v4092_v41 = vld [vmem:[%s5480_s12 + $0x30] sm:$0xf] }
  0x91   : > { %v653_v2 = vrot.slane %v651_v57, 5  ;;  %v663_v3 = vrot.slane %v662_v58, 4 }
  0x92   : > { %v934_v13 = vpack.c.b16 %v928_v63, %v927_v62  ;;  %v4216_v62 = vor.u32 %v4970_v49, %v4215_v46  ;;  %v4236_v63 = vor.u32 %v4975_v51, %v4235_v50  ;;  %v667_v4 = vrot.slane %v665_v59, 5 }
  0x93   : > { %v712_v49 = vshrl.u32 %v4092_v41, 16  ;;  %v715_v50 = vshll.u32 %v4092_v41, 16 }
  0x94   : > { %v668_v10 = vsel %vm5525_vm2, %v663_v3, %v667_v4  ;;  %v4111_v3 = vld [vmem:[%s5480_s12 + $0x2c] sm:$0x1]  ;;  %v4112_v4 = vld [vmem:[%s5480_s12 + $0x34] sm:$0x1] }
  0x98   : > { %1746 = vmatmul.bf16.gmra.mxu0 %v4184_v0  ;;  %v4085_v0 = vld [vmem:[%s5480_s12 + $0xf4] sm:$0x1] }
  0x99   : > { %1780 = vmatmul.bf16.gmra.mxu1 %v932_v1  ;;  %v4086_v1 = vld [vmem:[%s5480_s12 + $0xfc] sm:$0x1]  ;;  %v591_v9 = vshll.u32 %v4085_v0, 16 }
  0x9a   : > { %1814 = vmatmul.bf16.gmra.mxu2 %v4204_v6  ;;  %v4231_v6 = vld [vmem:[%s5480_s12 + $0x90] sm:$0xf]  ;;  %v605_v11 = vshll.u32 %v4086_v1, 16  ;;  %v649_v1 = vrot.slane %v648_v56, 4 }
  0x9b   : > { %1848 = vmatmul.bf16.gmra.mxu3 %v4224_v7  ;;  %v4974_v7 = vld [vmem:[%s5480_s12 + $0x94] sm:$0xf0]  ;;  %v593_v20 = vrot.slane %v591_v9, 5 }
  0x9c   : > { %v4232_v17 = vor.u32 %v4974_v7, %v4231_v6  ;;  %v607_v22 = vrot.slane %v605_v11, 5  ;;  %v4090_v6 = vld [vmem:[%s5480_s12 + $0x20] sm:$0xf]  ;;  %v654_v9 = vsel %vm5525_vm2, %v649_v1, %v653_v2  ;;  %v670_v11 = vshrl.u32 %v4089_v5, 16 }
  0x9d   : > { %v594_v25 = vsel %vm5525_vm2, %v589_v19, %v593_v20  ;;  %v1001_v19 = vunpack.c.l.b16 %v654_v9  ;;  %v1002_v20 = vunpack.c.l.b16 %v668_v10 }
  0x9e   : > { %v608_v26 = vsel %vm5525_vm2, %v603_v21, %v607_v22  ;;  %v672_v21 = vrot.slane %v670_v11, 4 }
  0x9f   : > { %v930_v39 = vunpack.c.l.b16 %v608_v26  ;;  %v4110_v26 = vld [vmem:[%s5480_s12 + $0x24] sm:$0x1]  ;;  %v1011_v29 = vpack.c.b16 %v1002_v20, %v1001_v19 }
  0xa8   : > { %1751 = vmatmul.bf16.gmra.mxu0 %v4188_v35 }
  0xa9   : > { %1785 = vmatmul.bf16.gmra.mxu1 %v933_v37  ;;  %v4195_v37 = vld [vmem:[%s5480_s12 + $0x148] sm:$0xf] }
  0xaa   : > { %1819 = vmatmul.bf16.gmra.mxu2 %v4208_v36  ;;  %v4196_v52 = vor.u32 %v4965_v40, %v4195_v37  ;;  %v4091_v40 = vld [vmem:[%s5480_s12 + $0x28] sm:$0xf] }
  0xab   : > { %1853 = vmatmul.bf16.gmra.mxu3 %v4228_v38  ;;  %v929_v38 = vunpack.c.l.b16 %v594_v25  ;;  %v4109_v25 = vld [vmem:[%s5480_s12 + $0x1c] sm:$0x1]  ;;  %v698_v47 = vshrl.u32 %v4091_v40, 16  ;;  %v701_v48 = vshll.u32 %v4091_v40, 16 }
  0xad   : > { %v935_v53 = vpack.c.b16 %v930_v39, %v929_v38  ;;  %v693_v38 = vshll.u32 %v4110_v26, 16 }
  0xaf   : > { %v695_v46 = vrot.slane %v693_v38, 5 }
  0xb5   : > { %v1606_v14 = vpop.f32.mrf.mxu0 }
  0xb6   : > { %v1640_v15 = vpop.f32.mrf.mxu1 }
  0xb7   : > { %v1641_v18 = vadd.f32 %v1640_v15, %v1606_v14  ;;  %v673_v15 = vshll.u32 %v4089_v5, 16 }
  0xb8   : > { %1756 = vmatmul.bf16.gmra.mxu0 %v4192_v12 }
  0xb9   : > { %1790 = vmatmul.bf16.gmra.mxu1 %v934_v13  ;;  %v675_v22 = vrot.slane %v673_v15, 5 }
  0xba   : > { %1824 = vmatmul.bf16.gmra.mxu2 %v4212_v16  ;;  %v684_v16 = vshrl.u32 %v4090_v6, 16 }
  0xbb   : > { %1858 = vmatmul.bf16.gmra.mxu3 %v4232_v17  ;;  %v687_v17 = vshll.u32 %v4090_v6, 16  ;;  %v676_v32 = vor.u32 %v675_v22, %v672_v21  ;;  %v707_v6 = vshll.u32 %v4111_v3, 16  ;;  %v4093_v22 = vld [vmem:[%s5480_s12 + $0x38] sm:$0xf] }
  0xbc   : > { %v686_v23 = vrot.slane %v684_v16, 4 }
  0xbd   : > { %v1674_v27 = vpop.f32.mrf.mxu2  ;;  %v5804_v34 = vpop.f32.mrf.mxu0  ;;  %v689_v24 = vrot.slane %v687_v17, 5  ;;  %v677_v42 = vrot.slane %v676_v32, 4  ;;  %v709_v19 = vrot.slane %v707_v6, 5  ;;  %v4096_v6 = vld [vmem:[%s5480_s12 + $0x50] sm:$0xf] }
  0xbe   : > { %v1708_v28 = vpop.f32.mrf.mxu3  ;;  %v1675_v33 = vadd.f32 %v1674_v27, %v1641_v18  ;;  %v5806_v35 = vpop.f32.mrf.mxu1 }
  0xbf   : > { %v690_v37 = vor.u32 %v689_v24, %v686_v23  ;;  %v4094_v23 = vld [vmem:[%s5480_s12 + $0x40] sm:$0xf] }
  0xc0   : > { %v5808_v36 = vadd.f32 %v1708_v28, %v1675_v33  ;;  %v679_v33 = vshll.u32 %v4109_v25, 16  ;;  %v740_v32 = vshrl.u32 %v4094_v23, 16 }
  0xc1   : > { %v691_v45 = vrot.slane %v690_v37, 4 }
  0xc2   : > { %v681_v43 = vrot.slane %v679_v33, 5  ;;  %v743_v33 = vshll.u32 %v4094_v23, 16 }
  0xc3   : > { %v696_v59 = vsel %vm5525_vm2, %v691_v45, %v695_v46  ;;  %v742_v46 = vrot.slane %v740_v32, 4  ;;  %v4116_v32 = vld [vmem:[%s5480_s12 + $0x54] sm:$0x1] }
  0xc4   : > { %v682_v58 = vsel %vm5525_vm2, %v677_v42, %v681_v43  ;;  %v1004_v2 = vunpack.c.l.b16 %v696_v59 }
  0xc5   : > { %v5818_v54 = vpop.f32.mrf.mxu2  ;;  %v1611_v60 = vpop.f32.mrf.mxu0  ;;  %v1003_v1 = vunpack.c.l.b16 %v682_v58 }
  0xc6   : > { %v5820_v55 = vpop.f32.mrf.mxu3  ;;  %v1645_v61 = vpop.f32.mrf.mxu1 }
  0xc7   : > { %v1646_v0 = vadd.f32 %v1645_v61, %v1611_v60  ;;  %v700_v60 = vrot.slane %v698_v47, 4  ;;  %v1012_v11 = vpack.c.b16 %v1004_v2, %v1003_v1  ;;  %v745_v47 = vrot.slane %v743_v33, 5 }
  0xc8   : > { %1761 = vmatmul.bf16.gmra.mxu0 %v4196_v52 }
  0xc9   : > { %1795 = vmatmul.bf16.gmra.mxu1 %v935_v53  ;;  %v746_v59 = vor.u32 %v745_v47, %v742_v46 }
  0xca   : > { %1829 = vmatmul.bf16.gmra.mxu2 %v4216_v62  ;;  %v703_v62 = vrot.slane %v701_v48, 5  ;;  %v4113_v48 = vld [vmem:[%s5480_s12 + $0x3c] sm:$0x1] }
  0xcb   : > { %1863 = vmatmul.bf16.gmra.mxu3 %v4236_v63  ;;  %v714_v63 = vrot.slane %v712_v49, 4  ;;  %v4114_v49 = vld [vmem:[%s5480_s12 + $0x44] sm:$0x1]  ;;  %v735_v58 = vshll.u32 %v4113_v48, 16  ;;  %v747_v3 = vrot.slane %v746_v59, 4 }
  0xcc   : > { %v704_v5 = vor.u32 %v703_v62, %v700_v60  ;;  %v749_v60 = vshll.u32 %v4114_v49, 16 }
  0xcd   : > { %v1679_v7 = vpop.f32.mrf.mxu2  ;;  %v5828_v13 = vpop.f32.mrf.mxu0  ;;  %v737_v2 = vrot.slane %v735_v58, 5 }
  0xce   : > { %v1713_v8 = vpop.f32.mrf.mxu3  ;;  %v1680_v12 = vadd.f32 %v1679_v7, %v1646_v0  ;;  %v5830_v14 = vpop.f32.mrf.mxu1  ;;  %v717_v0 = vrot.slane %v715_v50, 5  ;;  %v705_v17 = vrot.slane %v704_v5, 4  ;;  %v4095_v5 = vld [vmem:[%s5480_s12 + $0x48] sm:$0xf] }
  0xd0   : > { %v5832_v18 = vadd.f32 %v1713_v8, %v1680_v12  ;;  %v718_v7 = vor.u32 %v717_v0, %v714_v63  ;;  %v721_v8 = vshll.u32 %v4112_v4, 16  ;;  %v710_v24 = vsel %vm5525_vm2, %v705_v17, %v709_v19 }
  0xd1   : > { %v1005_v41 = vunpack.c.l.b16 %v710_v24  ;;  %v751_v4 = vrot.slane %v749_v60, 5  ;;  %v757_v19 = vshll.u32 %v4095_v5, 16 }
  0xd2   : > { %v719_v20 = vrot.slane %v718_v7, 4  ;;  %v723_v21 = vrot.slane %v721_v8, 5 }
  0xd4   : > { %v724_v25 = vsel %vm5525_vm2, %v719_v20, %v723_v21  ;;  %v768_v20 = vshrl.u32 %v4096_v6, 16  ;;  %v771_v21 = vshll.u32 %v4096_v6, 16  ;;  %v5074_v6 = vld [vmem:[#allocation3 + $0x70] sm:$0xff] }
  0xd5   : > { %v5836_v27 = vpop.f32.mrf.mxu2  ;;  %v1616_v30 = vpop.f32.mrf.mxu0  ;;  %v1006_v42 = vunpack.c.l.b16 %v724_v25 }
  0xd6   : > { %v5838_v28 = vpop.f32.mrf.mxu3  ;;  %v1650_v31 = vpop.f32.mrf.mxu1 }
  0xd7   : > { %v1651_v39 = vadd.f32 %v1650_v31, %v1616_v30  ;;  %v726_v30 = vshrl.u32 %v4093_v22, 16  ;;  %v729_v31 = vshll.u32 %v4093_v22, 16  ;;  %v1013_v50 = vpack.c.b16 %v1006_v42, %v1005_v41 }
  0xd8   : > { %1877 = vmatmul.bf16.vlgmr.msra.gmra.mxu0 %v1011_v29 }
  0xd9   : > { %v728_v43 = vrot.slane %v726_v30, 4  ;;  %v731_v45 = vrot.slane %v729_v31, 5  ;;  %v773_v30 = vrot.slane %v771_v21, 5  ;;  %v4115_v31 = vld [vmem:[%s5480_s12 + $0x4c] sm:$0x1] }
  0xda   : > { %v763_v42 = vshll.u32 %v4115_v31, 16  ;;  %v5067_v31 = vld [vmem:[#allocation3 + $0x38] sm:$0xff] }
  0xdb   : > { %5145 = vmatpush.bf16.msra.mxu1 %v5067_v31  ;;  %3484 = vmatpush.bf16.msrb.mxu0 %v5067_v31 }
  0xdc   : > { %v765_v48 = vrot.slane %v763_v42, 5 }
  0xdd   : > { %v1684_v51 = vpop.f32.mrf.mxu2  ;;  %v5842_v56 = vpop.f32.mrf.mxu0 }
  0xde   : > { %v1718_v52 = vpop.f32.mrf.mxu3  ;;  %v1685_v53 = vadd.f32 %v1684_v51, %v1651_v39  ;;  %v5844_v57 = vpop.f32.mrf.mxu1 }
  0xe0   : > { %v5850_v61 = vadd.f32 %v1718_v52, %v1685_v53  ;;  %v732_v53 = vor.u32 %v731_v45, %v728_v43  ;;  %v777_v45 = vshll.u32 %v4116_v32, 16 }
  0xe2   : > { %v733_v1 = vrot.slane %v732_v53, 4 }
  0xe5   : > { %v5854_v9 = vpop.f32.mrf.mxu2  ;;  %v1621_v12 = vpop.f32.mrf.mxu0 }
  0xe6   : > { %v5856_v10 = vpop.f32.mrf.mxu3  ;;  %v1655_v15 = vpop.f32.mrf.mxu1 }
  0xe7   : > { %v1656_v16 = vadd.f32 %v1655_v15, %v1621_v12  ;;  %v752_v12 = vsel %vm5525_vm2, %v747_v3, %v751_v4  ;;  %v754_v15 = vshrl.u32 %v4095_v5, 16  ;;  %v5083_v3 = vld [vmem:[#allocation3 + $0xb8] sm:$0xff] }
  0xe8   : > { %1882 = vmatmul.bf16.gmra.mxu0 %v1012_v11  ;;  %v738_v11 = vsel %vm5525_vm2, %v733_v1, %v737_v2  ;;  %v1008_v24 = vunpack.c.l.b16 %v752_v12  ;;  %v5075_v2 = vld [vmem:[#allocation3 + $0x78] sm:$0xff]  ;;  %3542 = vmatpush.bf16.msra.mxu3 %v5083_v3  ;;  %v5073_v12 = vld [vmem:[#allocation3 + $0x68] sm:$0xff] }
  0xe9   : > { %v1007_v23 = vunpack.c.l.b16 %v738_v11  ;;  %v756_v25 = vrot.slane %v754_v15, 4  ;;  %3513 = vmatpush.bf16.msra.mxu2 %v5075_v2 }
  0xeb   : > { %v1014_v33 = vpack.c.b16 %v1008_v24, %v1007_v23 }
  0xed   : > { %v1689_v26 = vpop.f32.mrf.mxu2  ;;  %v5864_v38 = vpop.f32.mrf.mxu0  ;;  %3514 = vmatpush.bf16.msra.mxu2 %v5074_v6 }
  0xee   : > { %v1723_v29 = vpop.f32.mrf.mxu3  ;;  %v1690_v37 = vadd.f32 %v1689_v26, %v1656_v16  ;;  %v5866_v39 = vpop.f32.mrf.mxu1  ;;  %v759_v26 = vrot.slane %v757_v19, 5 }
  0xf0   : > { %v5868_v40 = vadd.f32 %v1723_v29, %v1690_v37  ;;  %v770_v29 = vrot.slane %v768_v20, 4  ;;  %v760_v41 = vor.u32 %v759_v26, %v756_v25  ;;  %v5081_v20 = vld [vmem:[#allocation3 + $0xa8] sm:$0xff] }
  0xf1   : > { %3515 = vmatpush.bf16.msra.mxu2 %v5073_v12 }
  0xf2   : > { %v774_v43 = vor.u32 %v773_v30, %v770_v29  ;;  %v761_v47 = vrot.slane %v760_v41, 4 }
  0xf4   : > { %v775_v49 = vrot.slane %v774_v43, 4  ;;  %v766_v58 = vsel %vm5525_vm2, %v761_v47, %v765_v48  ;;  %v5065_v47 = vld [vmem:[#allocation3 + $0x28] sm:$0xff] }
  0xf5   : > { %v5872_v51 = vpop.f32.mrf.mxu2  ;;  %v1626_v62 = vpop.f32.mrf.mxu0  ;;  %v1009_v60 = vunpack.c.l.b16 %v766_v58  ;;  %v5064_v58 = vld [vmem:[#allocation3 + $0x20] sm:$0xff] }
  0xf6   : > { %v5874_v52 = vpop.f32.mrf.mxu3  ;;  %v1660_v63 = vpop.f32.mrf.mxu1 }
  0xf7   : > { %v1661_v0 = vadd.f32 %v1660_v63, %v1626_v62 }
  0xf8   : > { %1887 = vmatmul.bf16.gmra.mxu0 %v1013_v50  ;;  %v779_v50 = vrot.slane %v777_v45, 5 }
  0xfa   : > { %v780_v59 = vsel %vm5525_vm2, %v775_v49, %v779_v50 }
  0xfb   : > { %v1010_v62 = vunpack.c.l.b16 %v780_v59  ;;  %v5927_v59 = vld [vmem:[%s6502_s3] ss:$0 sm:$0xff] }
  0xfd   : > { %v1694_v7 = vpop.f32.mrf.mxu2  ;;  %v5882_v17 = vpop.f32.mrf.mxu0  ;;  %v1015_v63 = vpack.c.b16 %v1010_v62, %v1009_v60  ;;  %v5934_v62 = vld [vmem:[%s6502_s3 + $0x1] ss:$0 sm:$0xff] }
  0xfe   : > { %v1728_v8 = vpop.f32.mrf.mxu3  ;;  %v1695_v16 = vadd.f32 %v1694_v7, %v1661_v0  ;;  %v5082_v7 = vld [vmem:[#allocation3 + $0xb0] sm:$0xff] }
  0xff   : > { %3543 = vmatpush.bf16.msra.mxu3 %v5082_v7  ;;  %v5062_v7 = vld [vmem:[#allocation3 + $0x10] sm:$0xff] }
 0x100   : > { %v1729_v22 = vadd.f32 %v1728_v8, %v1695_v16  ;;  %v5899_v8 = vpop.f32.mrf.mxu1 }
 0x103   : > { %3544 = vmatpush.bf16.msra.mxu3 %v5081_v20 }
 0x105   : > { %v1742_v37 = vpop.f32.mrf.mxu0 }
 0x106   : > { %v1743_v46 = vadd.f32 %v1742_v37, %v5808_v36  ;;  %v5905_v15 = vpop.f32.mrf.mxu3  ;;  %v1643_v37 = vadd.f32 %v5806_v35, %v5804_v34  ;;  %v5072_v35 = vld [vmem:[#allocation3 + $0x60] sm:$0xff] }
 0x107   : > { %3516 = vmatpush.bf16.msra.mxu2 %v5072_v35 }
 0x108   : > { %1892 = vmatmul.bf16.gmra.mxu0 %v1014_v33  ;;  %v1776_v16 = vpop.f32.mrf.mxu1  ;;  %v1677_v41 = vadd.f32 %v5818_v54, %v1643_v37 }
 0x109   : > { %v1777_v45 = vadd.f32 %v1776_v16, %v1743_v46  ;;  %v5079_v16 = vld [vmem:[#allocation3 + $0x98] sm:$0xff] }
 0x10d   : > { %v1744_v53 = vpop.f32.mrf.mxu0 }
 0x10e   : > { %v1844_v24 = vpop.f32.mrf.mxu3 }
 0x110   : > { %v1778_v25 = vpop.f32.mrf.mxu1 }
 0x115   : > { %v1747_v0 = vpop.f32.mrf.mxu0 }
 0x116   : > { %v5892_v1 = vadd.f32 %v1747_v0, %v5832_v18  ;;  %v5903_v18 = vpop.f32.mrf.mxu2  ;;  %v1846_v32 = vpop.f32.mrf.mxu3  ;;  %v5080_v0 = vld [vmem:[#allocation3 + $0xa0] sm:$0xff] }
 0x117   : > { %3545 = vmatpush.bf16.msra.mxu3 %v5080_v0  ;;  %v5070_v0 = vld [vmem:[#allocation3 + $0x50] sm:$0xff] }
 0x118   : > { %1897 = vmatmul.bf16.gmra.mxu0 %v1015_v63  ;;  %v1781_v33 = vpop.f32.mrf.mxu1  ;;  %v5063_v63 = vld [vmem:[#allocation3 + $0x18] sm:$0xff] }
 0x11b   : > { %3546 = vmatpush.bf16.msra.mxu3 %v5079_v16  ;;  %v5076_v16 = vld [vmem:[#allocation3 + $0x80] sm:$0xff] }
 0x11d   : > { %v5894_v36 = vpop.f32.mrf.mxu0 }
 0x11e   : > { %v1810_v21 = vpop.f32.mrf.mxu2  ;;  %v5920_v50 = vpop.f32.mrf.mxu3 }
 0x11f   : > { %v1811_v48 = vadd.f32 %v1810_v21, %v1777_v45 }
 0x120   : > { %v5922_v34 = vpop.f32.mrf.mxu1 }
 0x121   : > { %v1845_v54 = vadd.f32 %v1844_v24, %v1811_v48  ;;  %v1782_v24 = vadd.f32 %v1781_v33, %v5892_v1  ;;  %v5060_v48 = vld [vmem:[#allocation3] sm:$0xff] }
 0x125   : > { %v1752_v4 = vpop.f32.mrf.mxu0 }
 0x126   : > { %v5897_v5 = vadd.f32 %v1752_v4, %v5850_v61  ;;  %v1812_v26 = vpop.f32.mrf.mxu2  ;;  %v1648_v4 = vadd.f32 %v5830_v14, %v5828_v13  ;;  %v5941_v20 = vpop.f32.mrf.mxu3 }
 0x128   : > { %v1682_v12 = vadd.f32 %v5836_v27, %v1648_v4  ;;  %v5078_v27 = vld [vmem:[#allocation3 + $0x90] sm:$0xff] }
 0x129   : > { %3547 = vmatpush.bf16.msra.mxu3 %v5078_v27 }
 0x12a   : > { %v1716_v31 = vadd.f32 %v5838_v28, %v1682_v12 }
 0x12c   : > { %v1750_v33 = vadd.f32 %v5894_v36, %v1716_v31  ;;  %v2056_v36 = vld [vmem:[#allocation2 + $0x4] sm:$0x1] }
 0x12d   : > { %v5901_v11 = vpop.f32.mrf.mxu0 }
 0x12e   : > { %v1815_v42 = vpop.f32.mrf.mxu2 }
 0x12f   : > { %v1816_v37 = vadd.f32 %v1815_v42, %v1782_v24  ;;  %v2050_v42 = vld [vmem:[#allocation2] sm:$0xf]  ;;  %v1653_v24 = vadd.f32 %v5844_v57, %v5842_v56  ;;  %v5142_v56 = vld [vmem:[%s6503_s4 + $0x30] sm:$0xff] }
 0x131   : > { %v1850_v35 = vadd.f32 %v5920_v50, %v1816_v37  ;;  %v5114_v37 = vld [vmem:[#allocation3 + $0x1b0] sm:$0xff]  ;;  %v1687_v27 = vadd.f32 %v5854_v9, %v1653_v24 }
 0x135   : > { %v1757_v19 = vpop.f32.mrf.mxu0 }
 0x136   : > { %v5908_v61 = vadd.f32 %v1757_v19, %v5868_v40  ;;  %v5066_v40 = vld [vmem:[#allocation3 + $0x30] sm:$0xff]  ;;  %v5929_v60 = vpop.f32.mrf.mxu2 }
 0x137   : > { %3485 = vmatpush.bf16.msrb.mxu0 %v5066_v40  ;;  %5146 = vmatpush.bf16.msra.mxu1 %v5066_v40 }
 0x13b   : > { %3486 = vmatpush.bf16.msrb.mxu0 %v5065_v47  ;;  %5147 = vmatpush.bf16.msra.mxu1 %v5065_v47 }
 0x13d   : > { %v5910_v23 = vpop.f32.mrf.mxu0 }
 0x13f   : > { %3487 = vmatpush.bf16.msrb.mxu0 %v5064_v58  ;;  %5148 = vmatpush.bf16.msra.mxu1 %v5064_v58  ;;  %v5077_v58 = vld [vmem:[#allocation3 + $0x88] sm:$0xff] }
 0x140   : > { %3548 = vmatpush.bf16.msra.mxu3 %v5077_v58  ;;  %v1721_v58 = vadd.f32 %v5856_v10, %v1687_v27  ;;  %v1658_v10 = vadd.f32 %v5866_v39, %v5864_v38  ;;  %v2068_v38 = vld [vmem:[#allocation2 + $0x14] sm:$0x1] }
 0x141   : > { %v5112_v27 = vld [vmem:[#allocation3 + $0x1a0] sm:$0xff] }
 0x143   : > { %3488 = vmatpush.bf16.msrb.mxu0 %v5063_v63  ;;  %5149 = vmatpush.bf16.msra.mxu1 %v5063_v63 }
 0x144   : > { %3549 = vmatpush.bf16.msra.mxu3 %v5076_v16  ;;  %v2065_v16 = vld [vmem:[#allocation2 + $0x10] sm:$0xf] }
 0x145   : > { %v1762_v29 = vpop.f32.mrf.mxu0 }
 0x146   : > { %v5912_v30 = vadd.f32 %v1762_v29, %v1729_v22  ;;  %v1711_v22 = vadd.f32 %v5820_v55, %v1677_v41  ;;  %v5061_v29 = vld [vmem:[#allocation3 + $0x8] sm:$0xff]  ;;  %v5071_v41 = vld [vmem:[#allocation3 + $0x58] sm:$0xff] }
 0x147   : > { %3489 = vmatpush.bf16.msrb.mxu0 %v5062_v7  ;;  %5150 = vmatpush.bf16.msra.mxu1 %v5062_v7  ;;  %v5115_v7 = vld [vmem:[#allocation3 + $0x1b8] sm:$0xff] }
 0x148   : > { %v1745_v49 = vadd.f32 %v1744_v53, %v1711_v22  ;;  %3517 = vmatpush.bf16.msra.mxu2 %v5071_v41 }
 0x14a   : > { %v1779_v55 = vadd.f32 %v1778_v25, %v1745_v49  ;;  %v5944_v25 = vpop.f32.mrf.mxu1 }
 0x14b   : > { %3490 = vmatpush.bf16.msrb.mxu0 %v5061_v29  ;;  %5151 = vmatpush.bf16.msra.mxu1 %v5061_v29 }
 0x14c   : > { %v1813_v2 = vadd.f32 %v1812_v26, %v1779_v55  ;;  %3518 = vmatpush.bf16.msra.mxu2 %v5070_v0 }
 0x14d   : > { %v5917_v43 = vpop.f32.mrf.mxu0 }
 0x14e   : > { %v1847_v19 = vadd.f32 %v1846_v32, %v1813_v2  ;;  %v5947_v32 = vpop.f32.mrf.mxu2  ;;  %v5965_v2 = vpop.f32.mrf.mxu3 }
 0x14f   : > { %3491 = vmatpush.bf16.msrb.mxu0 %v5060_v48  ;;  %5152 = vmatpush.bf16.msra.mxu1 %v5060_v48 }
 0x152   : > { %v5971_v12 = vpop.f32.mrf.mxu1 }
 0x153   : > { %3658 = vmatpush.bf16.msra.mxu0 %v5115_v7  ;;  %v1692_v7 = vadd.f32 %v5872_v51, %v1658_v10  ;;  %v5111_v10 = vld [vmem:[#allocation3 + $0x198] sm:$0xff] }
 0x155   : > { %v1878_v46 = vpop.f32.mrf.mxu0 }
 0x156   : > { %v1879_v53 = vadd.f32 %v1878_v46, %v1845_v54 }
 0x157   : > { %3659 = vmatpush.bf16.msra.mxu0 %v5114_v37 }
 0x158   : > { %v1905_v3 = vmul.f32 %v5927_v59, %v1879_v53  ;;  %v1784_v53 = vadd.f32 %v5922_v34, %v1750_v33 }
 0x15a   : > { %v1917_v6 = vadd.f32 %v5934_v62, %v1905_v3  ;;  %v1818_v34 = vadd.f32 %v5929_v60, %v1784_v53  ;;  %v2059_v60 = vld [vmem:[#allocation2 + $0x8] sm:$0xf]  ;;  %v1791_v0 = vpop.f32.mrf.mxu1 }
 0x15c   : > { %v1927_v21 = vmax.f32 %v1917_v6, 0.0 }
 0x15d   : > { %v1880_v26 = vpop.f32.mrf.mxu0 }
 0x15e   : > { %v1937_v13 = vpack.c.bf16 %v1927_v21, %v1927_v21  ;;  %v1881_v14 = vadd.f32 %v1880_v26, %v1847_v19  ;;  %v5069_v26 = vld [vmem:[#allocation3 + $0x48] sm:$0xff] }
 0x15f   : > { %3519 = vmatpush.bf16.msra.mxu2 %v5069_v26 }
 0x160   : > { %v1948_v40 = vshrl.u32 %v1937_v13, 16  ;;  %v1906_v1 = vmul.f32 %v5927_v59, %v1881_v14  ;;  %v1951_v47 = vshll.u32 %v1937_v13, 16  ;;  %v5977_v13 = vpop.f32.mrf.mxu2 }
 0x162   : > { %v1950_v45 = vrot.slane %v1948_v40, 7  ;;  %v1918_v22 = vadd.f32 %v5934_v62, %v1906_v1  ;;  %v1852_v40 = vadd.f32 %v5941_v20, %v1818_v34  ;;  %v2062_v20 = vld [vmem:[#allocation2 + $0xc] sm:$0x1] }
 0x164   : > { %v1953_v54 = vor.u32 %v1951_v47, %v1950_v45  ;;  %v1954_v46 = vrot.slane %v1950_v45, 4  ;;  %v1928_v55 = vmax.f32 %v1918_v22, 0.0  ;;  %v5068_v45 = vld [vmem:[#allocation3 + $0x40] sm:$0xff]  ;;  %v1787_v47 = vadd.f32 %v5944_v25, %v5897_v5 }
 0x165   : > { %v1883_v63 = vpop.f32.mrf.mxu0  ;;  %3520 = vmatpush.bf16.msra.mxu2 %v5068_v45 }
 0x166   : > { %v2051_v3 = vsel %vm5953_vm7, %v1953_v54, %v2050_v42  ;;  %v2057_v4 = vsel %vm5959_vm8, %v1954_v46, %v2056_v36  ;;  %v1938_v6 = vpack.c.bf16 %v1928_v55, %v1928_v55  ;;  %v1884_v50 = vadd.f32 %v1883_v63, %v1850_v35  ;;  %v5113_v36 = vld [vmem:[#allocation3 + $0x1a8] sm:$0xff]  ;;  %v1856_v55 = vpop.f32.mrf.mxu3 }
 0x167   : > { %2052 = vst [vmem:[#allocation2] sm:$0xf] %v2051_v3  ;;  %v1821_v46 = vadd.f32 %v5947_v32, %v1787_v47  ;;  %3660 = vmatpush.bf16.msra.mxu0 %v5113_v36  ;;  %v1755_v63 = vadd.f32 %v5901_v11, %v1721_v58  ;;  %v5348_v32 = vmov 0  }
 0x168   : > { %2058 = vst [vmem:[#allocation2 + $0x4] sm:$0x1] %v2057_v4  ;;  %v1956_v19 = vshrl.u32 %v1938_v6, 16  ;;  %v1907_v21 = vmul.f32 %v5927_v59, %v1884_v50  ;;  %v1959_v29 = vshll.u32 %v1938_v6, 16  ;;  %v1825_v11 = vpop.f32.mrf.mxu2 }
 0x169   : > { %v1855_v39 = vadd.f32 %v5965_v2, %v1821_v46  ;;  %v1789_v24 = vadd.f32 %v5971_v12, %v1755_v63 }
 0x16a   : > { %v1958_v14 = vrot.slane %v1956_v19, 7  ;;  %v1919_v31 = vadd.f32 %v5934_v62, %v1907_v21 }
 0x16b   : > { %v1823_v2 = vadd.f32 %v5977_v13, %v1789_v24  ;;  %3661 = vmatpush.bf16.msra.mxu0 %v5112_v27 }
 0x16c   : > { %v1961_v1 = vor.u32 %v1959_v29, %v1958_v14  ;;  %v1929_v33 = vmax.f32 %v1919_v31, 0.0  ;;  %v1962_v57 = vrot.slane %v1958_v14, 4 }
 0x16d   : > { %v1885_v41 = vpop.f32.mrf.mxu0 }
 0x16e   : > { %v2113_v9 = vld [vmem:[#allocation2] sm:$0x1]  ;;  %v2060_v42 = vsel %vm5953_vm7, %v1961_v1, %v2059_v60  ;;  %v1939_v22 = vpack.c.bf16 %v1929_v33, %v1929_v33  ;;  %v1886_v48 = vadd.f32 %v1885_v41, %v1852_v40  ;;  %v2063_v3 = vsel %vm5959_vm8, %v1962_v57, %v2062_v20  ;;  %v2071_v41 = vld [vmem:[#allocation2 + $0x18] sm:$0xf]  ;;  %v1859_v13 = vpop.f32.mrf.mxu3 }
 0x16f   : > { %v2114_v35 = vsel %vm5959_vm8, 0, %v2113_v9  ;;  %v2144_v54 = vld [vmem:[#allocation2 + $0x4] sm:$0x1]  ;;  %2061 = vst [vmem:[#allocation2 + $0x8] sm:$0xf] %v2060_v42  ;;  %v1726_v40 = vadd.f32 %v5874_v52, %v1692_v7  ;;  %v1663_v33 = vadd.f32 %v5899_v8, %v5882_v17  ;;  %v1792_v57 = vadd.f32 %v1791_v0, %v5908_v61  ;;  %v1793_v8 = vpop.f32.mrf.mxu1  ;;  %3662 = vmatpush.bf16.msra.mxu0 %v5111_v10 }
 0x170   : > { %2115 = vst [vmem:[#allocation2] sm:$0x1] %v2114_v35  ;;  %v2145_v5 = vsel %vm5984_vm9, 0, %v2144_v54  ;;  %v1964_v25 = vshrl.u32 %v1939_v22, 16  ;;  %v1908_v53 = vmul.f32 %v5927_v59, %v1886_v48  ;;  %v1967_v6 = vshll.u32 %v1939_v22, 16 }
 0x171   : > { %2146 = vst [vmem:[#allocation2 + $0x4] sm:$0x1] %v2145_v5  ;;  %v2074_v42 = vld [vmem:[#allocation2 + $0x1c] sm:$0x1]  ;;  %v1697_v22 = vadd.f32 %v5903_v18, %v1663_v33  ;;  %v1857_v48 = vadd.f32 %v1856_v55, %v1823_v2  ;;  %v1826_v36 = vadd.f32 %v1825_v11, %v1792_v57  ;;  %v1760_v17 = vadd.f32 %v5910_v23, %v1726_v40  ;;  %v5110_v11 = vld [vmem:[#allocation3 + $0x190] sm:$0xff] }
 0x172   : > { %2178 = vst [vmem:[#allocation2] sm:$0xf] %v5348_v32  ;;  %v1966_v4 = vrot.slane %v1964_v25, 7  ;;  %v1920_v50 = vadd.f32 %v5934_v62, %v1908_v53 }
 0x173   : > { %2179 = vst [vmem:[#allocation2 + $0x4] sm:$0x1] %v5348_v32  ;;  %v1860_v27 = vadd.f32 %v1859_v13, %v1826_v36  ;;  %3663 = vmatpush.bf16.msra.mxu0 %v5110_v11 }
 0x174   : > { %2064 = vst [vmem:[#allocation2 + $0xc] sm:$0x1] %v2063_v3  ;;  %v1969_v34 = vor.u32 %v1967_v6, %v1966_v4  ;;  %v1970_v19 = vrot.slane %v1966_v4, 4  ;;  %v1930_v21 = vmax.f32 %v1920_v50, 0.0  ;;  %v1827_v4 = vpop.f32.mrf.mxu2 }
 0x175   : > { %v1888_v26 = vpop.f32.mrf.mxu0 }
 0x176   : > { %v2116_v14 = vld [vmem:[#allocation2 + $0x8] sm:$0x1]  ;;  %v2066_v29 = vsel %vm5953_vm7, %v1969_v34, %v2065_v16  ;;  %v2069_v51 = vsel %vm5959_vm8, %v1970_v19, %v2068_v38  ;;  %v1940_v31 = vpack.c.bf16 %v1930_v21, %v1930_v21  ;;  %v1889_v37 = vadd.f32 %v1888_v26, %v1855_v39  ;;  %v2312_v39 = vld [vmem:[#allocation2 + $0x8] sm:$0xe] }
 0x177   : > { %v2117_v60 = vsel %vm5959_vm8, 0, %v2116_v14  ;;  %2067 = vst [vmem:[#allocation2 + $0x10] sm:$0xf] %v2066_v29  ;;  %v6038_v34 = vadd.f32 %v5905_v15, %v1697_v22  ;;  %v1794_v19 = vadd.f32 %v1793_v8, %v1760_v17 }
 0x178   : > { %2118 = vst [vmem:[#allocation2 + $0x8] sm:$0x1] %v2117_v60  ;;  %v1972_v12 = vshrl.u32 %v1940_v31, 16  ;;  %v1909_v1 = vmul.f32 %v5927_v59, %v1889_v37  ;;  %v1975_v9 = vshll.u32 %v1940_v31, 16  ;;  %v2077_v60 = vld [vmem:[#allocation2 + $0x20] sm:$0xf] }
 0x179   : > { %2070 = vst [vmem:[#allocation2 + $0x14] sm:$0x1] %v2069_v51  ;;  %v2311_v45 = vld [vmem:[#allocation2] sm:$0xe]  ;;  %v1828_v15 = vadd.f32 %v1827_v4, %v1794_v19 }
 0x17a   : > { %v1974_v47 = vrot.slane %v1972_v12, 7  ;;  %v1921_v52 = vadd.f32 %v5934_v62, %v1909_v1  ;;  %v4525_v20 = vrot.slane %v2311_v45, 9  ;;  %v2191_v58 = vld [vmem:[#allocation2 + $0x4] sm:$0x1]  ;;  %v2183_v35 = vld [vmem:[#allocation2] sm:$0xf] }
 0x17b   : > { %v2147_v61 = vld [vmem:[#allocation2 + $0xc] sm:$0x1]  ;;  %v4551_v53 = vld [vmem:[#allocation2] sm:$0xf]  ;;  %v2340_v23 = vrot.slane %v2191_v58, 5  ;;  %v2200_v55 = vshrl.u32 %v2183_v35, 16 }
 0x17c   : > { %v2148_v54 = vsel %vm5984_vm9, 0, %v2147_v61  ;;  %v1977_v46 = vor.u32 %v1975_v9, %v1974_v47  ;;  %v1978_v5 = vrot.slane %v1974_v47, 4  ;;  %v1931_v25 = vmax.f32 %v1921_v52, 0.0  ;;  %v2080_v45 = vld [vmem:[#allocation2 + $0x24] sm:$0x1]  ;;  %v5109_v52 = vld [vmem:[#allocation3 + $0x188] sm:$0xff]  ;;  %v1796_v61 = vpop.f32.mrf.mxu1 }
 0x17d   : > { %2149 = vst [vmem:[#allocation2 + $0xc] sm:$0x1] %v2148_v54  ;;  %v1890_v63 = vpop.f32.mrf.mxu0  ;;  %v2203_v0 = vshll.u32 %v2183_v35, 16  ;;  %v2209_v3 = vshll.u32 %v2191_v58, 16  ;;  %v2202_v26 = vrot.slane %v2200_v55, 4  ;;  %v6045_v37 = vsel %vm6029_vm12, %v4525_v20, %v2340_v23  ;;  %v1861_v20 = vpop.f32.mrf.mxu3  ;;  %3664 = vmatpush.bf16.msra.mxu0 %v5109_v52 }
 0x17e   : > { %v2119_v6 = vld [vmem:[#allocation2 + $0x10] sm:$0x1]  ;;  %v2072_v50 = vsel %vm5953_vm7, %v1977_v46, %v2071_v41  ;;  %v2075_v7 = vsel %vm5959_vm8, %v1978_v5, %v2074_v42  ;;  %v1941_v16 = vpack.c.bf16 %v1931_v25, %v1931_v25  ;;  %v1891_v38 = vadd.f32 %v1890_v63, %v1857_v48  ;;  %v6055_v55 = vld [vmem:[#allocation2 + $0x10] sm:$0xe] }
 0x17f   : > { %v2120_v21 = vsel %vm5959_vm8, 0, %v2119_v6  ;;  %2073 = vst [vmem:[#allocation2 + $0x18] sm:$0xf] %v2072_v50  ;;  %v5048_v24 = vld [vmem:[#allocation2 + $0x4] sm:$0xf0]  ;;  %v2205_v12 = vrot.slane %v2203_v0, 5  ;;  %v2780_v47 = vunpack.c.l.b16 %v6045_v37  ;;  %v1862_v0 = vadd.f32 %v1861_v20, %v1828_v15 }
 0x180   : > { %2121 = vst [vmem:[#allocation2 + $0x10] sm:$0x1] %v2120_v21  ;;  %v2150_v14 = vld [vmem:[#allocation2 + $0x14] sm:$0x1]  ;;  %v1980_v29 = vshrl.u32 %v1941_v16, 16  ;;  %v1910_v51 = vmul.f32 %v5927_v59, %v1891_v38  ;;  %v4552_v31 = vor.u32 %v5048_v24, %v4551_v53  ;;  %v1983_v33 = vshll.u32 %v1941_v16, 16  ;;  %v1830_v16 = vpop.f32.mrf.mxu2 }
 0x181   : > { %v2151_v2 = vsel %vm5984_vm9, 0, %v2150_v14  ;;  %2076 = vst [vmem:[#allocation2 + $0x1c] sm:$0x1] %v2075_v7  ;;  %v2184_v40 = vld [vmem:[#allocation2 + $0x8] sm:$0xf]  ;;  %v4526_v41 = vrot.slane %v2312_v39, 9  ;;  %v2206_v9 = vor.u32 %v2205_v12, %v2202_v26  ;;  %v1797_v7 = vadd.f32 %v1796_v61, %v5912_v30 }
 0x182   : > { %2152 = vst [vmem:[#allocation2 + $0x14] sm:$0x1] %v2151_v2  ;;  %v1982_v1 = vrot.slane %v1980_v29, 7  ;;  %v1922_v57 = vadd.f32 %v5934_v62, %v1910_v51  ;;  %3492 = vmatmul.bf16.vlgmr.msrb.gmra.mxu0 %v4552_v31  ;;  %v2214_v13 = vshrl.u32 %v2184_v40, 16  ;;  %v2217_v42 = vshll.u32 %v2184_v40, 16  ;;  %v5107_v15 = vld [vmem:[#allocation3 + $0x178] sm:$0xff] }
 0x183   : > { %v2211_v8 = vrot.slane %v2209_v3, 5  ;;  %v2207_v54 = vrot.slane %v2206_v9, 4  ;;  %v2083_v24 = vld [vmem:[#allocation2 + $0x28] sm:$0xf]  ;;  %v1831_v2 = vadd.f32 %v1830_v16, %v1797_v7  ;;  %v4527_v12 = vrot.slane %v6055_v55, 9  ;;  %3629 = vmatpush.bf16.msrb.mxu3 %v5107_v15 }
 0x184   : > { %v1985_v22 = vor.u32 %v1983_v33, %v1982_v1  ;;  %v1986_v48 = vrot.slane %v1982_v1, 4  ;;  %v1932_v36 = vmax.f32 %v1922_v57, 0.0  ;;  %v2192_v17 = vld [vmem:[#allocation2 + $0xc] sm:$0x1]  ;;  %v2216_v46 = vrot.slane %v2214_v13, 4  ;;  %v5108_v33 = vld [vmem:[#allocation3 + $0x180] sm:$0xff] }
 0x185   : > { %v1893_v58 = vpop.f32.mrf.mxu0  ;;  %v2344_v35 = vrot.slane %v2192_v17, 5  ;;  %v2219_v5 = vrot.slane %v2217_v42, 5  ;;  %v2212_v26 = vsel %vm5525_vm2, %v2207_v54, %v2211_v8  ;;  %v2223_v29 = vshll.u32 %v2192_v17, 16  ;;  %3665 = vmatpush.bf16.msra.mxu0 %v5108_v33 }
 0x186   : > { %v2122_v25 = vld [vmem:[#allocation2 + $0x18] sm:$0x1]  ;;  %v2078_v53 = vsel %vm5953_vm7, %v1985_v22, %v2077_v60  ;;  %v2081_v10 = vsel %vm5959_vm8, %v1986_v48, %v2080_v45  ;;  %v1942_v63 = vpack.c.bf16 %v1932_v36, %v1932_v36  ;;  %v1894_v23 = vadd.f32 %v1893_v58, %v1860_v27  ;;  %v6061_v50 = vld [vmem:[#allocation2 + $0x18] sm:$0xe]  ;;  %v5099_v27 = vld [vmem:[#allocation3 + $0x138] sm:$0xff]  ;;  %v1864_v36 = vpop.f32.mrf.mxu3 }
 0x187   : > { %v2123_v3 = vsel %vm5959_vm8, 0, %v2122_v25  ;;  %2079 = vst [vmem:[#allocation2 + $0x20] sm:$0xf] %v2078_v53  ;;  %v2345_v4 = vsel %vm6029_vm12, %v4526_v41, %v2344_v35  ;;  %v2220_v6 = vor.u32 %v2219_v5, %v2216_v46  ;;  %v2086_v60 = vld [vmem:[#allocation2 + $0x2c] sm:$0x1]  ;;  %v2225_v40 = vrot.slane %v2223_v29, 5  ;;  %3600 = vmatpush.bf16.msrb.mxu2 %v5099_v27 }
 0x188   : > { %2124 = vst [vmem:[#allocation2 + $0x18] sm:$0x1] %v2123_v3  ;;  %v2153_v38 = vld [vmem:[#allocation2 + $0x1c] sm:$0x1]  ;;  %v1988_v39 = vshrl.u32 %v1942_v63, 16  ;;  %v1911_v11 = vmul.f32 %v5927_v59, %v1894_v23  ;;  %v2781_v19 = vunpack.c.l.b16 %v2345_v4  ;;  %v1991_v30 = vshll.u32 %v1942_v63, 16  ;;  %v1798_v23 = vpop.f32.mrf.mxu1 }
 0x189   : > { %v2154_v21 = vsel %vm5984_vm9, 0, %v2153_v38  ;;  %2082 = vst [vmem:[#allocation2 + $0x24] sm:$0x1] %v2081_v10  ;;  %v2221_v14 = vrot.slane %v2220_v6, 4  ;;  %v4528_v1 = vrot.slane %v6061_v50, 9  ;;  %v2764_v9 = vunpack.c.l.b16 %v2212_v26  ;;  %v5091_v46 = vld [vmem:[#allocation3 + $0xf8] sm:$0xff] }
 0x18a   : > { %2155 = vst [vmem:[#allocation2 + $0x1c] sm:$0x1] %v2154_v21  ;;  %v1990_v51 = vrot.slane %v1988_v39, 7  ;;  %v1923_v31 = vadd.f32 %v5934_v62, %v1911_v11  ;;  %v2788_v37 = vpack.c.b16 %v2781_v19, %v2780_v47  ;;  %v6072_v13 = vld [vmem:[#allocation2 + $0x14] sm:$0x1]  ;;  %v1765_v5 = vadd.f32 %v5917_v43, %v6038_v34  ;;  %3571 = vmatpush.bf16.msrb.mxu1 %v5091_v46  ;;  %v5098_v11 = vld [vmem:[#allocation3 + $0x130] sm:$0xff] }
 0x18b   : > { %v2185_v42 = vld [vmem:[#allocation2 + $0x10] sm:$0xf]  ;;  %v2226_v52 = vsel %vm5525_vm2, %v2221_v14, %v2225_v40  ;;  %v2348_v20 = vrot.slane %v6072_v13, 5  ;;  %v1865_v26 = vadd.f32 %v1864_v36, %v1831_v2  ;;  %3601 = vmatpush.bf16.msrb.mxu2 %v5098_v11  ;;  %v2095_v46 = vld [vmem:[#allocation2 + $0x38] sm:$0xf] }
 0x18c   : > { %v1993_v57 = vor.u32 %v1991_v30, %v1990_v51  ;;  %v1994_v41 = vrot.slane %v1990_v51, 4  ;;  %v1933_v45 = vmax.f32 %v1923_v31, 0.0  ;;  %3550 = vmatmul.bf16.vlgmr.msra.gmra.mxu3 %v2788_v37  ;;  %v2228_v22 = vshrl.u32 %v2185_v42, 16  ;;  %v4555_v54 = vld [vmem:[#allocation2 + $0x10] sm:$0xf]  ;;  %v1832_v37 = vpop.f32.mrf.mxu2 }
 0x18d   : > { %v1895_v47 = vpop.f32.mrf.mxu0  ;;  %v2231_v48 = vshll.u32 %v2185_v42, 16  ;;  %v2765_v53 = vunpack.c.l.b16 %v2226_v52  ;;  %v2349_v19 = vsel %vm6029_vm12, %v4527_v12, %v2348_v20  ;;  %v1799_v14 = vadd.f32 %v1798_v23, %v1765_v5  ;;  %v2089_v29 = vld [vmem:[#allocation2 + $0x30] sm:$0xf]  ;;  %v2092_v51 = vld [vmem:[#allocation2 + $0x34] sm:$0x1]  ;;  %v5090_v12 = vld [vmem:[#allocation3 + $0xf0] sm:$0xff] }
 0x18e   : > { %v2125_v17 = vld [vmem:[#allocation2 + $0x20] sm:$0x1]  ;;  %v2084_v8 = vsel %vm5953_vm7, %v1993_v57, %v2083_v24  ;;  %v2087_v61 = vsel %vm5959_vm8, %v1994_v41, %v2086_v60  ;;  %v1943_v58 = vpack.c.bf16 %v1933_v45, %v1933_v45  ;;  %v1896_v35 = vadd.f32 %v1895_v47, %v1862_v0  ;;  %3572 = vmatpush.bf16.msrb.mxu1 %v5090_v12  ;;  %v5089_v20 = vld [vmem:[#allocation3 + $0xe8] sm:$0xff]  ;;  %v1866_v36 = vpop.f32.mrf.mxu3  ;;  %v2372_v49 = vld [vmem:[#allocation2 + $0x10] sm:$0xf] }
 0x18f   : > { %v2126_v25 = vsel %vm5959_vm8, 0, %v2125_v17  ;;  %2085 = vst [vmem:[#allocation2 + $0x28] sm:$0xf] %v2084_v8  ;;  %v5049_v10 = vld [vmem:[#allocation2 + $0x14] sm:$0xf0]  ;;  %v2230_v63 = vrot.slane %v2228_v22, 4  ;;  %v2772_v43 = vpack.c.b16 %v2765_v53, %v2764_v9  ;;  %v2782_v2 = vunpack.c.l.b16 %v2349_v19 }
 0x190   : > { %2127 = vst [vmem:[#allocation2 + $0x20] sm:$0x1] %v2126_v25  ;;  %v2156_v55 = vld [vmem:[#allocation2 + $0x24] sm:$0x1]  ;;  %v1996_v3 = vshrl.u32 %v1943_v58, 16  ;;  %v1999_v4 = vshll.u32 %v1943_v58, 16  ;;  %v1912_v6 = vmul.f32 %v5927_v59, %v1896_v35  ;;  %v4556_v0 = vor.u32 %v5049_v10, %v4555_v54 }
 0x191   : > { %v2157_v7 = vsel %vm5984_vm9, 0, %v2156_v55  ;;  %2088 = vst [vmem:[#allocation2 + $0x2c] sm:$0x1] %v2087_v61  ;;  %v6088_v34 = vld [vmem:[#allocation2 + $0x1c] sm:$0x1]  ;;  %v2233_v16 = vrot.slane %v2231_v48, 5  ;;  %3521 = vmatmul.bf16.vlgmr.msra.gmra.mxu2 %v2772_v43 }
 0x192   : > { %2158 = vst [vmem:[#allocation2 + $0x24] sm:$0x1] %v2157_v7  ;;  %v1998_v38 = vrot.slane %v1996_v3, 7  ;;  %v1924_v39 = vadd.f32 %v5934_v62, %v1912_v6  ;;  %3497 = vmatmul.bf16.gmra.mxu0 %v4556_v0  ;;  %v2352_v21 = vrot.slane %v6088_v34, 5  ;;  %v5106_v24 = vld [vmem:[#allocation3 + $0x170] sm:$0xff]  ;;  %v2237_v41 = vshll.u32 %v6072_v13, 16  ;;  %3573 = vmatpush.bf16.msrb.mxu1 %v5089_v20 }
 0x193   : > { %v2186_v30 = vld [vmem:[#allocation2 + $0x18] sm:$0xf]  ;;  %v2234_v31 = vor.u32 %v2233_v16, %v2230_v63  ;;  %3630 = vmatpush.bf16.msrb.mxu3 %v5106_v24  ;;  %v2315_v13 = vld [vmem:[#allocation2 + $0x20] sm:$0xe]  ;;  %v2098_v5 = vld [vmem:[#allocation2 + $0x3c] sm:$0x1] }
 0x194   : > { %v2001_v27 = vor.u32 %v1999_v4, %v1998_v38  ;;  %v2002_v15 = vrot.slane %v1998_v38, 4  ;;  %v1934_v60 = vmax.f32 %v1924_v39, 0.0  ;;  %v2353_v40 = vsel %vm6029_vm12, %v4528_v1, %v2352_v21  ;;  %v5097_v7 = vld [vmem:[#allocation3 + $0x128] sm:$0xff]  ;;  %v4583_v21 = vld [vmem:[#allocation2 + $0x10] sm:$0xf]  ;;  %v5103_v20 = vld [vmem:[#allocation3 + $0x158] sm:$0xff] }
 0x195   : > { %v1898_v33 = vpop.f32.mrf.mxu0  ;;  %v2783_v57 = vunpack.c.l.b16 %v2353_v40  ;;  %v2242_v45 = vshrl.u32 %v2186_v30, 16  ;;  %v1833_v1 = vadd.f32 %v1832_v37, %v1799_v14  ;;  %v6105_v48 = vrot.slane %v2234_v31, 4  ;;  %v5105_v43 = vld [vmem:[#allocation3 + $0x168] sm:$0xff]  ;;  %3602 = vmatpush.bf16.msrb.mxu2 %v5097_v7  ;;  %v5104_v37 = vld [vmem:[#allocation3 + $0x160] sm:$0xff] }
 0x196   : > { %v2128_v9 = vld [vmem:[#allocation2 + $0x28] sm:$0x1]  ;;  %v2090_v42 = vsel %vm5953_vm7, %v2001_v27, %v2089_v29  ;;  %v2093_v47 = vsel %vm5959_vm8, %v2002_v15, %v2092_v51  ;;  %v1944_v52 = vpack.c.bf16 %v1934_v60, %v1934_v60  ;;  %v1899_v50 = vadd.f32 %v1898_v33, %v1865_v26  ;;  %v6114_v3 = vld [vmem:[#allocation2 + $0x28] sm:$0xe]  ;;  %v5056_v16 = vld [vmem:[#allocation2 + $0x14] sm:$0xf0] }
 0x197   : > { %v2129_v22 = vsel %vm5959_vm8, 0, %v2128_v9  ;;  %2091 = vst [vmem:[#allocation2 + $0x30] sm:$0xf] %v2090_v42  ;;  %v2789_v58 = vpack.c.b16 %v2783_v57, %v2782_v2  ;;  %v6108_v35 = vrot.slane %v2237_v41, 5  ;;  %v2244_v25 = vrot.slane %v2242_v45, 4  ;;  %3631 = vmatpush.bf16.msrb.mxu3 %v5105_v43  ;;  %v5096_v51 = vld [vmem:[#allocation3 + $0x120] sm:$0xff] }
 0x198   : > { %2130 = vst [vmem:[#allocation2 + $0x28] sm:$0x1] %v2129_v22  ;;  %v2159_v17 = vld [vmem:[#allocation2 + $0x2c] sm:$0x1]  ;;  %v2004_v8 = vshrl.u32 %v1944_v52, 16  ;;  %v1913_v61 = vmul.f32 %v5927_v59, %v1899_v50  ;;  %v2245_v53 = vshll.u32 %v2186_v30, 16  ;;  %v1867_v4 = vadd.f32 %v1866_v36, %v1833_v1 }
 0x199   : > { %v2160_v54 = vsel %vm5984_vm9, 0, %v2159_v17  ;;  %2094 = vst [vmem:[#allocation2 + $0x34] sm:$0x1] %v2093_v47  ;;  %v2251_v10 = vshll.u32 %v6088_v34, 16  ;;  %v2007_v23 = vshll.u32 %v1944_v52, 16  ;;  %v2240_v6 = vsel %vm5525_vm2, %v6105_v48, %v6108_v35  ;;  %v5088_v15 = vld [vmem:[#allocation3 + $0xe0] sm:$0xff]  ;;  %3603 = vmatpush.bf16.msrb.mxu2 %v5096_v51 }
 0x19a   : > { %2161 = vst [vmem:[#allocation2 + $0x2c] sm:$0x1] %v2160_v54  ;;  %v2006_v63 = vrot.slane %v2004_v8, 7  ;;  %v1925_v55 = vadd.f32 %v5934_v62, %v1913_v61  ;;  %v2247_v0 = vrot.slane %v2245_v53, 5  ;;  %v4529_v38 = vrot.slane %v2315_v13, 9  ;;  %v5087_v41 = vld [vmem:[#allocation3 + $0xd8] sm:$0xff]  ;;  %3574 = vmatpush.bf16.msrb.mxu1 %v5088_v15 }
 0x19b   : > { %v2253_v19 = vrot.slane %v2251_v10, 5  ;;  %v6120_v24 = vld [vmem:[#allocation2 + $0x24] sm:$0x1]  ;;  %v4559_v29 = vld [vmem:[#allocation2 + $0x20] sm:$0xf]  ;;  %v4530_v31 = vrot.slane %v6114_v3, 9  ;;  %v4584_v47 = vor.u32 %v5056_v16, %v4583_v21  ;;  %3632 = vmatpush.bf16.msrb.mxu3 %v5104_v37 }
 0x19c   : > { %v2009_v34 = vor.u32 %v2007_v23, %v2006_v63  ;;  %v2010_v39 = vrot.slane %v2006_v63, 4  ;;  %v1935_v11 = vmax.f32 %v1925_v55, 0.0  ;;  %3555 = vmatmul.bf16.gmra.mxu3 %v2789_v58  ;;  %v2248_v14 = vor.u32 %v2247_v0, %v2244_v25  ;;  %v2187_v57 = vld [vmem:[#allocation2 + $0x20] sm:$0xf]  ;;  %v5095_v50 = vld [vmem:[#allocation3 + $0x118] sm:$0xff] }
 0x19d   : > { %v1900_v26 = vpop.f32.mrf.mxu0  ;;  %v2356_v30 = vrot.slane %v6120_v24, 5  ;;  %v2265_v27 = vshll.u32 %v6120_v24, 16  ;;  %v2101_v8 = vld [vmem:[#allocation2 + $0x40] sm:$0xf]  ;;  %v2766_v58 = vunpack.c.l.b16 %v2240_v6  ;;  %v2256_v54 = vshrl.u32 %v2187_v57, 16  ;;  %3604 = vmatpush.bf16.msrb.mxu2 %v5095_v50 }
 0x19e   : > { %v2131_v60 = vld [vmem:[#allocation2 + $0x30] sm:$0x1]  ;;  %v2096_v40 = vsel %vm5953_vm7, %v2009_v34, %v2095_v46  ;;  %v2099_v12 = vsel %vm5959_vm8, %v2010_v39, %v2098_v5  ;;  %v1945_v33 = vpack.c.bf16 %v1935_v11, %v1935_v11  ;;  %v1901_v2 = vadd.f32 %v1900_v26, %v1867_v4  ;;  %v2104_v10 = vld [vmem:[#allocation2 + $0x44] sm:$0x1]  ;;  %3575 = vmatpush.bf16.msrb.mxu1 %v5087_v41  ;;  %v6154_v15 = vld [vmem:[#allocation2 + $0x30] sm:$0xe] }
 0x19f   : > { %v2132_v45 = vsel %vm5959_vm8, 0, %v2131_v60  ;;  %2097 = vst [vmem:[#allocation2 + $0x38] sm:$0xf] %v2096_v40  ;;  %v2249_v9 = vrot.slane %v2248_v14, 4  ;;  %v5050_v42 = vld [vmem:[#allocation2 + $0x24] sm:$0xf0]  ;;  %v6133_v52 = vsel %vm6029_vm12, %v4529_v38, %v2356_v30  ;;  %3633 = vmatpush.bf16.msrb.mxu3 %v5103_v20 }
 0x1a0   : > { %2133 = vst [vmem:[#allocation2 + $0x30] sm:$0x1] %v2132_v45  ;;  %v2162_v1 = vld [vmem:[#allocation2 + $0x34] sm:$0x1]  ;;  %v2012_v22 = vshrl.u32 %v1945_v33, 16  ;;  %v2015_v48 = vshll.u32 %v1945_v33, 16  ;;  %v1914_v13 = vmul.f32 %v5927_v59, %v1901_v2  ;;  %v4560_v36 = vor.u32 %v5050_v42, %v4559_v29 }
 0x1a1   : > { %v2163_v17 = vsel %vm5984_vm9, 0, %v2162_v1  ;;  %2100 = vst [vmem:[#allocation2 + $0x3c] sm:$0x1] %v2099_v12  ;;  %v2254_v61 = vsel %vm5525_vm2, %v2249_v9, %v2253_v19  ;;  %v6140_v35 = vld [vmem:[#allocation2 + $0x2c] sm:$0x1]  ;;  %v2784_v63 = vunpack.c.l.b16 %v6133_v52  ;;  %v2258_v23 = vrot.slane %v2256_v54, 4 }
 0x1a2   : > { %2164 = vst [vmem:[#allocation2 + $0x34] sm:$0x1] %v2163_v17  ;;  %v2014_v46 = vrot.slane %v2012_v22, 7  ;;  %v1926_v5 = vadd.f32 %v5934_v62, %v1914_v13  ;;  %v2767_v59 = vunpack.c.l.b16 %v2254_v61  ;;  %3502 = vmatmul.bf16.vlgmr.msra.gmra.mxu1 %v4560_v36  ;;  %3666 = vmatmul.bf16.vlgmr.msra.gmra.mxu0 %v4584_v47  ;;  %v2360_v25 = vrot.slane %v6140_v35, 5  ;;  %v2188_v53 = vld [vmem:[#allocation2 + $0x28] sm:$0xf] }
 0x1a3   : > { %v2259_v55 = vshll.u32 %v2187_v57, 16  ;;  %v2270_v3 = vshrl.u32 %v2188_v53, 16  ;;  %v5086_v43 = vld [vmem:[#allocation3 + $0xd0] sm:$0xff]  ;;  %v2273_v34 = vshll.u32 %v2188_v53, 16  ;;  %v2279_v37 = vshll.u32 %v6140_v35, 16  ;;  %v5085_v60 = vld [vmem:[#allocation3 + $0xc8] sm:$0xff] }
 0x1a4   : > { %v2017_v4 = vor.u32 %v2015_v48, %v2014_v46  ;;  %v2018_v6 = vrot.slane %v2014_v46, 4  ;;  %v1936_v0 = vmax.f32 %v1926_v5, 0.0  ;;  %v2773_v7 = vpack.c.b16 %v2767_v59, %v2766_v58  ;;  %v5094_v39 = vld [vmem:[#allocation3 + $0x110] sm:$0xff]  ;;  %3576 = vmatpush.bf16.msrb.mxu1 %v5086_v43  ;;  %v2107_v41 = vld [vmem:[#allocation2 + $0x48] sm:$0xf]  ;;  %v5093_v47 = vld [vmem:[#allocation3 + $0x108] sm:$0xff] }
 0x1a5   : > { %v2361_v62 = vsel %vm6029_vm12, %v4530_v31, %v2360_v25  ;;  %v2261_v16 = vrot.slane %v2259_v55, 5  ;;  %v2272_v38 = vrot.slane %v2270_v3, 4  ;;  %v5102_v11 = vld [vmem:[#allocation3 + $0x150] sm:$0xff]  ;;  %v2275_v31 = vrot.slane %v2273_v34, 5  ;;  %v2110_v45 = vld [vmem:[#allocation2 + $0x4c] sm:$0x1]  ;;  %3605 = vmatpush.bf16.msrb.mxu2 %v5094_v39 }
 0x1a6   : > { %v2134_v19 = vld [vmem:[#allocation2 + $0x38] sm:$0x1]  ;;  %v2102_v21 = vsel %vm5953_vm7, %v2017_v4, %v2101_v8  ;;  %v2105_v26 = vsel %vm5959_vm8, %v2018_v6, %v2104_v10  ;;  %v1946_v14 = vpack.c.bf16 %v1936_v0, %v1936_v0  ;;  %3526 = vmatmul.bf16.gmra.mxu2 %v2773_v7  ;;  %v2785_v29 = vunpack.c.l.b16 %v2361_v62  ;;  %v6156_v2 = vld [vmem:[#allocation2 + $0x38] sm:$0xe]  ;;  %3634 = vmatpush.bf16.msrb.mxu3 %v5102_v11  ;;  %v5084_v22 = vld [vmem:[#allocation3 + $0xc0] sm:$0xff] }
 0x1a7   : > { %v2135_v51 = vsel %vm5959_vm8, 0, %v2134_v19  ;;  %2103 = vst [vmem:[#allocation2 + $0x40] sm:$0xf] %v2102_v21  ;;  %v2262_v30 = vor.u32 %v2261_v16, %v2258_v23  ;;  %v2276_v42 = vor.u32 %v2275_v31, %v2272_v38  ;;  %v5101_v52 = vld [vmem:[#allocation3 + $0x148] sm:$0xff]  ;;  %v2267_v1 = vrot.slane %v2265_v27, 5  ;;  %v5100_v25 = vld [vmem:[#allocation3 + $0x140] sm:$0xff] }
 0x1a8   : > { %2136 = vst [vmem:[#allocation2 + $0x38] sm:$0x1] %v2135_v51  ;;  %v2165_v40 = vld [vmem:[#allocation2 + $0x3c] sm:$0x1]  ;;  %v2020_v12 = vshrl.u32 %v1946_v14, 16  ;;  %v2790_v33 = vpack.c.b16 %v2785_v29, %v2784_v63  ;;  %v2023_v20 = vshll.u32 %v1946_v14, 16  ;;  %3577 = vmatpush.bf16.msrb.mxu1 %v5085_v60 }
 0x1a9   : > { %v2166_v57 = vsel %vm5984_vm9, 0, %v2165_v40  ;;  %2106 = vst [vmem:[#allocation2 + $0x44] sm:$0x1] %v2105_v26  ;;  %v2263_v9 = vrot.slane %v2262_v30, 4  ;;  %v2277_v48 = vrot.slane %v2276_v42, 4  ;;  %v2281_v13 = vrot.slane %v2279_v37, 5  ;;  %3606 = vmatpush.bf16.msrb.mxu2 %v5093_v47 }
 0x1aa   : > { %2167 = vst [vmem:[#allocation2 + $0x3c] sm:$0x1] %v2166_v57  ;;  %v2022_v50 = vrot.slane %v2020_v12, 7  ;;  %v6162_v36 = vld [vmem:[#allocation2 + $0x34] sm:$0x1]  ;;  %v4531_v54 = vrot.slane %v6154_v15, 9  ;;  %3635 = vmatpush.bf16.msrb.mxu3 %v5101_v52 }
 0x1ab   : > { %v2189_v17 = vld [vmem:[#allocation2 + $0x30] sm:$0xf]  ;;  %v2268_v58 = vsel %vm5525_vm2, %v2263_v9, %v2267_v1  ;;  %v5057_v35 = vld [vmem:[#allocation2 + $0x24] sm:$0xf0]  ;;  %v2282_v24 = vsel %vm5525_vm2, %v2277_v48, %v2281_v13  ;;  %v4587_v27 = vld [vmem:[#allocation2 + $0x20] sm:$0xf] }
 0x1ac   : > { %v2025_v8 = vor.u32 %v2023_v20, %v2022_v50  ;;  %v2026_v61 = vrot.slane %v2022_v50, 4  ;;  %3560 = vmatmul.bf16.gmra.mxu3 %v2790_v33  ;;  %v4532_v46 = vrot.slane %v6156_v2, 9  ;;  %v2284_v5 = vshrl.u32 %v2189_v17, 16  ;;  %v5092_v53 = vld [vmem:[#allocation3 + $0x100] sm:$0xff]  ;;  %3578 = vmatpush.bf16.msrb.mxu1 %v5084_v22  ;;  %v5131_v2 = vld [vmem:[#allocation3 + $0x238] sm:$0xff]  ;;  %v5143_v57 = vld [vmem:[%s6503_s4 + $0x38] sm:$0xff] }
 0x1ad   : > { %v2287_v59 = vshll.u32 %v2189_v17, 16  ;;  %v2769_v55 = vunpack.c.l.b16 %v2282_v24  ;;  %v4563_v3 = vld [vmem:[#allocation2 + $0x30] sm:$0xf]  ;;  %v2364_v4 = vrot.slane %v6162_v36, 5  ;;  %v2768_v62 = vunpack.c.l.b16 %v2268_v58  ;;  %3607 = vmatpush.bf16.msrb.mxu2 %v5092_v53  ;;  %v5123_v9 = vld [vmem:[#allocation3 + $0x1f8] sm:$0xff]  ;;  %v5130_v50 = vld [vmem:[#allocation3 + $0x230] sm:$0xff] }
 0x1ae   : > { %v2137_v10 = vld [vmem:[#allocation2 + $0x40] sm:$0x1]  ;;  %v2108_v63 = vsel %vm5953_vm7, %v2025_v8, %v2107_v41  ;;  %v2111_v23 = vsel %vm5959_vm8, %v2026_v61, %v2110_v45  ;;  %v2286_v7 = vrot.slane %v2284_v5, 4  ;;  %v4588_v28 = vor.u32 %v5057_v35, %v4587_v27  ;;  %3636 = vmatpush.bf16.msrb.mxu3 %v5100_v25  ;;  %v2371_v17 = vld [vmem:[#allocation2 + $0x8] sm:$0xf] }
 0x1af   : > { %v2138_v6 = vsel %vm5959_vm8, 0, %v2137_v10  ;;  %2109 = vst [vmem:[#allocation2 + $0x48] sm:$0xf] %v2108_v63  ;;  %v5051_v0 = vld [vmem:[#allocation2 + $0x34] sm:$0xf0]  ;;  %v2289_v11 = vrot.slane %v2287_v59, 5  ;;  %v2774_v19 = vpack.c.b16 %v2769_v55, %v2768_v62  ;;  %v2365_v29 = vsel %vm6029_vm12, %v4531_v54, %v2364_v4 }
 0x1b0   : > { %2139 = vst [vmem:[#allocation2 + $0x40] sm:$0x1] %v2138_v6  ;;  %v2168_v43 = vld [vmem:[#allocation2 + $0x44] sm:$0x1]  ;;  %v4564_v16 = vor.u32 %v5051_v0, %v4563_v3  ;;  %v2190_v38 = vld [vmem:[#allocation2 + $0x38] sm:$0xf]  ;;  %v2786_v12 = vunpack.c.l.b16 %v2365_v29  ;;  %3687 = vmatpush.bf16.msra.mxu1 %v5123_v9 }
 0x1b1   : > { %v2169_v34 = vsel %vm5984_vm9, 0, %v2168_v43  ;;  %2112 = vst [vmem:[#allocation2 + $0x4c] sm:$0x1] %v2111_v23  ;;  %v2198_v39 = vld [vmem:[#allocation2 + $0x3c] sm:$0x1]  ;;  %v2298_v26 = vshrl.u32 %v2190_v38, 16  ;;  %v2290_v15 = vor.u32 %v2289_v11, %v2286_v7  ;;  %3716 = vmatpush.bf16.msra.mxu2 %v5131_v2 }
 0x1b2   : > { %2170 = vst [vmem:[#allocation2 + $0x44] sm:$0x1] %v2169_v34  ;;  %3507 = vmatmul.bf16.gmra.mxu1 %v4564_v16  ;;  %3671 = vmatmul.bf16.gmra.mxu0 %v4588_v28  ;;  %v2368_v21 = vrot.slane %v2198_v39, 5  ;;  %v2301_v14 = vshll.u32 %v2190_v38, 16  ;;  %v2307_v60 = vshll.u32 %v2198_v39, 16  ;;  %v2293_v45 = vshll.u32 %v6162_v36, 16 }
 0x1b3   : > { %v2300_v30 = vrot.slane %v2298_v26, 4  ;;  %3862 = vmatpush.bf16.msra.mxu3 %v5143_v57  ;;  %v2291_v1 = vrot.slane %v2290_v15, 4  ;;  %v2380_v36 = vld [vmem:[#allocation2 + $0x14] sm:$0x1]  ;;  %v5122_v8 = vld [vmem:[#allocation3 + $0x1f0] sm:$0xff]  ;;  %v2402_v54 = vshrl.u32 %v2372_v49, 16 }
 0x1b4   : > { %v2369_v51 = vsel %vm6029_vm12, %v4532_v46, %v2368_v21  ;;  %v2303_v31 = vrot.slane %v2301_v14, 5  ;;  %v2309_v22 = vrot.slane %v2307_v60, 5  ;;  %v2295_v48 = vrot.slane %v2293_v45, 5  ;;  %v5052_v58 = vld [vmem:[#allocation2 + $0xc] sm:$0xf0]  ;;  %3688 = vmatpush.bf16.msra.mxu1 %v5122_v8  ;;  %v5141_v21 = vld [vmem:[%s6503_s4 + $0x28] sm:$0xff] }
 0x1b5   : > { %v2787_v37 = vunpack.c.l.b16 %v2369_v51  ;;  %3717 = vmatpush.bf16.msra.mxu2 %v5130_v50  ;;  %v5058_v35 = vld [vmem:[#allocation2 + $0x34] sm:$0xf0]  ;;  %v4567_v27 = vld [vmem:[#allocation2 + $0x8] sm:$0xf]  ;;  %v2379_v46 = vld [vmem:[#allocation2 + $0xc] sm:$0x1] }
 0x1b6   : > { %v2140_v40 = vld [vmem:[#allocation2 + $0x48] sm:$0x1]  ;;  %3531 = vmatmul.bf16.gmra.mxu2 %v2774_v19  ;;  %v2304_v33 = vor.u32 %v2303_v31, %v2300_v30  ;;  %v2296_v61 = vsel %vm5525_vm2, %v2291_v1, %v2295_v48  ;;  %v2500_v5 = vld [vmem:[#allocation2 + $0x10] sm:$0xe]  ;;  %v2529_v25 = vrot.slane %v2380_v36, 5  ;;  %v2388_v53 = vshrl.u32 %v2371_v17, 16 }
 0x1b7   : > { %v2141_v41 = vsel %vm5959_vm8, 0, %v2140_v40  ;;  %v2791_v47 = vpack.c.b16 %v2787_v37, %v2786_v12  ;;  %3863 = vmatpush.bf16.msra.mxu3 %v5142_v56  ;;  %v4591_v59 = vld [vmem:[#allocation2 + $0x30] sm:$0xf]  ;;  %v2391_v10 = vshll.u32 %v2371_v17, 16  ;;  %v2770_v63 = vunpack.c.l.b16 %v2296_v61  ;;  %v2499_v3 = vld [vmem:[#allocation2 + $0x8] sm:$0xe] }
 0x1b8   : > { %2142 = vst [vmem:[#allocation2 + $0x48] sm:$0x1] %v2141_v41  ;;  %v2171_v42 = vld [vmem:[#allocation2 + $0x4c] sm:$0x1]  ;;  %v2305_v52 = vrot.slane %v2304_v33, 4  ;;  %v4568_v23 = vor.u32 %v5052_v58, %v4567_v27  ;;  %v4592_v55 = vor.u32 %v5058_v35, %v4591_v59  ;;  %v2525_v4 = vrot.slane %v2379_v46, 5 }
 0x1b9   : > { %v2172_v20 = vsel %vm5984_vm9, 0, %v2171_v42  ;;  %2181 = vst [vmem:[#allocation2 + $0x48] sm:$0xf] %v5348_v32  ;;  %v4534_v6 = vrot.slane %v2500_v5, 9  ;;  %v2404_v0 = vrot.slane %v2402_v54, 4  ;;  %v4533_v62 = vrot.slane %v2499_v3, 9 }
 0x1ba   : > { %2173 = vst [vmem:[#allocation2 + $0x4c] sm:$0x1] %v2172_v20  ;;  %v2310_v13 = vsel %vm5525_vm2, %v2305_v52, %v2309_v22  ;;  %v2390_v28 = vrot.slane %v2388_v53, 4  ;;  %v2393_v38 = vrot.slane %v2391_v10, 5  ;;  %v5129_v19 = vld [vmem:[#allocation3 + $0x228] sm:$0xff]  ;;  %v2411_v29 = vshll.u32 %v2380_v36, 16 }
 0x1bb   : > { %2182 = vst [vmem:[#allocation2 + $0x4c] sm:$0x1] %v5348_v32  ;;  %v2405_v32 = vshll.u32 %v2372_v49, 16  ;;  %v2771_v24 = vunpack.c.l.b16 %v2310_v13  ;;  %v2530_v16 = vsel %vm6029_vm12, %v4534_v6, %v2529_v25  ;;  %v2526_v34 = vsel %vm6029_vm12, %v4533_v62, %v2525_v4  ;;  %v5121_v26 = vld [vmem:[#allocation3 + $0x1e8] sm:$0xff]  ;;  %3718 = vmatpush.bf16.msra.mxu2 %v5129_v19  ;;  %3864 = vmatpush.bf16.msra.mxu3 %v5141_v21  ;;  %v5128_v30 = vld [vmem:[#allocation3 + $0x220] sm:$0xff]  ;;  %v5140_v41 = vld [vmem:[%s6503_s4 + $0x20] sm:$0xff] }
 0x1bc   : > { %3565 = vmatmul.bf16.gmra.mxu3 %v2791_v47  ;;  %v2837_v11 = vunpack.c.l.b16 %v2530_v16  ;;  %v2394_v14 = vor.u32 %v2393_v38, %v2390_v28  ;;  %v2836_v51 = vunpack.c.l.b16 %v2526_v34  ;;  %v2397_v31 = vshll.u32 %v2379_v46, 16  ;;  %3689 = vmatpush.bf16.msra.mxu1 %v5121_v26  ;;  %v2374_v60 = vld [vmem:[#allocation2 + $0x20] sm:$0xf]  ;;  %v2382_v2 = vld [vmem:[#allocation2 + $0x24] sm:$0x1]  ;;  %v5120_v45 = vld [vmem:[#allocation3 + $0x1e0] sm:$0xff] }
 0x1bd   : > { %v2407_v7 = vrot.slane %v2405_v32, 5  ;;  %v2775_v43 = vpack.c.b16 %v2771_v24, %v2770_v63  ;;  %v2413_v12 = vrot.slane %v2411_v29, 5  ;;  %v5053_v33 = vld [vmem:[#allocation2 + $0x1c] sm:$0xf0]  ;;  %v2373_v57 = vld [vmem:[#allocation2 + $0x18] sm:$0xf] }
 0x1be   : > { %v2844_v15 = vpack.c.b16 %v2837_v11, %v2836_v51  ;;  %v2395_v40 = vrot.slane %v2394_v14, 4  ;;  %v2399_v9 = vrot.slane %v2397_v31, 5  ;;  %v2430_v52 = vshrl.u32 %v2374_v60, 16  ;;  %v4571_v20 = vld [vmem:[#allocation2 + $0x18] sm:$0xf]  ;;  %v5119_v4 = vld [vmem:[#allocation3 + $0x1d8] sm:$0xff] }
 0x1bf   : > { %v2408_v39 = vor.u32 %v2407_v7, %v2404_v0  ;;  %3719 = vmatpush.bf16.msra.mxu2 %v5128_v30  ;;  %v2433_v50 = vshll.u32 %v2374_v60, 16  ;;  %v2381_v1 = vld [vmem:[#allocation2 + $0x1c] sm:$0x1]  ;;  %v2502_v22 = vld [vmem:[#allocation2 + $0x20] sm:$0xe]  ;;  %3865 = vmatpush.bf16.msra.mxu3 %v5140_v41  ;;  %v2537_v13 = vrot.slane %v2382_v2, 5  ;;  %v4572_v8 = vor.u32 %v5053_v33, %v4571_v20 }
 0x1c0   : > { %v5059_v47 = vld [vmem:[#allocation2 + $0x44] sm:$0xf0]  ;;  %3690 = vmatpush.bf16.msra.mxu1 %v5120_v45  ;;  %v2400_v49 = vsel %vm5525_vm2, %v2395_v40, %v2399_v9  ;;  %v4595_v48 = vld [vmem:[#allocation2 + $0x40] sm:$0xf]  ;;  %v2416_v36 = vshrl.u32 %v2373_v57, 16  ;;  %v2419_v17 = vshll.u32 %v2373_v57, 16 }
 0x1c1   : > { %v2409_v37 = vrot.slane %v2408_v39, 4  ;;  %v4596_v61 = vor.u32 %v5059_v47, %v4595_v48  ;;  %v2501_v58 = vld [vmem:[#allocation2 + $0x18] sm:$0xe]  ;;  %v2533_v35 = vrot.slane %v2381_v1, 5  ;;  %v4536_v54 = vrot.slane %v2502_v22, 9  ;;  %v5118_v14 = vld [vmem:[#allocation3 + $0x1d0] sm:$0xff] }
 0x1c2   : > { %3579 = vmatmul.bf16.vlgmr.msrb.gmra.mxu1 %v4568_v23  ;;  %3676 = vmatmul.bf16.gmra.mxu0 %v4592_v55  ;;  %v2432_v32 = vrot.slane %v2430_v52, 4  ;;  %v2435_v24 = vrot.slane %v2433_v50, 5  ;;  %v2820_v27 = vunpack.c.l.b16 %v2400_v49  ;;  %v4535_v46 = vrot.slane %v2501_v58, 9  ;;  %v5127_v55 = vld [vmem:[#allocation3 + $0x218] sm:$0xff]  ;;  %v5139_v3 = vld [vmem:[%s6503_s4 + $0x18] sm:$0xff]  ;;  %v5138_v29 = vld [vmem:[%s6503_s4 + $0x10] sm:$0xff] }
 0x1c3   : > { %v2414_v42 = vsel %vm5525_vm2, %v2409_v37, %v2413_v12  ;;  %v2538_v5 = vsel %vm6029_vm12, %v4536_v54, %v2537_v13  ;;  %v2418_v59 = vrot.slane %v2416_v36, 4  ;;  %v2421_v25 = vrot.slane %v2419_v17, 5  ;;  %3720 = vmatpush.bf16.msra.mxu2 %v5127_v55  ;;  %3866 = vmatpush.bf16.msra.mxu3 %v5139_v3  ;;  %v2376_v28 = vld [vmem:[#allocation2 + $0x30] sm:$0xf]  ;;  %v2375_v11 = vld [vmem:[#allocation2 + $0x28] sm:$0xf] }
 0x1c4   : > { %v2821_v56 = vunpack.c.l.b16 %v2414_v42  ;;  %v2534_v10 = vsel %vm6029_vm12, %v4535_v46, %v2533_v35  ;;  %v2436_v63 = vor.u32 %v2435_v24, %v2432_v32  ;;  %v2839_v23 = vunpack.c.l.b16 %v2538_v5  ;;  %3691 = vmatpush.bf16.msra.mxu1 %v5119_v4  ;;  %v2384_v19 = vld [vmem:[#allocation2 + $0x34] sm:$0x1]  ;;  %v5054_v31 = vld [vmem:[#allocation2 + $0x2c] sm:$0xf0]  ;;  %v2383_v37 = vld [vmem:[#allocation2 + $0x2c] sm:$0x1] }
 0x1c5   : > { %v2422_v6 = vor.u32 %v2421_v25, %v2418_v59  ;;  %v2439_v0 = vshll.u32 %v2382_v2, 16  ;;  %v2838_v7 = vunpack.c.l.b16 %v2534_v10  ;;  %v2425_v62 = vshll.u32 %v2381_v1, 16  ;;  %v4575_v40 = vld [vmem:[#allocation2 + $0x28] sm:$0xf]  ;;  %v5117_v57 = vld [vmem:[#allocation3 + $0x1c8] sm:$0xff]  ;;  %v5116_v35 = vld [vmem:[#allocation3 + $0x1c0] sm:$0xff] }
 0x1c6   : > { %3536 = vmatmul.bf16.gmra.mxu2 %v2775_v43  ;;  %v2828_v53 = vpack.c.b16 %v2821_v56, %v2820_v27  ;;  %v5126_v43 = vld [vmem:[#allocation3 + $0x210] sm:$0xff]  ;;  %v2437_v16 = vrot.slane %v2436_v63, 4  ;;  %v2458_v21 = vshrl.u32 %v2376_v28, 16  ;;  %v2461_v26 = vshll.u32 %v2376_v28, 16  ;;  %v2503_v9 = vld [vmem:[#allocation2 + $0x28] sm:$0xe] }
 0x1c7   : > { %v2845_v38 = vpack.c.b16 %v2839_v23, %v2838_v7  ;;  %v2423_v34 = vrot.slane %v2422_v6, 4  ;;  %v2441_v39 = vrot.slane %v2439_v0, 5  ;;  %3721 = vmatpush.bf16.msra.mxu2 %v5126_v43  ;;  %v2427_v51 = vrot.slane %v2425_v62, 5  ;;  %3867 = vmatpush.bf16.msra.mxu3 %v5138_v29  ;;  %v2557_v56 = vld [vmem:[#allocation2 + $0x18] sm:$0xf]  ;;  %v5137_v54 = vld [vmem:[%s6503_s4 + $0x8] sm:$0xff] }
 0x1c8   : > { %3692 = vmatpush.bf16.msra.mxu1 %v5118_v14  ;;  %v2545_v12 = vrot.slane %v2384_v19, 5  ;;  %v2444_v33 = vshrl.u32 %v2375_v11, 16  ;;  %v2447_v2 = vshll.u32 %v2375_v11, 16  ;;  %v4576_v45 = vor.u32 %v5054_v31, %v4575_v40  ;;  %v5125_v58 = vld [vmem:[#allocation3 + $0x208] sm:$0xff]  ;;  %v2556_v5 = vld [vmem:[#allocation2 + $0x10] sm:$0xf] }
 0x1c9   : > { %v2442_v30 = vsel %vm5525_vm2, %v2437_v16, %v2441_v39  ;;  %v2428_v60 = vsel %vm5525_vm2, %v2423_v34, %v2427_v51  ;;  %v2460_v42 = vrot.slane %v2458_v21, 4  ;;  %v2463_v47 = vrot.slane %v2461_v26, 5  ;;  %v5124_v59 = vld [vmem:[#allocation3 + $0x200] sm:$0xff]  ;;  %v5136_v10 = vld [vmem:[%s6503_s4] sm:$0xff]  ;;  %v2377_v4 = vld [vmem:[#allocation2 + $0x38] sm:$0xf] }
 0x1ca   : > { %v2823_v41 = vunpack.c.l.b16 %v2442_v30  ;;  %v2541_v52 = vrot.slane %v2383_v37, 5  ;;  %v2822_v20 = vunpack.c.l.b16 %v2428_v60  ;;  %v4537_v1 = vrot.slane %v2503_v9, 9  ;;  %v2378_v55 = vld [vmem:[#allocation2 + $0x40] sm:$0xf]  ;;  %v6240_v62 = vld [vmem:[#allocation2 + $0x3c] sm:$0x1] }
 0x1cb   : > { %v2446_v49 = vrot.slane %v2444_v33, 4  ;;  %v2449_v48 = vrot.slane %v2447_v2, 5  ;;  %v2464_v36 = vor.u32 %v2463_v47, %v2460_v42  ;;  %v2453_v27 = vshll.u32 %v2383_v37, 16  ;;  %3722 = vmatpush.bf16.msra.mxu2 %v5125_v58  ;;  %3868 = vmatpush.bf16.msra.mxu3 %v5137_v54  ;;  %v2386_v16 = vld [vmem:[#allocation2 + $0x44] sm:$0x1] }
 0x1cc   : > { %3637 = vmatmul.bf16.vlgmr.msrb.gmra.mxu3 %v2844_v15  ;;  %v2504_v15 = vld [vmem:[#allocation2 + $0x30] sm:$0xe]  ;;  %3693 = vmatpush.bf16.msra.mxu1 %v5117_v57  ;;  %v2829_v13 = vpack.c.b16 %v2823_v41, %v2822_v20  ;;  %v2542_v17 = vsel %vm6029_vm12, %v4537_v1, %v2541_v52  ;;  %v2587_v25 = vshrl.u32 %v2557_v56, 16  ;;  %v2573_v6 = vshrl.u32 %v2556_v5, 16  ;;  %v5055_v28 = vld [vmem:[#allocation2 + $0x3c] sm:$0xf0] }
 0x1cd   : > { %v4538_v50 = vrot.slane %v2504_v15, 9  ;;  %v2450_v32 = vor.u32 %v2449_v48, %v2446_v49  ;;  %v2840_v24 = vunpack.c.l.b16 %v2542_v17  ;;  %v2465_v46 = vrot.slane %v2464_v36, 4  ;;  %v4579_v29 = vld [vmem:[#allocation2 + $0x38] sm:$0xf]  ;;  %v6247_v41 = vld [vmem:[#allocation2 + $0x14] sm:$0x1] }
 0x1ce   : > { %v2576_v0 = vshll.u32 %v2556_v5, 16  ;;  %v2455_v7 = vrot.slane %v2453_v27, 5  ;;  %v2489_v34 = vshll.u32 %v2378_v55, 16  ;;  %v2589_v39 = vrot.slane %v2587_v25, 4  ;;  %v2505_v60 = vld [vmem:[#allocation2 + $0x38] sm:$0xe] }
 0x1cf   : > { %v2546_v22 = vsel %vm6029_vm12, %v4538_v50, %v2545_v12  ;;  %v2451_v3 = vrot.slane %v2450_v32, 4  ;;  %3723 = vmatpush.bf16.msra.mxu2 %v5124_v59  ;;  %3869 = vmatpush.bf16.msra.mxu3 %v5136_v10  ;;  %v2472_v21 = vshrl.u32 %v2377_v4, 16  ;;  %v2475_v26 = vshll.u32 %v2377_v4, 16  ;;  %v6245_v12 = vld [vmem:[#allocation2 + $0x1c] sm:$0x1] }
 0x1d0   : > { %3694 = vmatpush.bf16.msra.mxu1 %v5116_v35  ;;  %v2553_v51 = vrot.slane %v2386_v16, 5  ;;  %v2575_v30 = vrot.slane %v2573_v6, 4  ;;  %v2578_v31 = vrot.slane %v2576_v0, 5  ;;  %v4580_v15 = vor.u32 %v5055_v28, %v4579_v29  ;;  %v2558_v27 = vld [vmem:[#allocation2 + $0x20] sm:$0xf] }
 0x1d1   : > { %v2456_v14 = vsel %vm5525_vm2, %v2451_v3, %v2455_v7  ;;  %v2549_v40 = vrot.slane %v6240_v62, 5  ;;  %v2491_v57 = vrot.slane %v2489_v34, 5  ;;  %v2474_v42 = vrot.slane %v2472_v21, 4 }
 0x1d2   : > { %3584 = vmatmul.bf16.gmra.mxu1 %v4572_v8  ;;  %3681 = vmatmul.bf16.gmra.mxu0 %v4596_v61  ;;  %v2841_v8 = vunpack.c.l.b16 %v2546_v22  ;;  %v2467_v61 = vshll.u32 %v2384_v19, 16  ;;  %v2506_v19 = vld [vmem:[#allocation2 + $0x40] sm:$0xe]  ;;  %v2824_v9 = vunpack.c.l.b16 %v2456_v14  ;;  %v2477_v47 = vrot.slane %v2475_v26, 5  ;;  %v6266_v26 = vld [vmem:[#allocation2 + $0x24] sm:$0x1] }
 0x1d3   : > { %v4540_v33 = vrot.slane %v2506_v19, 9  ;;  %v4539_v52 = vrot.slane %v2505_v60, 9  ;;  %v2579_v20 = vor.u32 %v2578_v31, %v2575_v30  ;;  %v2596_v1 = vshll.u32 %v6245_v12, 16  ;;  %v4895_v30 = vld [vmem:[%s5480_s12 + $0x110] sm:$0xf] }
 0x1d4   : > { %v2846_v63 = vpack.c.b16 %v2841_v8, %v2840_v24  ;;  %v2469_v23 = vrot.slane %v2467_v61, 5  ;;  %v2582_v49 = vshll.u32 %v6247_v41, 16  ;;  %v2559_v8 = vld [vmem:[#allocation2 + $0x28] sm:$0xf]  ;;  %v2495_v61 = vshll.u32 %v2386_v16, 16 }
 0x1d5   : > { %v2554_v50 = vsel %vm6029_vm12, %v4540_v33, %v2553_v51  ;;  %v2550_v48 = vsel %vm6029_vm12, %v4539_v52, %v2549_v40  ;;  %v2580_v58 = vrot.slane %v2579_v20, 4  ;;  %v2598_v35 = vrot.slane %v2596_v1, 5  ;;  %v5132_v31 = vld [vmem:[%s5480_s12 + $0x114] sm:$0xf0]  ;;  %v2684_v20 = vld [vmem:[#allocation2 + $0x10] sm:$0xe] }
 0x1d6   : > { %3608 = vmatmul.bf16.vlgmr.msrb.gmra.mxu2 %v2828_v53  ;;  %v2590_v53 = vshll.u32 %v2557_v56, 16  ;;  %v2470_v43 = vsel %vm5525_vm2, %v2465_v46, %v2469_v23  ;;  %v2843_v17 = vunpack.c.l.b16 %v2554_v50  ;;  %v2478_v56 = vor.u32 %v2477_v47, %v2474_v42  ;;  %v2561_v60 = vld [vmem:[#allocation2 + $0x38] sm:$0xf] }
 0x1d7   : > { %v2825_v37 = vunpack.c.l.b16 %v2470_v43  ;;  %v2842_v54 = vunpack.c.l.b16 %v2550_v48  ;;  %v2481_v32 = vshll.u32 %v6240_v62, 16  ;;  %v2584_v24 = vrot.slane %v2582_v49, 5 }
 0x1d8   : > { %v2592_v11 = vrot.slane %v2590_v53, 5  ;;  %v2615_v59 = vshrl.u32 %v2559_v8, 16  ;;  %v2618_v25 = vshll.u32 %v2559_v8, 16  ;;  %v2479_v10 = vrot.slane %v2478_v56, 4 }
 0x1d9   : > { %v2830_v22 = vpack.c.b16 %v2825_v37, %v2824_v9  ;;  %v2847_v53 = vpack.c.b16 %v2843_v17, %v2842_v54  ;;  %v2585_v23 = vsel %vm5525_vm2, %v2580_v58, %v2584_v24  ;;  %v2604_v3 = vshll.u32 %v2558_v27, 16  ;;  %v2560_v9 = vld [vmem:[#allocation2 + $0x30] sm:$0xf] }
 0x1da   : > { %v2483_v6 = vrot.slane %v2481_v32, 5  ;;  %v2617_v7 = vrot.slane %v2615_v59, 4  ;;  %v2620_v43 = vrot.slane %v2618_v25, 5  ;;  %v2876_v62 = vunpack.c.l.b16 %v2585_v23  ;;  %v6286_v59 = vld [vmem:[#allocation2 + $0x34] sm:$0x1] }
 0x1db   : > { %v2610_v37 = vshll.u32 %v6266_v26, 16  ;;  %v2643_v52 = vshrl.u32 %v2561_v60, 16  ;;  %v2646_v50 = vshll.u32 %v2561_v60, 16  ;;  %v2710_v1 = vrot.slane %v6247_v41, 5  ;;  %v5133_v23 = vld [vmem:[%s5480_s12 + $0x124] sm:$0xf0] }
 0x1dc   : > { %3642 = vmatmul.bf16.gmra.mxu3 %v2845_v38  ;;  %v2486_v38 = vshrl.u32 %v2378_v55, 16  ;;  %v2601_v55 = vshrl.u32 %v2558_v27, 16  ;;  %v2484_v16 = vsel %vm5525_vm2, %v2479_v10, %v2483_v6  ;;  %v2621_v19 = vor.u32 %v2620_v43, %v2617_v7  ;;  %v6284_v27 = vld [vmem:[#allocation2 + $0x3c] sm:$0x1]  ;;  %v2563_v6 = vld [vmem:[#allocation2 + $0x48] sm:$0xf] }
 0x1dd   : > { %v2826_v21 = vunpack.c.l.b16 %v2484_v16  ;;  %v2612_v42 = vrot.slane %v2610_v37, 5  ;;  %v2629_v48 = vshrl.u32 %v2560_v9, 16  ;;  %v4541_v17 = vrot.slane %v2684_v20, 9 }
 0x1de   : > { %v2488_v2 = vrot.slane %v2486_v38, 4  ;;  %v2603_v28 = vrot.slane %v2601_v55, 4  ;;  %v2606_v38 = vrot.slane %v2604_v3, 5  ;;  %v2645_v56 = vrot.slane %v2643_v52, 4 }
 0x1df   : > { %v2648_v8 = vrot.slane %v2646_v50, 5  ;;  %v2711_v41 = vsel %vm6029_vm12, %v4541_v17, %v2710_v1  ;;  %v2638_v55 = vshll.u32 %v6286_v59, 16  ;;  %v6304_v1 = vld [vmem:[#allocation2 + $0x4c] sm:$0x1] }
 0x1e0   : > { %v2607_v14 = vor.u32 %v2606_v38, %v2603_v28  ;;  %v2687_v28 = vld [vmem:[#allocation2 + $0x28] sm:$0xe] }
 0x1e2   : > { %3589 = vmatmul.bf16.gmra.mxu1 %v4576_v45  ;;  %v2593_v45 = vor.u32 %v2592_v11, %v2589_v39  ;;  %v6264_v11 = vld [vmem:[#allocation2 + $0x2c] sm:$0x1]  ;;  %v2608_v40 = vrot.slane %v2607_v14, 4  ;;  %v2674_v14 = vshll.u32 %v2563_v6, 16 }
 0x1e3   : > { %v2624_v29 = vshll.u32 %v6264_v11, 16  ;;  %v2722_v38 = vrot.slane %v6264_v11, 5 }
 0x1e4   : > { %v2594_v36 = vrot.slane %v2593_v45, 4  ;;  %v2714_v45 = vrot.slane %v6245_v12, 5  ;;  %v2613_v49 = vsel %vm5525_vm2, %v2608_v40, %v2612_v42 }
 0x1e5   : > { %v2626_v33 = vrot.slane %v2624_v29, 5  ;;  %v2686_v29 = vld [vmem:[#allocation2 + $0x20] sm:$0xe] }
 0x1e6   : > { %3613 = vmatmul.bf16.gmra.mxu2 %v2829_v13  ;;  %v2492_v13 = vor.u32 %v2491_v57, %v2488_v2  ;;  %v2599_v5 = vsel %vm5525_vm2, %v2594_v36, %v2598_v35  ;;  %v4896_v2 = vor.u32 %v5132_v31, %v4895_v30  ;;  %v2685_v57 = vld [vmem:[#allocation2 + $0x18] sm:$0xe]  ;;  %v2631_v35 = vrot.slane %v2629_v48, 4 }
 0x1e7   : > { %v2877_v4 = vunpack.c.l.b16 %v2599_v5  ;;  %v2892_v5 = vunpack.c.l.b16 %v2711_v41  ;;  %v4544_v30 = vrot.slane %v2687_v28, 9  ;;  %v4543_v40 = vrot.slane %v2686_v29, 9  ;;  %v5134_v41 = vld [vmem:[%s5480_s12 + $0x134] sm:$0xf0] }
 0x1e8   : > { %v2493_v46 = vrot.slane %v2492_v13, 4  ;;  %v2632_v13 = vshll.u32 %v2560_v9, 16  ;;  %v2680_v48 = vshll.u32 %v6304_v1, 16 }
 0x1e9   : > { %v2884_v39 = vpack.c.b16 %v2877_v4, %v2876_v62  ;;  %v2723_v11 = vsel %vm6029_vm12, %v4544_v30, %v2722_v38  ;;  %v4907_v30 = vld [vmem:[%s5480_s12 + $0x140] sm:$0xf] }
 0x1ea   : > { %v2634_v54 = vrot.slane %v2632_v13, 5  ;;  %v2895_v50 = vunpack.c.l.b16 %v2723_v11 }
 0x1ec   : > { %3647 = vmatmul.bf16.gmra.mxu3 %v2846_v63  ;;  %v2497_v63 = vrot.slane %v2495_v61, 5  ;;  %v2878_v61 = vunpack.c.l.b16 %v2613_v49  ;;  %v2635_v25 = vor.u32 %v2634_v54, %v2631_v35  ;;  %v2682_v54 = vrot.slane %v2680_v48, 5 }
 0x1ee   : > { %v2498_v0 = vsel %vm5525_vm2, %v2493_v46, %v2497_v63  ;;  %v2649_v46 = vor.u32 %v2648_v8, %v2645_v56  ;;  %v4899_v63 = vld [vmem:[%s5480_s12 + $0x120] sm:$0xf]  ;;  %v2636_v7 = vrot.slane %v2635_v25, 4 }
 0x1ef   : > { %v2827_v34 = vunpack.c.l.b16 %v2498_v0  ;;  %v4900_v16 = vor.u32 %v5133_v23, %v4899_v63  ;;  %v2730_v23 = vrot.slane %v6284_v27, 5 }
 0x1f0   : > { %v2650_v3 = vrot.slane %v2649_v46, 4 }
 0x1f1   : > { %v2831_v51 = vpack.c.b16 %v2827_v34, %v2826_v21  ;;  %v2562_v34 = vld [vmem:[#allocation2 + $0x40] sm:$0xf]  ;;  %v2671_v21 = vshrl.u32 %v2563_v6, 16 }
 0x1f2   : > { %3594 = vmatmul.bf16.gmra.mxu1 %v4580_v15  ;;  %v2622_v15 = vrot.slane %v2621_v19, 4  ;;  %v2657_v37 = vshrl.u32 %v2562_v34, 16 }
 0x1f4   : > { %v2627_v47 = vsel %vm5525_vm2, %v2622_v15, %v2626_v33  ;;  %v2660_v15 = vshll.u32 %v2562_v34, 16  ;;  %v2673_v33 = vrot.slane %v2671_v21, 4 }
 0x1f5   : > { %v2879_v36 = vunpack.c.l.b16 %v2627_v47  ;;  %v2659_v47 = vrot.slane %v2657_v37, 4 }
 0x1f6   : > { %3618 = vmatmul.bf16.gmra.mxu2 %v2830_v22  ;;  %v4542_v22 = vrot.slane %v2685_v57, 9  ;;  %v2662_v52 = vrot.slane %v2660_v15, 5  ;;  %v2691_v15 = vld [vmem:[#allocation2 + $0x48] sm:$0xe] }
 0x1f7   : > { %v2885_v24 = vpack.c.b16 %v2879_v36, %v2878_v61  ;;  %v4903_v61 = vld [vmem:[%s5480_s12 + $0x130] sm:$0xf] }
 0x1f8   : > { %v2715_v12 = vsel %vm6029_vm12, %v4542_v22, %v2714_v45  ;;  %v6306_v22 = vld [vmem:[#allocation2 + $0x44] sm:$0x1] }
 0x1f9   : > { %v2893_v32 = vunpack.c.l.b16 %v2715_v12  ;;  %v2663_v12 = vor.u32 %v2662_v52, %v2659_v47  ;;  %v2666_v8 = vshll.u32 %v6306_v22, 16  ;;  %v2690_v47 = vld [vmem:[#allocation2 + $0x40] sm:$0xe] }
 0x1fb   : > { %v2900_v10 = vpack.c.b16 %v2893_v32, %v2892_v5  ;;  %v2664_v25 = vrot.slane %v2663_v12, 4 }
 0x1fc   : > { %3652 = vmatmul.bf16.gmra.mxu3 %v2847_v53  ;;  %v2652_v53 = vshll.u32 %v6284_v27, 16 }
 0x1fe   : > { %v2654_v43 = vrot.slane %v2652_v53, 5  ;;  %v4904_v53 = vor.u32 %v5134_v41, %v4903_v61 }
 0x1ff   : > { %v3493_v62 = vpop.f32.mrf.mxu0 }
 0x200   : > { %v2655_v19 = vsel %vm5525_vm2, %v2650_v3, %v2654_v43 }
 0x201   : > { %v2881_v60 = vunpack.c.l.b16 %v2655_v19 }
 0x202   : > { %3695 = vmatmul.bf16.vlgmr.msra.gmra.mxu1 %v2884_v39  ;;  %v2640_v39 = vrot.slane %v2638_v55, 5  ;;  %v2668_v55 = vrot.slane %v2666_v8, 5 }
 0x204   : > { %v2641_v31 = vsel %vm5525_vm2, %v2636_v7, %v2640_v39  ;;  %v2726_v7 = vrot.slane %v6286_v59, 5 }
 0x205   : > { %v2880_v45 = vunpack.c.l.b16 %v2641_v31  ;;  %v5135_v31 = vld [vmem:[%s5480_s12 + $0x144] sm:$0xf0]  ;;  %s3950_s12 = sshll.u32 %s6406_s8, 4  ;;  %s3951_s12 = int_to_ptr.vmem [resolvable:$true] %s3950_s12 }
 0x206   : > { %3623 = vmatmul.bf16.gmra.mxu2 %v2831_v51  ;;  %v2718_v51 = vrot.slane %v6266_v26, 5 }
 0x207   : > { %v2886_v20 = vpack.c.b16 %v2881_v60, %v2880_v45  ;;  %v3495_v13 = vpop.f32.mrf.mxu0  ;;  %v2738_v45 = vrot.slane %v6304_v1, 5 }
 0x208   : > { %v2719_v26 = vsel %vm6029_vm12, %v4543_v40, %v2718_v51 }
 0x209   : > { %v2894_v17 = vunpack.c.l.b16 %v2719_v26 }
 0x20b   : > { %v2901_v56 = vpack.c.b16 %v2895_v50, %v2894_v17  ;;  %v4547_v50 = vrot.slane %v2690_v47, 9 }
 0x20c   : > { %3870 = vmatmul.bf16.vlgmr.msra.gmra.mxu3 %v4896_v2  ;;  %v2676_v2 = vrot.slane %v2674_v14, 5 }
 0x20e   : > { %v2677_v49 = vor.u32 %v2676_v2, %v2673_v33  ;;  %v4908_v33 = vor.u32 %v5135_v31, %v4907_v30 }
 0x20f   : > { %v6280_v58 = vpop.f32.mrf.mxu3 }
 0x210   : > { %v2678_v35 = vrot.slane %v2677_v49, 4 }
 0x212   : > { %3700 = vmatmul.bf16.gmra.mxu1 %v2885_v24  ;;  %v2683_v3 = vsel %vm5525_vm2, %v2678_v35, %v2682_v54 }
 0x214   : > { %v3522_v4 = vpop.f32.mrf.mxu2 }
 0x215   : > { %v3523_v36 = vadd.f32 %v3522_v4, %v3493_v62  ;;  %v2688_v4 = vld [vmem:[#allocation2 + $0x30] sm:$0xe]  ;;  %v3498_v62 = vpop.f32.mrf.mxu0 }
 0x216   : > { %3724 = vmatmul.bf16.vlgmr.msra.gmra.mxu2 %v2900_v10  ;;  %v2689_v10 = vld [vmem:[#allocation2 + $0x38] sm:$0xe]  ;;  %v4545_v28 = vrot.slane %v2688_v4, 9 }
 0x217   : > { %v3553_v0 = vpop.f32.mrf.mxu3  ;;  %v6313_v24 = vadd.f32 %v6280_v58, %v3523_v36  ;;  %v4546_v43 = vrot.slane %v2689_v10, 9  ;;  %v2669_v58 = vsel %vm5525_vm2, %v2664_v25, %v2668_v55 }
 0x218   : > { %v2882_v34 = vunpack.c.l.b16 %v2669_v58 }
 0x219   : > { %v2731_v27 = vsel %vm6029_vm12, %v4546_v43, %v2730_v23 }
 0x21a   : > { %v2897_v19 = vunpack.c.l.b16 %v2731_v27 }
 0x21c   : > { %3875 = vmatmul.bf16.gmra.mxu3 %v4900_v16  ;;  %v3524_v57 = vpop.f32.mrf.mxu2  ;;  %v2883_v16 = vunpack.c.l.b16 %v2683_v3 }
 0x21d   : > { %v3525_v32 = vadd.f32 %v3524_v57, %v3495_v13  ;;  %v3500_v37 = vpop.f32.mrf.mxu0  ;;  %v4548_v57 = vrot.slane %v2691_v15, 9 }
 0x21e   : > { %v2887_v21 = vpack.c.b16 %v2883_v16, %v2882_v34 }
 0x21f   : > { %v3556_v9 = vpop.f32.mrf.mxu3  ;;  %v6302_v42 = vpop.f32.mrf.mxu1  ;;  %v6318_v6 = vadd.f32 %v3553_v0, %v3525_v32  ;;  %v2727_v0 = vsel %vm6029_vm12, %v4545_v28, %v2726_v7 }
 0x220   : > { %v2896_v14 = vunpack.c.l.b16 %v2727_v0 }
 0x222   : > { %3705 = vmatmul.bf16.gmra.mxu1 %v2886_v20  ;;  %v2902_v51 = vpack.c.b16 %v2897_v19, %v2896_v14  ;;  %v2739_v20 = vsel %vm6029_vm12, %v4548_v57, %v2738_v45  ;;  %v6385_v45 = vld [vmem:[%s6502_s3 + $0x5] ss:$0 sm:$0xff] }
 0x223   : > { %v2899_v36 = vunpack.c.l.b16 %v2739_v20  ;;  %v6395_v20 = vld [vmem:[%s6502_s3 + $0x3] ss:$0 sm:$0xff] }
 0x225   : > { %v3667_v0 = vpop.f32.mrf.mxu0 }
 0x226   : > { %3729 = vmatmul.bf16.gmra.mxu2 %v2901_v56 }
 0x227   : > { %v3558_v46 = vpop.f32.mrf.mxu3  ;;  %v3505_v5 = vpop.f32.mrf.mxu1 }
 0x229   : > { %v3527_v63 = vpop.f32.mrf.mxu2 }
 0x22a   : > { %v3528_v38 = vadd.f32 %v3527_v63, %v3498_v62 }
 0x22c   : > { %3880 = vmatmul.bf16.gmra.mxu3 %v4904_v53  ;;  %v6327_v29 = vadd.f32 %v3556_v9, %v3528_v38  ;;  %v2734_v9 = vrot.slane %v6306_v22, 5 }
 0x22d   : > { %v3669_v30 = vpop.f32.mrf.mxu0 }
 0x22e   : > { %v2735_v48 = vsel %vm6029_vm12, %v4547_v50, %v2734_v9 }
 0x22f   : > { %v3561_v39 = vpop.f32.mrf.mxu3  ;;  %v3508_v59 = vpop.f32.mrf.mxu1  ;;  %v2898_v12 = vunpack.c.l.b16 %v2735_v48 }
 0x231   : > { %v3529_v44 = vpop.f32.mrf.mxu2 }
 0x232   : > { %3710 = vmatmul.bf16.gmra.mxu1 %v2887_v21  ;;  %v3530_v11 = vadd.f32 %v3529_v44, %v3500_v37 }
 0x234   : > { %v6334_v52 = vadd.f32 %v3558_v46, %v3530_v11 }
 0x235   : > { %v3672_v47 = vpop.f32.mrf.mxu0 }
 0x236   : > { %3734 = vmatmul.bf16.gmra.mxu2 %v2902_v51 }
 0x237   : > { %v3563_v60 = vpop.f32.mrf.mxu3  ;;  %v3510_v40 = vpop.f32.mrf.mxu1 }
 0x239   : > { %v3532_v2 = vpop.f32.mrf.mxu2 }
 0x23a   : > { %v3533_v26 = vadd.f32 %v3532_v2, %v6302_v42  ;;  %v2903_v42 = vpack.c.b16 %v2899_v36, %v2898_v12 }
 0x23c   : > { %3885 = vmatmul.bf16.gmra.mxu3 %v4908_v33  ;;  %v6340_v56 = vadd.f32 %v3561_v39, %v3533_v26 }
 0x23f   : > { %v3566_v49 = vpop.f32.mrf.mxu3  ;;  %v3580_v13 = vpop.f32.mrf.mxu1 }
 0x240   : > { %v3581_v44 = vadd.f32 %v3580_v13, %v6313_v24 }
 0x241   : > { %v3534_v17 = vpop.f32.mrf.mxu2 }
 0x242   : > { %v3535_v1 = vadd.f32 %v3534_v17, %v3505_v5 }
 0x244   : > { %v6342_v35 = vadd.f32 %v3563_v60, %v3535_v1 }
 0x246   : > { %3739 = vmatmul.bf16.gmra.mxu2 %v2903_v42 }
 0x247   : > { %v3568_v22 = vpop.f32.mrf.mxu3  ;;  %v3582_v8 = vpop.f32.mrf.mxu1 }
 0x248   : > { %v3583_v60 = vadd.f32 %v3582_v8, %v6318_v6  ;;  %v6390_v6 = vld [vmem:[%s6502_s3 + $0x2] ss:$0 sm:$0xff] }
 0x249   : > { %v3537_v61 = vpop.f32.mrf.mxu2 }
 0x24a   : > { %v3538_v41 = vadd.f32 %v3537_v61, %v3508_v59 }
 0x24c   : > { %v6344_v25 = vadd.f32 %v3566_v49, %v3538_v41 }
 0x24f   : > { %v3638_v54 = vpop.f32.mrf.mxu3  ;;  %v3585_v32 = vpop.f32.mrf.mxu1 }
 0x250   : > { %v3586_v48 = vadd.f32 %v3585_v32, %v6327_v29  ;;  %v3674_v29 = vpop.f32.mrf.mxu0 }
 0x251   : > { %v3539_v46 = vpop.f32.mrf.mxu2 }
 0x252   : > { %v3540_v18 = vadd.f32 %v3539_v46, %v3510_v40  ;;  %v6379_v40 = vld [vmem:[%s6502_s3 + $0x4] ss:$0 sm:$0xff] }
 0x254   : > { %v6346_v63 = vadd.f32 %v3568_v22, %v3540_v18 }
 0x257   : > { %v3640_v53 = vpop.f32.mrf.mxu3  ;;  %v3587_v10 = vpop.f32.mrf.mxu1 }
 0x258   : > { %v3588_v32 = vadd.f32 %v3587_v10, %v6334_v52 }
 0x259   : > { %v3609_v5 = vpop.f32.mrf.mxu2 }
 0x25a   : > { %v3610_v14 = vadd.f32 %v3609_v5, %v3581_v44 }
 0x25c   : > { %v3639_v15 = vadd.f32 %v3638_v54, %v3610_v14 }
 0x25e   : > { %v3668_v33 = vadd.f32 %v3667_v0, %v3639_v15 }
 0x25f   : > { %v3643_v23 = vpop.f32.mrf.mxu3  ;;  %v6348_v55 = vpop.f32.mrf.mxu1 }
 0x260   : > { %v3591_v15 = vadd.f32 %v6348_v55, %v6340_v56 }
 0x261   : > { %v3611_v3 = vpop.f32.mrf.mxu2 }
 0x262   : > { %v3612_v11 = vadd.f32 %v3611_v3, %v3583_v60 }
 0x264   : > { %v3641_v9 = vadd.f32 %v3640_v53, %v3612_v11  ;;  %v3677_v11 = vpop.f32.mrf.mxu0 }
 0x266   : > { %v3670_v1 = vadd.f32 %v3669_v30, %v3641_v9 }
 0x267   : > { %v6350_v4 = vpop.f32.mrf.mxu3  ;;  %v6352_v43 = vpop.f32.mrf.mxu1 }
 0x269   : > { %v3614_v7 = vpop.f32.mrf.mxu2 }
 0x26a   : > { %v3615_v17 = vadd.f32 %v3614_v7, %v3586_v48  ;;  %v3593_v48 = vadd.f32 %v6352_v43, %v6342_v35 }
 0x26c   : > { %v3644_v41 = vadd.f32 %v3643_v23, %v3615_v17 }
 0x26e   : > { %v3673_v7 = vadd.f32 %v3672_v47, %v3644_v41 }
 0x26f   : > { %v6354_v58 = vpop.f32.mrf.mxu3  ;;  %v6356_v16 = vpop.f32.mrf.mxu1 }
 0x271   : > { %v3616_v62 = vpop.f32.mrf.mxu2 }
 0x272   : > { %v3617_v3 = vadd.f32 %v3616_v62, %v3588_v32 }
 0x274   : > { %v3646_v10 = vadd.f32 %v6350_v4, %v3617_v3 }
 0x277   : > { %v6358_v28 = vpop.f32.mrf.mxu3  ;;  %v6362_v38 = vpop.f32.mrf.mxu1 }
 0x279   : > { %v6360_v27 = vpop.f32.mrf.mxu2 }
 0x27f   : > { %v6364_v34 = vpop.f32.mrf.mxu3  ;;  %v3696_v59 = vpop.f32.mrf.mxu1 }
 0x280   : > { %v3697_v57 = vadd.f32 %v3696_v59, %v3668_v33  ;;  %v3620_v33 = vadd.f32 %v6360_v27, %v3591_v15 }
 0x281   : > { %v6366_v39 = vpop.f32.mrf.mxu2 }
 0x287   : > { %v6368_v19 = vpop.f32.mrf.mxu3  ;;  %v3698_v31 = vpop.f32.mrf.mxu1 }
 0x288   : > { %v3699_v22 = vadd.f32 %v3698_v31, %v3670_v1 }
 0x289   : > { %v6370_v21 = vpop.f32.mrf.mxu2 }
 0x28f   : > { %v3871_v51 = vpop.f32.mrf.mxu3  ;;  %v3701_v49 = vpop.f32.mrf.mxu1 }
 0x290   : > { %v3893_v24 = vmul.f32 %v6379_v40, %v3871_v51  ;;  %v3702_v44 = vadd.f32 %v3701_v49, %v3673_v7 }
 0x291   : > { %v6373_v37 = vpop.f32.mrf.mxu2 }
 0x292   : > { %v3903_v13 = vadd.f32 %v6385_v45, %v3893_v24 }
 0x297   : > { %v3873_v2 = vpop.f32.mrf.mxu3  ;;  %v3703_v5 = vpop.f32.mrf.mxu1 }
 0x298   : > { %v3894_v46 = vmul.f32 %v6379_v40, %v3873_v2  ;;  %v3675_v2 = vadd.f32 %v3674_v29, %v3646_v10 }
 0x299   : > { %v3725_v26 = vpop.f32.mrf.mxu2 }
 0x29a   : > { %v3726_v50 = vadd.f32 %v3725_v26, %v3697_v57  ;;  %v3904_v0 = vadd.f32 %v6385_v45, %v3894_v46  ;;  %v3704_v26 = vadd.f32 %v3703_v5, %v3675_v2 }
 0x29c   : > { %v3747_v36 = vmul.f32 %v6390_v6, %v3726_v50  ;;  %v3649_v50 = vadd.f32 %v6354_v58, %v3620_v33 }
 0x29e   : > { %v3757_v12 = vadd.f32 %v6395_v20, %v3747_v36  ;;  %v3678_v36 = vadd.f32 %v3677_v11, %v3649_v50 }
 0x29f   : > { %v3876_v42 = vpop.f32.mrf.mxu3  ;;  %v3706_v24 = vpop.f32.mrf.mxu1 }
 0x2a0   : > { %v3911_v8 = vadd.f32 %v3903_v13, %v3757_v12  ;;  %v3895_v51 = vmul.f32 %v6379_v40, %v3876_v42  ;;  %v3622_v13 = vadd.f32 %v6366_v39, %v3593_v48  ;;  %v3679_v12 = vpop.f32.mrf.mxu0  ;;  %v3707_v58 = vadd.f32 %v3706_v24, %v3678_v36 }
 0x2a1   : > { %v3727_v61 = vpop.f32.mrf.mxu2  ;;  %v3596_v39 = vadd.f32 %v6356_v16, %v6344_v25 }
 0x2a2   : > { %v3919_v54 = vmax.f32 %v3911_v8, 0.0  ;;  %v3728_v18 = vadd.f32 %v3727_v61, %v3699_v22  ;;  %v3905_v62 = vadd.f32 %v6385_v45, %v3895_v51  ;;  %v3651_v35 = vadd.f32 %v6358_v28, %v3622_v13 }
 0x2a3   : > { %v3625_v29 = vadd.f32 %v6370_v21, %v3596_v39 }
 0x2a4   : > { %3927 = vst [vmem:[%s6406_s8] sm:$0xff] %v3919_v54  ;;  %v3748_v53 = vmul.f32 %v6390_v6, %v3728_v18  ;;  %v3680_v32 = vadd.f32 %v3679_v12, %v3651_v35 }
 0x2a5   : > { %v3654_v7 = vadd.f32 %v6364_v34, %v3625_v29 }
 0x2a6   : > { %v3758_v23 = vadd.f32 %v6395_v20, %v3748_v53 }
 0x2a7   : > { %v3878_v59 = vpop.f32.mrf.mxu3  ;;  %v3708_v8 = vpop.f32.mrf.mxu1 }
 0x2a8   : > { %v3912_v14 = vadd.f32 %v3904_v0, %v3758_v23  ;;  %v3896_v55 = vmul.f32 %v6379_v40, %v3878_v59  ;;  %v3709_v5 = vadd.f32 %v3708_v8, %v3680_v32  ;;  %v3682_v16 = vpop.f32.mrf.mxu0 }
 0x2a9   : > { %v3730_v52 = vpop.f32.mrf.mxu2 }
 0x2aa   : > { %v3920_v30 = vmax.f32 %v3912_v14, 0.0  ;;  %v3731_v31 = vadd.f32 %v3730_v52, %v3702_v44  ;;  %v3906_v17 = vadd.f32 %v6385_v45, %v3896_v55  ;;  %v3598_v44 = vadd.f32 %v6362_v38, %v6346_v63 }
 0x2ab   : > { %v3683_v52 = vadd.f32 %v3682_v16, %v3654_v7 }
 0x2ac   : > { %3928 = vst [vmem:[%s6406_s8 + $0x8] sm:$0xff] %v3920_v30  ;;  %v3749_v60 = vmul.f32 %v6390_v6, %v3731_v31  ;;  %v3627_v51 = vadd.f32 %v6373_v37, %v3598_v44 }
 0x2ae   : > { %v3759_v57 = vadd.f32 %v6395_v20, %v3749_v60  ;;  %v3656_v60 = vadd.f32 %v6368_v19, %v3627_v51 }
 0x2af   : > { %v3881_v9 = vpop.f32.mrf.mxu3  ;;  %v3711_v59 = vpop.f32.mrf.mxu1 }
 0x2b0   : > { %v3913_v4 = vadd.f32 %v3905_v62, %v3759_v57  ;;  %v3897_v22 = vmul.f32 %v6379_v40, %v3881_v9  ;;  %v3712_v30 = vadd.f32 %v3711_v59, %v3683_v52  ;;  %v3684_v33 = vpop.f32.mrf.mxu0 }
 0x2b1   : > { %v3732_v47 = vpop.f32.mrf.mxu2  ;;  %v3685_v57 = vadd.f32 %v3684_v33, %v3656_v60 }
 0x2b2   : > { %v3921_v56 = vmax.f32 %v3913_v4, 0.0  ;;  %v3733_v49 = vadd.f32 %v3732_v47, %v3704_v26  ;;  %v3907_v46 = vadd.f32 %v6385_v45, %v3897_v22 }
 0x2b4   : > { %3929 = vst [vmem:[%s6406_s8 + $0x10] sm:$0xff] %v3921_v56  ;;  %v3750_v27 = vmul.f32 %v6390_v6, %v3733_v49 }
 0x2b6   : > { %v3760_v1 = vadd.f32 %v6395_v20, %v3750_v27 }
 0x2b7   : > { %v3883_v54 = vpop.f32.mrf.mxu3  ;;  %v3713_v2 = vpop.f32.mrf.mxu1 }
 0x2b8   : > { %v3914_v42 = vadd.f32 %v3906_v17, %v3760_v1  ;;  %v3898_v23 = vmul.f32 %v6379_v40, %v3883_v54  ;;  %v3714_v4 = vadd.f32 %v3713_v2, %v3685_v57 }
 0x2b9   : > { %v3735_v61 = vpop.f32.mrf.mxu2 }
 0x2ba   : > { %v3922_v43 = vmax.f32 %v3914_v42, 0.0  ;;  %v3736_v41 = vadd.f32 %v3735_v61, %v3707_v58  ;;  %v3908_v10 = vadd.f32 %v6385_v45, %v3898_v23 }
 0x2bc   : > { %3930 = vst [vmem:[%s6406_s8 + $0x18] sm:$0xff] %v3922_v43  ;;  %v3751_v18 = vmul.f32 %v6390_v6, %v3736_v41 }
 0x2be   : > { %v3761_v53 = vadd.f32 %v6395_v20, %v3751_v18 }
 0x2bf   : > { %v3886_v14 = vpop.f32.mrf.mxu3 }
 0x2c0   : > { %v3915_v3 = vadd.f32 %v3907_v46, %v3761_v53  ;;  %v3899_v15 = vmul.f32 %v6379_v40, %v3886_v14 }
 0x2c1   : > { %v3737_v28 = vpop.f32.mrf.mxu2 }
 0x2c2   : > { %v3923_v0 = vmax.f32 %v3915_v3, 0.0  ;;  %v3738_v25 = vadd.f32 %v3737_v28, %v3709_v5  ;;  %v3909_v11 = vadd.f32 %v6385_v45, %v3899_v15 }
 0x2c4   : > { %3931 = vst [vmem:[%s6406_s8 + $0x20] sm:$0xff] %v3923_v0  ;;  %v3752_v21 = vmul.f32 %v6390_v6, %v3738_v25 }
 0x2c6   : > { %v3762_v34 = vadd.f32 %v6395_v20, %v3752_v21 }
 0x2c7   : > { %v3888_v26 = vpop.f32.mrf.mxu3 }
 0x2c8   : > { %v3916_v31 = vadd.f32 %v3908_v10, %v3762_v34  ;;  %v3900_v50 = vmul.f32 %v6379_v40, %v3888_v26 }
 0x2c9   : > { %v3740_v62 = vpop.f32.mrf.mxu2 }
 0x2ca   : > { %v3924_v63 = vmax.f32 %v3916_v31, 0.0  ;;  %v3741_v38 = vadd.f32 %v3740_v62, %v3712_v30  ;;  %v3910_v49 = vadd.f32 %v6385_v45, %v3900_v50 }
 0x2cc   : > { %3932 = vst [vmem:[%s6406_s8 + $0x28] sm:$0xff] %v3924_v63  ;;  %v3753_v37 = vmul.f32 %v6390_v6, %v3741_v38 }
 0x2ce   : > { %v3763_v24 = vadd.f32 %v6395_v20, %v3753_v37 }
 0x2d0   : > { %v3917_v47 = vadd.f32 %v3909_v11, %v3763_v24 }
 0x2d1   : > { %v3742_v9 = vpop.f32.mrf.mxu2 }
 0x2d2   : > { %v3925_v19 = vmax.f32 %v3917_v47, 0.0  ;;  %v3743_v56 = vadd.f32 %v3742_v9, %v3714_v4 }
 0x2d4   : > { %3933 = vst [vmem:[%s6406_s8 + $0x30] sm:$0xff] %v3925_v19  ;;  %v3754_v55 = vmul.f32 %v6390_v6, %v3743_v56 }
 0x2d6   : > { %v3764_v48 = vadd.f32 %v6395_v20, %v3754_v55 }
 0x2d8   : > { %v3918_v27 = vadd.f32 %v3910_v49, %v3764_v48 }
 0x2da   : > { %v3926_v13 = vmax.f32 %v3918_v27, 0.0 }
 0x2dc   : > { %3934 = vst [vmem:[%s6406_s8 + $0x38] sm:$0xff] %v3926_v13 }
 0x2dd   : > { %5288 = shalt.err (!%p5285_p9)
}
 0x2de   : > { %s5349_s27 = smov 128   ;;  %s5350_s8 = smov 8  }
 0x2df   : > { %5158 = dma.vmem_to_hbm [thread:$0]  (%p5421_p4), %s3951_s12, 1024, %s3953_s13, %s3936_s21, %s5349_s27, %s5349_s27, %s5350_s8  }
 0x2e0 PF: > { %p5170_p10 = scmp.ge.s32.totalorder %s5343_s23, 2  ;;  %s3967_s9 = sand.u32 1, %s5323_s18  }
 0x2e1   : > { %s3968_s10 = scalar_lea.sflag [#allocation5], %s3967_s9 }
 0x2e2   : > { %p5165_p11 = pnand %p5170_p10, %p5428_p8 }
 0x2e4   : > { %p5166_p12 = pneg %p5165_p11 }
 0x2e6   : > { %5318 = dma.done.wait (%p5166_p12), %s3968_s10, 1024  }
 0x2e7   : > { %5320 = vsyncadd (%p5166_p12), %s3968_s10, 4294966272  ;;  %s19_s23 = sadd.s32 1, %s5343_s23   ;;  %s6517_s18 = smov %s5327_s19 }
 0x2e8   : > { %p16_p13 = scmp.ge.s32.totalorder %s19_s23, 4   ;;  %s6518_s19 = smov %s5331_s20 }
 0x2e9   : > { %s6519_s20 = smov %s5434_s6  ;;  %s6520_s21 = smov %s5339_s22 }
 0x2ea   : > { %s6521_s22 = smov %s6523_s26  ;;  %18 = sbr.rel (!%p16_p13) target bundleno = 5 (0x5), region = 93 }
 0x2ef   :  { %3974 = vsyncpa [#allocation4], 1 }
 0x2f0   :  { %3976 = vsyncpa [#allocation4 + $0x1], 1 }
 0x2f1   :  { %3977 = vsyncpa [#allocation5], 1 }
 0x2f2   :  { %3979 = vsyncpa [#allocation5 + $0x1], 1 }

</bundles_post_ra>
